<compile_context>
chip_gen: v7x
topology: tpu7x:2x2x1
jax: 0.10.0
libtpu: 0.0.40
codegen_flags: <defaults>
</compile_context>

<pallas_src>
import jax
import jax.numpy as jnp
import numpy as np
from jax.experimental import pallas as pl
from jax.experimental.pallas import tpu as pltpu


def _make_kernel(c_total, H, W):
    inv_c = 1.0 / float(c_total)

    def kernel(x_ref, w_ref, o_ref, sum_acc, max_acc):
        c_idx = pl.program_id(1)

        x = x_ref[0].astype(jnp.float32)           # (C_TILE, H, W)
        part_sum = jnp.sum(x, axis=0)              # (H, W): pure VPU adds
        part_max = jnp.max(x, axis=0)              # (H, W): pure VPU maxes

        @pl.when(c_idx == 0)
        def _init():
            sum_acc[...] = part_sum
            max_acc[...] = part_max

        @pl.when(c_idx != 0)
        def _accumulate():
            sum_acc[...] += part_sum
            max_acc[...] = jnp.maximum(max_acc[...], part_max)

        @pl.when(c_idx == pl.num_programs(1) - 1)
        def _finalize():
            avg = sum_acc[...] * inv_c             # (H, W) channel mean
            mx = max_acc[...]                      # (H, W) channel max

            # Zero-pad by 3 on every side (Conv2d padding=3) via concatenation.
            zc = jnp.zeros((H, 3), jnp.float32)
            zr = jnp.zeros((3, W + 6), jnp.float32)

            def pad3(m):
                m = jnp.concatenate([zc, m, zc], axis=1)     # (H,   W+6)
                return jnp.concatenate([zr, m, zr], axis=0)  # (H+6, W+6)

            pa = pad3(avg)
            pm = pad3(mx)

            # 7x7 cross-correlation (PyTorch Conv2d):
            #   out[h, w] = bias + sum_{c,i,j} w[c,i,j] * padded_c[h+i, w+j]
            # Weights are scalars read from SMEM; shifts are static slices.
            acc = jnp.zeros((H, W), jnp.float32) + w_ref[98]   # bias
            for i in range(7):
                for j in range(7):
                    acc = acc + pa[i:i + H, j:j + W] * w_ref[i * 7 + j]
                    acc = acc + pm[i:i + H, j:j + W] * w_ref[49 + i * 7 + j]

            o_ref[0] = jax.nn.sigmoid(acc).astype(o_ref.dtype)

    return kernel


def _pick_c_tile(C, H, W, target_bytes=2 << 20):
    """Largest channel tile that (a) keeps the padded VMEM footprint of one x
    block around `target_bytes` and (b) divides C exactly."""
    hp = ((H + 7) // 8) * 8
    wp = ((W + 127) // 128) * 128
    per_channel = hp * wp * 4
    budget = max(1, target_bytes // per_channel)
    if C <= budget:
        return C
    for t in range(int(budget), 0, -1):
        if C % t == 0:
            return t
    return C


def spatial_attention(x, conv_w, conv_b):
    """Forward pass of SpatialAttentionModule.

    x:       (B, C, H, W)
    conv_w:  (1, 2, 7, 7)  Conv2d(2, 1, kernel_size=7, padding=3) weight
    conv_b:  (1,)          Conv2d bias
    returns  (B, 1, H, W)  sigmoid spatial attention map
    """
    B, C, H, W = x.shape
    assert conv_w.shape == (1, 2, 7, 7) and conv_b.shape == (1,)

    c_tile = _pick_c_tile(C, H, W)
    nc = C // c_tile

    # w_flat[c*49 + i*7 + j] = conv_w[0, c, i, j]; w_flat[98] = bias.
    # Lives in SMEM; taps are read as scalars inside the kernel.
    w_flat = jnp.concatenate(
        [conv_w.reshape(98), conv_b.reshape(1)]).astype(jnp.float32)

    hp = ((H + 7) // 8) * 8
    wp = ((W + 127) // 128) * 128
    block_bytes = c_tile * hp * wp * 4
    vmem_limit = int(min(64 << 20, max(16 << 20, 4 * block_bytes + (4 << 20))))

    itemsize = jnp.dtype(x.dtype).itemsize
    cost = pl.CostEstimate(
        flops=2 * B * C * H * W + 4 * 98 * B * H * W,
        transcendentals=B * H * W,
        bytes_accessed=B * C * H * W * itemsize + B * H * W * itemsize + 99 * 4,
    )

    out = pl.pallas_call(
        _make_kernel(C, H, W),
        out_shape=jax.ShapeDtypeStruct((B, H, W), x.dtype),
        grid_spec=pltpu.PrefetchScalarGridSpec(
            num_scalar_prefetch=0,
            grid=(B, nc),
            in_specs=[
                pl.BlockSpec((1, c_tile, H, W), lambda b, c: (b, c, 0, 0)),
                pl.BlockSpec(memory_space=pltpu.MemorySpace.SMEM),
            ],
            out_specs=pl.BlockSpec((1, H, W), lambda b, c: (b, 0, 0)),
            scratch_shapes=[
                pltpu.VMEM((H, W), jnp.float32),   # running channel sum
                pltpu.VMEM((H, W), jnp.float32),   # running channel max
            ],
        ),
        compiler_params=pltpu.CompilerParams(
            dimension_semantics=("parallel", "arbitrary"),
            vmem_limit_bytes=vmem_limit,
        ),
        cost_estimate=cost,
    )(x, w_flat)

    return out.reshape(B, 1, H, W)


def _reference(x, conv_w, conv_b):
    """Pure-JAX replica of the PyTorch module (exact elementwise f32 math)."""
    B, C, H, W = x.shape
    avg = jnp.mean(x, axis=1)                       # (B, H, W)
    mx = jnp.max(x, axis=1)                         # (B, H, W)
    maps = jnp.stack([avg, mx], axis=1)             # (B, 2, H, W)
    p = jnp.pad(maps, ((0, 0), (0, 0), (3, 3), (3, 3)))
    out = jnp.zeros((B, H, W), jnp.float32) + conv_b[0]
    for c in range(2):
        for i in range(7):
            for j in range(7):
                out = out + conv_w[0, c, i, j] * p[:, c, i:i + H, j:j + W]
    return jax.nn.sigmoid(out)[:, None]             # (B, 1, H, W)


if __name__ == "__main__":
    B, C, H, W = 2, 4, 16, 16

    key = jax.random.PRNGKey(0)
    kx, kw, kb = jax.random.split(key, 3)

    x = jax.random.normal(kx, (B, C, H, W), dtype=jnp.float32)
    # Conv2d(2, 1, kernel_size=7, padding=3): weight (1, 2, 7, 7), bias (1,)
    conv_w = jax.random.normal(kw, (1, 2, 7, 7), dtype=jnp.float32) * 0.1
    conv_b = jax.random.normal(kb, (1,), dtype=jnp.float32) * 0.1

    out = spatial_attention(x, conv_w, conv_b)
    out = jax.block_until_ready(out)

    ref = _reference(x, conv_w, conv_b)
    np.testing.assert_allclose(np.asarray(out), np.asarray(ref),
                               rtol=1e-5, atol=1e-5)
    assert out.shape == (B, 1, H, W)
    print("KERNEL_OK")
</pallas_src>

<mosaic_0001>
module attributes {stable_mosaic.version = 11 : i64} {
  func.func @kernel(%arg0: i32, %arg1: i32, %arg2: memref<1x4x16x16xf32, #tpu.memory_space<vmem>>, %arg3: memref<99xf32, #tpu.memory_space<smem>>, %arg4: memref<1x16x16xf32, #tpu.memory_space<vmem>>, %arg5: memref<16x16xf32, #tpu.memory_space<vmem>>, %arg6: memref<16x16xf32, #tpu.memory_space<vmem>>) attributes {dimension_semantics = [#tpu.dimension_semantics<parallel>, #tpu.dimension_semantics<arbitrary>], iteration_bounds = array<i64: 2, 1>, scalar_prefetch = 0 : i64, scratch_operands = 2 : i64, tpu.core_type = #tpu.core_type<tc>, window_params = [{transform_indices = @transform_0, window_bounds = array<i64: 1, 4, 16, 16>}, {transform_indices = @transform_1, window_bounds = array<i64: 99>}, {transform_indices = @transform_2, window_bounds = array<i64: 1, 16, 16>}]} {
    %c0 = arith.constant 0 : index
    %c0_0 = arith.constant 0 : index
    %c0_1 = arith.constant 0 : index
    %c0_2 = arith.constant 0 : index
    %0 = vector.load %arg2[%c0, %c0_0, %c0_1, %c0_2] : memref<1x4x16x16xf32, #tpu.memory_space<vmem>>, vector<1x4x16x16xf32>
    %1 = vector.shape_cast %0 : vector<1x4x16x16xf32> to vector<4x16x16xf32>
    %cst = arith.constant dense<0.000000e+00> : vector<16x16xf32>
    %2 = vector.multi_reduction <add>, %1, %cst [0] : vector<4x16x16xf32> to vector<16x16xf32>
    %cst_3 = arith.constant dense<0xFF800000> : vector<16x16xf32>
    %3 = vector.multi_reduction <maximumf>, %1, %cst_3 [0] : vector<4x16x16xf32> to vector<16x16xf32>
    %c0_i32 = arith.constant 0 : i32
    %4 = arith.cmpi eq, %arg1, %c0_i32 : i32
    %5 = arith.extui %4 : i1 to i32
    %c0_i32_4 = arith.constant 0 : i32
    %6 = arith.cmpi ne, %5, %c0_i32_4 : i32
    scf.if %6 {
      %c0_9 = arith.constant 0 : index
      %c0_10 = arith.constant 0 : index
      %13 = vector.load %arg5[%c0_9, %c0_10] : memref<16x16xf32, #tpu.memory_space<vmem>>, vector<16x16xf32>
      tpu.vector_store %arg5[%c0_9, %c0_10], %2 {strides = array<i32>} : memref<16x16xf32, #tpu.memory_space<vmem>>, vector<16x16xf32>,
      %c0_11 = arith.constant 0 : index
      %c0_12 = arith.constant 0 : index
      %14 = vector.load %arg6[%c0_11, %c0_12] : memref<16x16xf32, #tpu.memory_space<vmem>>, vector<16x16xf32>
      tpu.vector_store %arg6[%c0_11, %c0_12], %3 {strides = array<i32>} : memref<16x16xf32, #tpu.memory_space<vmem>>, vector<16x16xf32>,
    } else {
    }
    %c0_i32_5 = arith.constant 0 : i32
    %7 = arith.cmpi ne, %arg1, %c0_i32_5 : i32
    %8 = arith.extui %7 : i1 to i32
    %c0_i32_6 = arith.constant 0 : i32
    %9 = arith.cmpi ne, %8, %c0_i32_6 : i32
    scf.if %9 {
      %c0_9 = arith.constant 0 : index
      %c0_10 = arith.constant 0 : index
      %13 = vector.load %arg5[%c0_9, %c0_10] : memref<16x16xf32, #tpu.memory_space<vmem>>, vector<16x16xf32>
      %14 = arith.addf %13, %2 : vector<16x16xf32>
      %c0_11 = arith.constant 0 : index
      %c0_12 = arith.constant 0 : index
      %15 = vector.load %arg5[%c0_11, %c0_12] : memref<16x16xf32, #tpu.memory_space<vmem>>, vector<16x16xf32>
      tpu.vector_store %arg5[%c0_11, %c0_12], %14 {strides = array<i32>} : memref<16x16xf32, #tpu.memory_space<vmem>>, vector<16x16xf32>,
      %c0_13 = arith.constant 0 : index
      %c0_14 = arith.constant 0 : index
      %16 = vector.load %arg6[%c0_13, %c0_14] : memref<16x16xf32, #tpu.memory_space<vmem>>, vector<16x16xf32>
      %17 = arith.maximumf %16, %3 : vector<16x16xf32>
      %c0_15 = arith.constant 0 : index
      %c0_16 = arith.constant 0 : index
      %18 = vector.load %arg6[%c0_15, %c0_16] : memref<16x16xf32, #tpu.memory_space<vmem>>, vector<16x16xf32>
      tpu.vector_store %arg6[%c0_15, %c0_16], %17 {strides = array<i32>} : memref<16x16xf32, #tpu.memory_space<vmem>>, vector<16x16xf32>,
    } else {
    }
    %c0_i32_7 = arith.constant 0 : i32
    %10 = arith.cmpi eq, %arg1, %c0_i32_7 : i32
    %11 = arith.extui %10 : i1 to i32
    %c0_i32_8 = arith.constant 0 : i32
    %12 = arith.cmpi ne, %11, %c0_i32_8 : i32
    scf.if %12 {
      %c0_9 = arith.constant 0 : index
      %c0_10 = arith.constant 0 : index
      %13 = vector.load %arg5[%c0_9, %c0_10] : memref<16x16xf32, #tpu.memory_space<vmem>>, vector<16x16xf32>
      %cst_11 = arith.constant 2.500000e-01 : f32
      %14 = vector.broadcast %cst_11 : f32 to vector<16x16xf32>
      %15 = arith.mulf %13, %14 : vector<16x16xf32>
      %c0_12 = arith.constant 0 : index
      %c0_13 = arith.constant 0 : index
      %16 = vector.load %arg6[%c0_12, %c0_13] : memref<16x16xf32, #tpu.memory_space<vmem>>, vector<16x16xf32>
      %cst_14 = arith.constant 0.000000e+00 : f32
      %17 = vector.broadcast %cst_14 : f32 to vector<16x3xf32>
      %cst_15 = arith.constant 0.000000e+00 : f32
      %18 = vector.broadcast %cst_15 : f32 to vector<3x22xf32>
      %19 = tpu.concatenate %17, %15, %17 in 1 : vector<16x3xf32>, vector<16x16xf32>, vector<16x3xf32> -> vector<16x22xf32>
      %20 = tpu.concatenate %18, %19, %18 in 0 : vector<3x22xf32>, vector<16x22xf32>, vector<3x22xf32> -> vector<22x22xf32>
      %21 = tpu.concatenate %17, %16, %17 in 1 : vector<16x3xf32>, vector<16x16xf32>, vector<16x3xf32> -> vector<16x22xf32>
      %22 = tpu.concatenate %18, %21, %18 in 0 : vector<3x22xf32>, vector<16x22xf32>, vector<3x22xf32> -> vector<22x22xf32>
      %cst_16 = arith.constant 0.000000e+00 : f32
      %23 = vector.broadcast %cst_16 : f32 to vector<16x16xf32>
      %c98 = arith.constant 98 : index
      %24 = memref.load %arg3[%c98] : memref<99xf32, #tpu.memory_space<smem>>
      %25 = vector.broadcast %24 : f32 to vector<16x16xf32>
      %26 = arith.addf %23, %25 : vector<16x16xf32>
      %27 = vector.extract_strided_slice %20 {offsets = [0, 0], sizes = [16, 16], strides = [1, 1]} : vector<22x22xf32> to vector<16x16xf32>
      %c0_17 = arith.constant 0 : index
      %28 = memref.load %arg3[%c0_17] : memref<99xf32, #tpu.memory_space<smem>>
      %29 = vector.broadcast %28 : f32 to vector<16x16xf32>
      %30 = arith.mulf %27, %29 : vector<16x16xf32>
      %31 = arith.addf %26, %30 : vector<16x16xf32>
      %32 = vector.extract_strided_slice %22 {offsets = [0, 0], sizes = [16, 16], strides = [1, 1]} : vector<22x22xf32> to vector<16x16xf32>
      %c49 = arith.constant 49 : index
      %33 = memref.load %arg3[%c49] : memref<99xf32, #tpu.memory_space<smem>>
      %34 = vector.broadcast %33 : f32 to vector<16x16xf32>
      %35 = arith.mulf %32, %34 : vector<16x16xf32>
      %36 = arith.addf %31, %35 : vector<16x16xf32>
      %37 = vector.extract_strided_slice %20 {offsets = [0, 1], sizes = [16, 16], strides = [1, 1]} : vector<22x22xf32> to vector<16x16xf32>
      %c1 = arith.constant 1 : index
      %38 = memref.load %arg3[%c1] : memref<99xf32, #tpu.memory_space<smem>>
      %39 = vector.broadcast %38 : f32 to vector<16x16xf32>
      %40 = arith.mulf %37, %39 : vector<16x16xf32>
      %41 = arith.addf %36, %40 : vector<16x16xf32>
      %42 = vector.extract_strided_slice %22 {offsets = [0, 1], sizes = [16, 16], strides = [1, 1]} : vector<22x22xf32> to vector<16x16xf32>
      %c50 = arith.constant 50 : index
      %43 = memref.load %arg3[%c50] : memref<99xf32, #tpu.memory_space<smem>>
      %44 = vector.broadcast %43 : f32 to vector<16x16xf32>
      %45 = arith.mulf %42, %44 : vector<16x16xf32>
      %46 = arith.addf %41, %45 : vector<16x16xf32>
      %47 = vector.extract_strided_slice %20 {offsets = [0, 2], sizes = [16, 16], strides = [1, 1]} : vector<22x22xf32> to vector<16x16xf32>
      %c2 = arith.constant 2 : index
      %48 = memref.load %arg3[%c2] : memref<99xf32, #tpu.memory_space<smem>>
      %49 = vector.broadcast %48 : f32 to vector<16x16xf32>
      %50 = arith.mulf %47, %49 : vector<16x16xf32>
      %51 = arith.addf %46, %50 : vector<16x16xf32>
      %52 = vector.extract_strided_slice %22 {offsets = [0, 2], sizes = [16, 16], strides = [1, 1]} : vector<22x22xf32> to vector<16x16xf32>
      %c51 = arith.constant 51 : index
      %53 = memref.load %arg3[%c51] : memref<99xf32, #tpu.memory_space<smem>>
      %54 = vector.broadcast %53 : f32 to vector<16x16xf32>
      %55 = arith.mulf %52, %54 : vector<16x16xf32>
      %56 = arith.addf %51, %55 : vector<16x16xf32>
      %57 = vector.extract_strided_slice %20 {offsets = [0, 3], sizes = [16, 16], strides = [1, 1]} : vector<22x22xf32> to vector<16x16xf32>
      %c3 = arith.constant 3 : index
      %58 = memref.load %arg3[%c3] : memref<99xf32, #tpu.memory_space<smem>>
      %59 = vector.broadcast %58 : f32 to vector<16x16xf32>
      %60 = arith.mulf %57, %59 : vector<16x16xf32>
      %61 = arith.addf %56, %60 : vector<16x16xf32>
      %62 = vector.extract_strided_slice %22 {offsets = [0, 3], sizes = [16, 16], strides = [1, 1]} : vector<22x22xf32> to vector<16x16xf32>
      %c52 = arith.constant 52 : index
      %63 = memref.load %arg3[%c52] : memref<99xf32, #tpu.memory_space<smem>>
      %64 = vector.broadcast %63 : f32 to vector<16x16xf32>
      %65 = arith.mulf %62, %64 : vector<16x16xf32>
      %66 = arith.addf %61, %65 : vector<16x16xf32>
      %67 = vector.extract_strided_slice %20 {offsets = [0, 4], sizes = [16, 16], strides = [1, 1]} : vector<22x22xf32> to vector<16x16xf32>
      %c4 = arith.constant 4 : index
      %68 = memref.load %arg3[%c4] : memref<99xf32, #tpu.memory_space<smem>>
      %69 = vector.broadcast %68 : f32 to vector<16x16xf32>
      %70 = arith.mulf %67, %69 : vector<16x16xf32>
      %71 = arith.addf %66, %70 : vector<16x16xf32>
      %72 = vector.extract_strided_slice %22 {offsets = [0, 4], sizes = [16, 16], strides = [1, 1]} : vector<22x22xf32> to vector<16x16xf32>
      %c53 = arith.constant 53 : index
      %73 = memref.load %arg3[%c53] : memref<99xf32, #tpu.memory_space<smem>>
      %74 = vector.broadcast %73 : f32 to vector<16x16xf32>
      %75 = arith.mulf %72, %74 : vector<16x16xf32>
      %76 = arith.addf %71, %75 : vector<16x16xf32>
      %77 = vector.extract_strided_slice %20 {offsets = [0, 5], sizes = [16, 16], strides = [1, 1]} : vector<22x22xf32> to vector<16x16xf32>
      %c5 = arith.constant 5 : index
      %78 = memref.load %arg3[%c5] : memref<99xf32, #tpu.memory_space<smem>>
      %79 = vector.broadcast %78 : f32 to vector<16x16xf32>
      %80 = arith.mulf %77, %79 : vector<16x16xf32>
      %81 = arith.addf %76, %80 : vector<16x16xf32>
      %82 = vector.extract_strided_slice %22 {offsets = [0, 5], sizes = [16, 16], strides = [1, 1]} : vector<22x22xf32> to vector<16x16xf32>
      %c54 = arith.constant 54 : index
      %83 = memref.load %arg3[%c54] : memref<99xf32, #tpu.memory_space<smem>>
      %84 = vector.broadcast %83 : f32 to vector<16x16xf32>
      %85 = arith.mulf %82, %84 : vector<16x16xf32>
      %86 = arith.addf %81, %85 : vector<16x16xf32>
      %87 = vector.extract_strided_slice %20 {offsets = [0, 6], sizes = [16, 16], strides = [1, 1]} : vector<22x22xf32> to vector<16x16xf32>
      %c6 = arith.constant 6 : index
      %88 = memref.load %arg3[%c6] : memref<99xf32, #tpu.memory_space<smem>>
      %89 = vector.broadcast %88 : f32 to vector<16x16xf32>
      %90 = arith.mulf %87, %89 : vector<16x16xf32>
      %91 = arith.addf %86, %90 : vector<16x16xf32>
      %92 = vector.extract_strided_slice %22 {offsets = [0, 6], sizes = [16, 16], strides = [1, 1]} : vector<22x22xf32> to vector<16x16xf32>
      %c55 = arith.constant 55 : index
      %93 = memref.load %arg3[%c55] : memref<99xf32, #tpu.memory_space<smem>>
      %94 = vector.broadcast %93 : f32 to vector<16x16xf32>
      %95 = arith.mulf %92, %94 : vector<16x16xf32>
      %96 = arith.addf %91, %95 : vector<16x16xf32>
      %97 = vector.extract_strided_slice %20 {offsets = [1, 0], sizes = [16, 16], strides = [1, 1]} : vector<22x22xf32> to vector<16x16xf32>
      %c7 = arith.constant 7 : index
      %98 = memref.load %arg3[%c7] : memref<99xf32, #tpu.memory_space<smem>>
      %99 = vector.broadcast %98 : f32 to vector<16x16xf32>
      %100 = arith.mulf %97, %99 : vector<16x16xf32>
      %101 = arith.addf %96, %100 : vector<16x16xf32>
      %102 = vector.extract_strided_slice %22 {offsets = [1, 0], sizes = [16, 16], strides = [1, 1]} : vector<22x22xf32> to vector<16x16xf32>
      %c56 = arith.constant 56 : index
      %103 = memref.load %arg3[%c56] : memref<99xf32, #tpu.memory_space<smem>>
      %104 = vector.broadcast %103 : f32 to vector<16x16xf32>
      %105 = arith.mulf %102, %104 : vector<16x16xf32>
      %106 = arith.addf %101, %105 : vector<16x16xf32>
      %107 = vector.extract_strided_slice %20 {offsets = [1, 1], sizes = [16, 16], strides = [1, 1]} : vector<22x22xf32> to vector<16x16xf32>
      %c8 = arith.constant 8 : index
      %108 = memref.load %arg3[%c8] : memref<99xf32, #tpu.memory_space<smem>>
      %109 = vector.broadcast %108 : f32 to vector<16x16xf32>
      %110 = arith.mulf %107, %109 : vector<16x16xf32>
      %111 = arith.addf %106, %110 : vector<16x16xf32>
      %112 = vector.extract_strided_slice %22 {offsets = [1, 1], sizes = [16, 16], strides = [1, 1]} : vector<22x22xf32> to vector<16x16xf32>
      %c57 = arith.constant 57 : index
      %113 = memref.load %arg3[%c57] : memref<99xf32, #tpu.memory_space<smem>>
      %114 = vector.broadcast %113 : f32 to vector<16x16xf32>
      %115 = arith.mulf %112, %114 : vector<16x16xf32>
      %116 = arith.addf %111, %115 : vector<16x16xf32>
      %117 = vector.extract_strided_slice %20 {offsets = [1, 2], sizes = [16, 16], strides = [1, 1]} : vector<22x22xf32> to vector<16x16xf32>
      %c9 = arith.constant 9 : index
      %118 = memref.load %arg3[%c9] : memref<99xf32, #tpu.memory_space<smem>>
      %119 = vector.broadcast %118 : f32 to vector<16x16xf32>
      %120 = arith.mulf %117, %119 : vector<16x16xf32>
      %121 = arith.addf %116, %120 : vector<16x16xf32>
      %122 = vector.extract_strided_slice %22 {offsets = [1, 2], sizes = [16, 16], strides = [1, 1]} : vector<22x22xf32> to vector<16x16xf32>
      %c58 = arith.constant 58 : index
      %123 = memref.load %arg3[%c58] : memref<99xf32, #tpu.memory_space<smem>>
      %124 = vector.broadcast %123 : f32 to vector<16x16xf32>
      %125 = arith.mulf %122, %124 : vector<16x16xf32>
      %126 = arith.addf %121, %125 : vector<16x16xf32>
      %127 = vector.extract_strided_slice %20 {offsets = [1, 3], sizes = [16, 16], strides = [1, 1]} : vector<22x22xf32> to vector<16x16xf32>
      %c10 = arith.constant 10 : index
      %128 = memref.load %arg3[%c10] : memref<99xf32, #tpu.memory_space<smem>>
      %129 = vector.broadcast %128 : f32 to vector<16x16xf32>
      %130 = arith.mulf %127, %129 : vector<16x16xf32>
      %131 = arith.addf %126, %130 : vector<16x16xf32>
      %132 = vector.extract_strided_slice %22 {offsets = [1, 3], sizes = [16, 16], strides = [1, 1]} : vector<22x22xf32> to vector<16x16xf32>
      %c59 = arith.constant 59 : index
      %133 = memref.load %arg3[%c59] : memref<99xf32, #tpu.memory_space<smem>>
      %134 = vector.broadcast %133 : f32 to vector<16x16xf32>
      %135 = arith.mulf %132, %134 : vector<16x16xf32>
      %136 = arith.addf %131, %135 : vector<16x16xf32>
      %137 = vector.extract_strided_slice %20 {offsets = [1, 4], sizes = [16, 16], strides = [1, 1]} : vector<22x22xf32> to vector<16x16xf32>
      %c11 = arith.constant 11 : index
      %138 = memref.load %arg3[%c11] : memref<99xf32, #tpu.memory_space<smem>>
      %139 = vector.broadcast %138 : f32 to vector<16x16xf32>
      %140 = arith.mulf %137, %139 : vector<16x16xf32>
      %141 = arith.addf %136, %140 : vector<16x16xf32>
      %142 = vector.extract_strided_slice %22 {offsets = [1, 4], sizes = [16, 16], strides = [1, 1]} : vector<22x22xf32> to vector<16x16xf32>
      %c60 = arith.constant 60 : index
      %143 = memref.load %arg3[%c60] : memref<99xf32, #tpu.memory_space<smem>>
      %144 = vector.broadcast %143 : f32 to vector<16x16xf32>
      %145 = arith.mulf %142, %144 : vector<16x16xf32>
      %146 = arith.addf %141, %145 : vector<16x16xf32>
      %147 = vector.extract_strided_slice %20 {offsets = [1, 5], sizes = [16, 16], strides = [1, 1]} : vector<22x22xf32> to vector<16x16xf32>
      %c12 = arith.constant 12 : index
      %148 = memref.load %arg3[%c12] : memref<99xf32, #tpu.memory_space<smem>>
      %149 = vector.broadcast %148 : f32 to vector<16x16xf32>
      %150 = arith.mulf %147, %149 : vector<16x16xf32>
      %151 = arith.addf %146, %150 : vector<16x16xf32>
      %152 = vector.extract_strided_slice %22 {offsets = [1, 5], sizes = [16, 16], strides = [1, 1]} : vector<22x22xf32> to vector<16x16xf32>
      %c61 = arith.constant 61 : index
      %153 = memref.load %arg3[%c61] : memref<99xf32, #tpu.memory_space<smem>>
      %154 = vector.broadcast %153 : f32 to vector<16x16xf32>
      %155 = arith.mulf %152, %154 : vector<16x16xf32>
      %156 = arith.addf %151, %155 : vector<16x16xf32>
      %157 = vector.extract_strided_slice %20 {offsets = [1, 6], sizes = [16, 16], strides = [1, 1]} : vector<22x22xf32> to vector<16x16xf32>
      %c13 = arith.constant 13 : index
      %158 = memref.load %arg3[%c13] : memref<99xf32, #tpu.memory_space<smem>>
      %159 = vector.broadcast %158 : f32 to vector<16x16xf32>
      %160 = arith.mulf %157, %159 : vector<16x16xf32>
      %161 = arith.addf %156, %160 : vector<16x16xf32>
      %162 = vector.extract_strided_slice %22 {offsets = [1, 6], sizes = [16, 16], strides = [1, 1]} : vector<22x22xf32> to vector<16x16xf32>
      %c62 = arith.constant 62 : index
      %163 = memref.load %arg3[%c62] : memref<99xf32, #tpu.memory_space<smem>>
      %164 = vector.broadcast %163 : f32 to vector<16x16xf32>
      %165 = arith.mulf %162, %164 : vector<16x16xf32>
      %166 = arith.addf %161, %165 : vector<16x16xf32>
      %167 = vector.extract_strided_slice %20 {offsets = [2, 0], sizes = [16, 16], strides = [1, 1]} : vector<22x22xf32> to vector<16x16xf32>
      %c14 = arith.constant 14 : index
      %168 = memref.load %arg3[%c14] : memref<99xf32, #tpu.memory_space<smem>>
      %169 = vector.broadcast %168 : f32 to vector<16x16xf32>
      %170 = arith.mulf %167, %169 : vector<16x16xf32>
      %171 = arith.addf %166, %170 : vector<16x16xf32>
      %172 = vector.extract_strided_slice %22 {offsets = [2, 0], sizes = [16, 16], strides = [1, 1]} : vector<22x22xf32> to vector<16x16xf32>
      %c63 = arith.constant 63 : index
      %173 = memref.load %arg3[%c63] : memref<99xf32, #tpu.memory_space<smem>>
      %174 = vector.broadcast %173 : f32 to vector<16x16xf32>
      %175 = arith.mulf %172, %174 : vector<16x16xf32>
      %176 = arith.addf %171, %175 : vector<16x16xf32>
      %177 = vector.extract_strided_slice %20 {offsets = [2, 1], sizes = [16, 16], strides = [1, 1]} : vector<22x22xf32> to vector<16x16xf32>
      %c15 = arith.constant 15 : index
      %178 = memref.load %arg3[%c15] : memref<99xf32, #tpu.memory_space<smem>>
      %179 = vector.broadcast %178 : f32 to vector<16x16xf32>
      %180 = arith.mulf %177, %179 : vector<16x16xf32>
      %181 = arith.addf %176, %180 : vector<16x16xf32>
      %182 = vector.extract_strided_slice %22 {offsets = [2, 1], sizes = [16, 16], strides = [1, 1]} : vector<22x22xf32> to vector<16x16xf32>
      %c64 = arith.constant 64 : index
      %183 = memref.load %arg3[%c64] : memref<99xf32, #tpu.memory_space<smem>>
      %184 = vector.broadcast %183 : f32 to vector<16x16xf32>
      %185 = arith.mulf %182, %184 : vector<16x16xf32>
      %186 = arith.addf %181, %185 : vector<16x16xf32>
      %187 = vector.extract_strided_slice %20 {offsets = [2, 2], sizes = [16, 16], strides = [1, 1]} : vector<22x22xf32> to vector<16x16xf32>
      %c16 = arith.constant 16 : index
      %188 = memref.load %arg3[%c16] : memref<99xf32, #tpu.memory_space<smem>>
      %189 = vector.broadcast %188 : f32 to vector<16x16xf32>
      %190 = arith.mulf %187, %189 : vector<16x16xf32>
      %191 = arith.addf %186, %190 : vector<16x16xf32>
      %192 = vector.extract_strided_slice %22 {offsets = [2, 2], sizes = [16, 16], strides = [1, 1]} : vector<22x22xf32> to vector<16x16xf32>
      %c65 = arith.constant 65 : index
      %193 = memref.load %arg3[%c65] : memref<99xf32, #tpu.memory_space<smem>>
      %194 = vector.broadcast %193 : f32 to vector<16x16xf32>
      %195 = arith.mulf %192, %194 : vector<16x16xf32>
      %196 = arith.addf %191, %195 : vector<16x16xf32>
      %197 = vector.extract_strided_slice %20 {offsets = [2, 3], sizes = [16, 16], strides = [1, 1]} : vector<22x22xf32> to vector<16x16xf32>
      %c17 = arith.constant 17 : index
      %198 = memref.load %arg3[%c17] : memref<99xf32, #tpu.memory_space<smem>>
      %199 = vector.broadcast %198 : f32 to vector<16x16xf32>
      %200 = arith.mulf %197, %199 : vector<16x16xf32>
      %201 = arith.addf %196, %200 : vector<16x16xf32>
      %202 = vector.extract_strided_slice %22 {offsets = [2, 3], sizes = [16, 16], strides = [1, 1]} : vector<22x22xf32> to vector<16x16xf32>
      %c66 = arith.constant 66 : index
      %203 = memref.load %arg3[%c66] : memref<99xf32, #tpu.memory_space<smem>>
      %204 = vector.broadcast %203 : f32 to vector<16x16xf32>
      %205 = arith.mulf %202, %204 : vector<16x16xf32>
      %206 = arith.addf %201, %205 : vector<16x16xf32>
      %207 = vector.extract_strided_slice %20 {offsets = [2, 4], sizes = [16, 16], strides = [1, 1]} : vector<22x22xf32> to vector<16x16xf32>
      %c18 = arith.constant 18 : index
      %208 = memref.load %arg3[%c18] : memref<99xf32, #tpu.memory_space<smem>>
      %209 = vector.broadcast %208 : f32 to vector<16x16xf32>
      %210 = arith.mulf %207, %209 : vector<16x16xf32>
      %211 = arith.addf %206, %210 : vector<16x16xf32>
      %212 = vector.extract_strided_slice %22 {offsets = [2, 4], sizes = [16, 16], strides = [1, 1]} : vector<22x22xf32> to vector<16x16xf32>
      %c67 = arith.constant 67 : index
      %213 = memref.load %arg3[%c67] : memref<99xf32, #tpu.memory_space<smem>>
      %214 = vector.broadcast %213 : f32 to vector<16x16xf32>
      %215 = arith.mulf %212, %214 : vector<16x16xf32>
      %216 = arith.addf %211, %215 : vector<16x16xf32>
      %217 = vector.extract_strided_slice %20 {offsets = [2, 5], sizes = [16, 16], strides = [1, 1]} : vector<22x22xf32> to vector<16x16xf32>
      %c19 = arith.constant 19 : index
      %218 = memref.load %arg3[%c19] : memref<99xf32, #tpu.memory_space<smem>>
      %219 = vector.broadcast %218 : f32 to vector<16x16xf32>
      %220 = arith.mulf %217, %219 : vector<16x16xf32>
      %221 = arith.addf %216, %220 : vector<16x16xf32>
      %222 = vector.extract_strided_slice %22 {offsets = [2, 5], sizes = [16, 16], strides = [1, 1]} : vector<22x22xf32> to vector<16x16xf32>
      %c68 = arith.constant 68 : index
      %223 = memref.load %arg3[%c68] : memref<99xf32, #tpu.memory_space<smem>>
      %224 = vector.broadcast %223 : f32 to vector<16x16xf32>
      %225 = arith.mulf %222, %224 : vector<16x16xf32>
      %226 = arith.addf %221, %225 : vector<16x16xf32>
      %227 = vector.extract_strided_slice %20 {offsets = [2, 6], sizes = [16, 16], strides = [1, 1]} : vector<22x22xf32> to vector<16x16xf32>
      %c20 = arith.constant 20 : index
      %228 = memref.load %arg3[%c20] : memref<99xf32, #tpu.memory_space<smem>>
      %229 = vector.broadcast %228 : f32 to vector<16x16xf32>
      %230 = arith.mulf %227, %229 : vector<16x16xf32>
      %231 = arith.addf %226, %230 : vector<16x16xf32>
      %232 = vector.extract_strided_slice %22 {offsets = [2, 6], sizes = [16, 16], strides = [1, 1]} : vector<22x22xf32> to vector<16x16xf32>
      %c69 = arith.constant 69 : index
      %233 = memref.load %arg3[%c69] : memref<99xf32, #tpu.memory_space<smem>>
      %234 = vector.broadcast %233 : f32 to vector<16x16xf32>
      %235 = arith.mulf %232, %234 : vector<16x16xf32>
      %236 = arith.addf %231, %235 : vector<16x16xf32>
      %237 = vector.extract_strided_slice %20 {offsets = [3, 0], sizes = [16, 16], strides = [1, 1]} : vector<22x22xf32> to vector<16x16xf32>
      %c21 = arith.constant 21 : index
      %238 = memref.load %arg3[%c21] : memref<99xf32, #tpu.memory_space<smem>>
      %239 = vector.broadcast %238 : f32 to vector<16x16xf32>
      %240 = arith.mulf %237, %239 : vector<16x16xf32>
      %241 = arith.addf %236, %240 : vector<16x16xf32>
      %242 = vector.extract_strided_slice %22 {offsets = [3, 0], sizes = [16, 16], strides = [1, 1]} : vector<22x22xf32> to vector<16x16xf32>
      %c70 = arith.constant 70 : index
      %243 = memref.load %arg3[%c70] : memref<99xf32, #tpu.memory_space<smem>>
      %244 = vector.broadcast %243 : f32 to vector<16x16xf32>
      %245 = arith.mulf %242, %244 : vector<16x16xf32>
      %246 = arith.addf %241, %245 : vector<16x16xf32>
      %247 = vector.extract_strided_slice %20 {offsets = [3, 1], sizes = [16, 16], strides = [1, 1]} : vector<22x22xf32> to vector<16x16xf32>
      %c22 = arith.constant 22 : index
      %248 = memref.load %arg3[%c22] : memref<99xf32, #tpu.memory_space<smem>>
      %249 = vector.broadcast %248 : f32 to vector<16x16xf32>
      %250 = arith.mulf %247, %249 : vector<16x16xf32>
      %251 = arith.addf %246, %250 : vector<16x16xf32>
      %252 = vector.extract_strided_slice %22 {offsets = [3, 1], sizes = [16, 16], strides = [1, 1]} : vector<22x22xf32> to vector<16x16xf32>
      %c71 = arith.constant 71 : index
      %253 = memref.load %arg3[%c71] : memref<99xf32, #tpu.memory_space<smem>>
      %254 = vector.broadcast %253 : f32 to vector<16x16xf32>
      %255 = arith.mulf %252, %254 : vector<16x16xf32>
      %256 = arith.addf %251, %255 : vector<16x16xf32>
      %257 = vector.extract_strided_slice %20 {offsets = [3, 2], sizes = [16, 16], strides = [1, 1]} : vector<22x22xf32> to vector<16x16xf32>
      %c23 = arith.constant 23 : index
      %258 = memref.load %arg3[%c23] : memref<99xf32, #tpu.memory_space<smem>>
      %259 = vector.broadcast %258 : f32 to vector<16x16xf32>
      %260 = arith.mulf %257, %259 : vector<16x16xf32>
      %261 = arith.addf %256, %260 : vector<16x16xf32>
      %262 = vector.extract_strided_slice %22 {offsets = [3, 2], sizes = [16, 16], strides = [1, 1]} : vector<22x22xf32> to vector<16x16xf32>
      %c72 = arith.constant 72 : index
      %263 = memref.load %arg3[%c72] : memref<99xf32, #tpu.memory_space<smem>>
      %264 = vector.broadcast %263 : f32 to vector<16x16xf32>
      %265 = arith.mulf %262, %264 : vector<16x16xf32>
      %266 = arith.addf %261, %265 : vector<16x16xf32>
      %267 = vector.extract_strided_slice %20 {offsets = [3, 3], sizes = [16, 16], strides = [1, 1]} : vector<22x22xf32> to vector<16x16xf32>
      %c24 = arith.constant 24 : index
      %268 = memref.load %arg3[%c24] : memref<99xf32, #tpu.memory_space<smem>>
      %269 = vector.broadcast %268 : f32 to vector<16x16xf32>
      %270 = arith.mulf %267, %269 : vector<16x16xf32>
      %271 = arith.addf %266, %270 : vector<16x16xf32>
      %272 = vector.extract_strided_slice %22 {offsets = [3, 3], sizes = [16, 16], strides = [1, 1]} : vector<22x22xf32> to vector<16x16xf32>
      %c73 = arith.constant 73 : index
      %273 = memref.load %arg3[%c73] : memref<99xf32, #tpu.memory_space<smem>>
      %274 = vector.broadcast %273 : f32 to vector<16x16xf32>
      %275 = arith.mulf %272, %274 : vector<16x16xf32>
      %276 = arith.addf %271, %275 : vector<16x16xf32>
      %277 = vector.extract_strided_slice %20 {offsets = [3, 4], sizes = [16, 16], strides = [1, 1]} : vector<22x22xf32> to vector<16x16xf32>
      %c25 = arith.constant 25 : index
      %278 = memref.load %arg3[%c25] : memref<99xf32, #tpu.memory_space<smem>>
      %279 = vector.broadcast %278 : f32 to vector<16x16xf32>
      %280 = arith.mulf %277, %279 : vector<16x16xf32>
      %281 = arith.addf %276, %280 : vector<16x16xf32>
      %282 = vector.extract_strided_slice %22 {offsets = [3, 4], sizes = [16, 16], strides = [1, 1]} : vector<22x22xf32> to vector<16x16xf32>
      %c74 = arith.constant 74 : index
      %283 = memref.load %arg3[%c74] : memref<99xf32, #tpu.memory_space<smem>>
      %284 = vector.broadcast %283 : f32 to vector<16x16xf32>
      %285 = arith.mulf %282, %284 : vector<16x16xf32>
      %286 = arith.addf %281, %285 : vector<16x16xf32>
      %287 = vector.extract_strided_slice %20 {offsets = [3, 5], sizes = [16, 16], strides = [1, 1]} : vector<22x22xf32> to vector<16x16xf32>
      %c26 = arith.constant 26 : index
      %288 = memref.load %arg3[%c26] : memref<99xf32, #tpu.memory_space<smem>>
      %289 = vector.broadcast %288 : f32 to vector<16x16xf32>
      %290 = arith.mulf %287, %289 : vector<16x16xf32>
      %291 = arith.addf %286, %290 : vector<16x16xf32>
      %292 = vector.extract_strided_slice %22 {offsets = [3, 5], sizes = [16, 16], strides = [1, 1]} : vector<22x22xf32> to vector<16x16xf32>
      %c75 = arith.constant 75 : index
      %293 = memref.load %arg3[%c75] : memref<99xf32, #tpu.memory_space<smem>>
      %294 = vector.broadcast %293 : f32 to vector<16x16xf32>
      %295 = arith.mulf %292, %294 : vector<16x16xf32>
      %296 = arith.addf %291, %295 : vector<16x16xf32>
      %297 = vector.extract_strided_slice %20 {offsets = [3, 6], sizes = [16, 16], strides = [1, 1]} : vector<22x22xf32> to vector<16x16xf32>
      %c27 = arith.constant 27 : index
      %298 = memref.load %arg3[%c27] : memref<99xf32, #tpu.memory_space<smem>>
      %299 = vector.broadcast %298 : f32 to vector<16x16xf32>
      %300 = arith.mulf %297, %299 : vector<16x16xf32>
      %301 = arith.addf %296, %300 : vector<16x16xf32>
      %302 = vector.extract_strided_slice %22 {offsets = [3, 6], sizes = [16, 16], strides = [1, 1]} : vector<22x22xf32> to vector<16x16xf32>
      %c76 = arith.constant 76 : index
      %303 = memref.load %arg3[%c76] : memref<99xf32, #tpu.memory_space<smem>>
      %304 = vector.broadcast %303 : f32 to vector<16x16xf32>
      %305 = arith.mulf %302, %304 : vector<16x16xf32>
      %306 = arith.addf %301, %305 : vector<16x16xf32>
      %307 = vector.extract_strided_slice %20 {offsets = [4, 0], sizes = [16, 16], strides = [1, 1]} : vector<22x22xf32> to vector<16x16xf32>
      %c28 = arith.constant 28 : index
      %308 = memref.load %arg3[%c28] : memref<99xf32, #tpu.memory_space<smem>>
      %309 = vector.broadcast %308 : f32 to vector<16x16xf32>
      %310 = arith.mulf %307, %309 : vector<16x16xf32>
      %311 = arith.addf %306, %310 : vector<16x16xf32>
      %312 = vector.extract_strided_slice %22 {offsets = [4, 0], sizes = [16, 16], strides = [1, 1]} : vector<22x22xf32> to vector<16x16xf32>
      %c77 = arith.constant 77 : index
      %313 = memref.load %arg3[%c77] : memref<99xf32, #tpu.memory_space<smem>>
      %314 = vector.broadcast %313 : f32 to vector<16x16xf32>
      %315 = arith.mulf %312, %314 : vector<16x16xf32>
      %316 = arith.addf %311, %315 : vector<16x16xf32>
      %317 = vector.extract_strided_slice %20 {offsets = [4, 1], sizes = [16, 16], strides = [1, 1]} : vector<22x22xf32> to vector<16x16xf32>
      %c29 = arith.constant 29 : index
      %318 = memref.load %arg3[%c29] : memref<99xf32, #tpu.memory_space<smem>>
      %319 = vector.broadcast %318 : f32 to vector<16x16xf32>
      %320 = arith.mulf %317, %319 : vector<16x16xf32>
      %321 = arith.addf %316, %320 : vector<16x16xf32>
      %322 = vector.extract_strided_slice %22 {offsets = [4, 1], sizes = [16, 16], strides = [1, 1]} : vector<22x22xf32> to vector<16x16xf32>
      %c78 = arith.constant 78 : index
      %323 = memref.load %arg3[%c78] : memref<99xf32, #tpu.memory_space<smem>>
      %324 = vector.broadcast %323 : f32 to vector<16x16xf32>
      %325 = arith.mulf %322, %324 : vector<16x16xf32>
      %326 = arith.addf %321, %325 : vector<16x16xf32>
      %327 = vector.extract_strided_slice %20 {offsets = [4, 2], sizes = [16, 16], strides = [1, 1]} : vector<22x22xf32> to vector<16x16xf32>
      %c30 = arith.constant 30 : index
      %328 = memref.load %arg3[%c30] : memref<99xf32, #tpu.memory_space<smem>>
      %329 = vector.broadcast %328 : f32 to vector<16x16xf32>
      %330 = arith.mulf %327, %329 : vector<16x16xf32>
      %331 = arith.addf %326, %330 : vector<16x16xf32>
      %332 = vector.extract_strided_slice %22 {offsets = [4, 2], sizes = [16, 16], strides = [1, 1]} : vector<22x22xf32> to vector<16x16xf32>
      %c79 = arith.constant 79 : index
      %333 = memref.load %arg3[%c79] : memref<99xf32, #tpu.memory_space<smem>>
      %334 = vector.broadcast %333 : f32 to vector<16x16xf32>
      %335 = arith.mulf %332, %334 : vector<16x16xf32>
      %336 = arith.addf %331, %335 : vector<16x16xf32>
      %337 = vector.extract_strided_slice %20 {offsets = [4, 3], sizes = [16, 16], strides = [1, 1]} : vector<22x22xf32> to vector<16x16xf32>
      %c31 = arith.constant 31 : index
      %338 = memref.load %arg3[%c31] : memref<99xf32, #tpu.memory_space<smem>>
      %339 = vector.broadcast %338 : f32 to vector<16x16xf32>
      %340 = arith.mulf %337, %339 : vector<16x16xf32>
      %341 = arith.addf %336, %340 : vector<16x16xf32>
      %342 = vector.extract_strided_slice %22 {offsets = [4, 3], sizes = [16, 16], strides = [1, 1]} : vector<22x22xf32> to vector<16x16xf32>
      %c80 = arith.constant 80 : index
      %343 = memref.load %arg3[%c80] : memref<99xf32, #tpu.memory_space<smem>>
      %344 = vector.broadcast %343 : f32 to vector<16x16xf32>
      %345 = arith.mulf %342, %344 : vector<16x16xf32>
      %346 = arith.addf %341, %345 : vector<16x16xf32>
      %347 = vector.extract_strided_slice %20 {offsets = [4, 4], sizes = [16, 16], strides = [1, 1]} : vector<22x22xf32> to vector<16x16xf32>
      %c32 = arith.constant 32 : index
      %348 = memref.load %arg3[%c32] : memref<99xf32, #tpu.memory_space<smem>>
      %349 = vector.broadcast %348 : f32 to vector<16x16xf32>
      %350 = arith.mulf %347, %349 : vector<16x16xf32>
      %351 = arith.addf %346, %350 : vector<16x16xf32>
      %352 = vector.extract_strided_slice %22 {offsets = [4, 4], sizes = [16, 16], strides = [1, 1]} : vector<22x22xf32> to vector<16x16xf32>
      %c81 = arith.constant 81 : index
      %353 = memref.load %arg3[%c81] : memref<99xf32, #tpu.memory_space<smem>>
      %354 = vector.broadcast %353 : f32 to vector<16x16xf32>
      %355 = arith.mulf %352, %354 : vector<16x16xf32>
      %356 = arith.addf %351, %355 : vector<16x16xf32>
      %357 = vector.extract_strided_slice %20 {offsets = [4, 5], sizes = [16, 16], strides = [1, 1]} : vector<22x22xf32> to vector<16x16xf32>
      %c33 = arith.constant 33 : index
      %358 = memref.load %arg3[%c33] : memref<99xf32, #tpu.memory_space<smem>>
      %359 = vector.broadcast %358 : f32 to vector<16x16xf32>
      %360 = arith.mulf %357, %359 : vector<16x16xf32>
      %361 = arith.addf %356, %360 : vector<16x16xf32>
      %362 = vector.extract_strided_slice %22 {offsets = [4, 5], sizes = [16, 16], strides = [1, 1]} : vector<22x22xf32> to vector<16x16xf32>
      %c82 = arith.constant 82 : index
      %363 = memref.load %arg3[%c82] : memref<99xf32, #tpu.memory_space<smem>>
      %364 = vector.broadcast %363 : f32 to vector<16x16xf32>
      %365 = arith.mulf %362, %364 : vector<16x16xf32>
      %366 = arith.addf %361, %365 : vector<16x16xf32>
      %367 = vector.extract_strided_slice %20 {offsets = [4, 6], sizes = [16, 16], strides = [1, 1]} : vector<22x22xf32> to vector<16x16xf32>
      %c34 = arith.constant 34 : index
      %368 = memref.load %arg3[%c34] : memref<99xf32, #tpu.memory_space<smem>>
      %369 = vector.broadcast %368 : f32 to vector<16x16xf32>
      %370 = arith.mulf %367, %369 : vector<16x16xf32>
      %371 = arith.addf %366, %370 : vector<16x16xf32>
      %372 = vector.extract_strided_slice %22 {offsets = [4, 6], sizes = [16, 16], strides = [1, 1]} : vector<22x22xf32> to vector<16x16xf32>
      %c83 = arith.constant 83 : index
      %373 = memref.load %arg3[%c83] : memref<99xf32, #tpu.memory_space<smem>>
      %374 = vector.broadcast %373 : f32 to vector<16x16xf32>
      %375 = arith.mulf %372, %374 : vector<16x16xf32>
      %376 = arith.addf %371, %375 : vector<16x16xf32>
      %377 = vector.extract_strided_slice %20 {offsets = [5, 0], sizes = [16, 16], strides = [1, 1]} : vector<22x22xf32> to vector<16x16xf32>
      %c35 = arith.constant 35 : index
      %378 = memref.load %arg3[%c35] : memref<99xf32, #tpu.memory_space<smem>>
      %379 = vector.broadcast %378 : f32 to vector<16x16xf32>
      %380 = arith.mulf %377, %379 : vector<16x16xf32>
      %381 = arith.addf %376, %380 : vector<16x16xf32>
      %382 = vector.extract_strided_slice %22 {offsets = [5, 0], sizes = [16, 16], strides = [1, 1]} : vector<22x22xf32> to vector<16x16xf32>
      %c84 = arith.constant 84 : index
      %383 = memref.load %arg3[%c84] : memref<99xf32, #tpu.memory_space<smem>>
      %384 = vector.broadcast %383 : f32 to vector<16x16xf32>
      %385 = arith.mulf %382, %384 : vector<16x16xf32>
      %386 = arith.addf %381, %385 : vector<16x16xf32>
      %387 = vector.extract_strided_slice %20 {offsets = [5, 1], sizes = [16, 16], strides = [1, 1]} : vector<22x22xf32> to vector<16x16xf32>
      %c36 = arith.constant 36 : index
      %388 = memref.load %arg3[%c36] : memref<99xf32, #tpu.memory_space<smem>>
      %389 = vector.broadcast %388 : f32 to vector<16x16xf32>
      %390 = arith.mulf %387, %389 : vector<16x16xf32>
      %391 = arith.addf %386, %390 : vector<16x16xf32>
      %392 = vector.extract_strided_slice %22 {offsets = [5, 1], sizes = [16, 16], strides = [1, 1]} : vector<22x22xf32> to vector<16x16xf32>
      %c85 = arith.constant 85 : index
      %393 = memref.load %arg3[%c85] : memref<99xf32, #tpu.memory_space<smem>>
      %394 = vector.broadcast %393 : f32 to vector<16x16xf32>
      %395 = arith.mulf %392, %394 : vector<16x16xf32>
      %396 = arith.addf %391, %395 : vector<16x16xf32>
      %397 = vector.extract_strided_slice %20 {offsets = [5, 2], sizes = [16, 16], strides = [1, 1]} : vector<22x22xf32> to vector<16x16xf32>
      %c37 = arith.constant 37 : index
      %398 = memref.load %arg3[%c37] : memref<99xf32, #tpu.memory_space<smem>>
      %399 = vector.broadcast %398 : f32 to vector<16x16xf32>
      %400 = arith.mulf %397, %399 : vector<16x16xf32>
      %401 = arith.addf %396, %400 : vector<16x16xf32>
      %402 = vector.extract_strided_slice %22 {offsets = [5, 2], sizes = [16, 16], strides = [1, 1]} : vector<22x22xf32> to vector<16x16xf32>
      %c86 = arith.constant 86 : index
      %403 = memref.load %arg3[%c86] : memref<99xf32, #tpu.memory_space<smem>>
      %404 = vector.broadcast %403 : f32 to vector<16x16xf32>
      %405 = arith.mulf %402, %404 : vector<16x16xf32>
      %406 = arith.addf %401, %405 : vector<16x16xf32>
      %407 = vector.extract_strided_slice %20 {offsets = [5, 3], sizes = [16, 16], strides = [1, 1]} : vector<22x22xf32> to vector<16x16xf32>
      %c38 = arith.constant 38 : index
      %408 = memref.load %arg3[%c38] : memref<99xf32, #tpu.memory_space<smem>>
      %409 = vector.broadcast %408 : f32 to vector<16x16xf32>
      %410 = arith.mulf %407, %409 : vector<16x16xf32>
      %411 = arith.addf %406, %410 : vector<16x16xf32>
      %412 = vector.extract_strided_slice %22 {offsets = [5, 3], sizes = [16, 16], strides = [1, 1]} : vector<22x22xf32> to vector<16x16xf32>
      %c87 = arith.constant 87 : index
      %413 = memref.load %arg3[%c87] : memref<99xf32, #tpu.memory_space<smem>>
      %414 = vector.broadcast %413 : f32 to vector<16x16xf32>
      %415 = arith.mulf %412, %414 : vector<16x16xf32>
      %416 = arith.addf %411, %415 : vector<16x16xf32>
      %417 = vector.extract_strided_slice %20 {offsets = [5, 4], sizes = [16, 16], strides = [1, 1]} : vector<22x22xf32> to vector<16x16xf32>
      %c39 = arith.constant 39 : index
      %418 = memref.load %arg3[%c39] : memref<99xf32, #tpu.memory_space<smem>>
      %419 = vector.broadcast %418 : f32 to vector<16x16xf32>
      %420 = arith.mulf %417, %419 : vector<16x16xf32>
      %421 = arith.addf %416, %420 : vector<16x16xf32>
      %422 = vector.extract_strided_slice %22 {offsets = [5, 4], sizes = [16, 16], strides = [1, 1]} : vector<22x22xf32> to vector<16x16xf32>
      %c88 = arith.constant 88 : index
      %423 = memref.load %arg3[%c88] : memref<99xf32, #tpu.memory_space<smem>>
      %424 = vector.broadcast %423 : f32 to vector<16x16xf32>
      %425 = arith.mulf %422, %424 : vector<16x16xf32>
      %426 = arith.addf %421, %425 : vector<16x16xf32>
      %427 = vector.extract_strided_slice %20 {offsets = [5, 5], sizes = [16, 16], strides = [1, 1]} : vector<22x22xf32> to vector<16x16xf32>
      %c40 = arith.constant 40 : index
      %428 = memref.load %arg3[%c40] : memref<99xf32, #tpu.memory_space<smem>>
      %429 = vector.broadcast %428 : f32 to vector<16x16xf32>
      %430 = arith.mulf %427, %429 : vector<16x16xf32>
      %431 = arith.addf %426, %430 : vector<16x16xf32>
      %432 = vector.extract_strided_slice %22 {offsets = [5, 5], sizes = [16, 16], strides = [1, 1]} : vector<22x22xf32> to vector<16x16xf32>
      %c89 = arith.constant 89 : index
      %433 = memref.load %arg3[%c89] : memref<99xf32, #tpu.memory_space<smem>>
      %434 = vector.broadcast %433 : f32 to vector<16x16xf32>
      %435 = arith.mulf %432, %434 : vector<16x16xf32>
      %436 = arith.addf %431, %435 : vector<16x16xf32>
      %437 = vector.extract_strided_slice %20 {offsets = [5, 6], sizes = [16, 16], strides = [1, 1]} : vector<22x22xf32> to vector<16x16xf32>
      %c41 = arith.constant 41 : index
      %438 = memref.load %arg3[%c41] : memref<99xf32, #tpu.memory_space<smem>>
      %439 = vector.broadcast %438 : f32 to vector<16x16xf32>
      %440 = arith.mulf %437, %439 : vector<16x16xf32>
      %441 = arith.addf %436, %440 : vector<16x16xf32>
      %442 = vector.extract_strided_slice %22 {offsets = [5, 6], sizes = [16, 16], strides = [1, 1]} : vector<22x22xf32> to vector<16x16xf32>
      %c90 = arith.constant 90 : index
      %443 = memref.load %arg3[%c90] : memref<99xf32, #tpu.memory_space<smem>>
      %444 = vector.broadcast %443 : f32 to vector<16x16xf32>
      %445 = arith.mulf %442, %444 : vector<16x16xf32>
      %446 = arith.addf %441, %445 : vector<16x16xf32>
      %447 = vector.extract_strided_slice %20 {offsets = [6, 0], sizes = [16, 16], strides = [1, 1]} : vector<22x22xf32> to vector<16x16xf32>
      %c42 = arith.constant 42 : index
      %448 = memref.load %arg3[%c42] : memref<99xf32, #tpu.memory_space<smem>>
      %449 = vector.broadcast %448 : f32 to vector<16x16xf32>
      %450 = arith.mulf %447, %449 : vector<16x16xf32>
      %451 = arith.addf %446, %450 : vector<16x16xf32>
      %452 = vector.extract_strided_slice %22 {offsets = [6, 0], sizes = [16, 16], strides = [1, 1]} : vector<22x22xf32> to vector<16x16xf32>
      %c91 = arith.constant 91 : index
      %453 = memref.load %arg3[%c91] : memref<99xf32, #tpu.memory_space<smem>>
      %454 = vector.broadcast %453 : f32 to vector<16x16xf32>
      %455 = arith.mulf %452, %454 : vector<16x16xf32>
      %456 = arith.addf %451, %455 : vector<16x16xf32>
      %457 = vector.extract_strided_slice %20 {offsets = [6, 1], sizes = [16, 16], strides = [1, 1]} : vector<22x22xf32> to vector<16x16xf32>
      %c43 = arith.constant 43 : index
      %458 = memref.load %arg3[%c43] : memref<99xf32, #tpu.memory_space<smem>>
      %459 = vector.broadcast %458 : f32 to vector<16x16xf32>
      %460 = arith.mulf %457, %459 : vector<16x16xf32>
      %461 = arith.addf %456, %460 : vector<16x16xf32>
      %462 = vector.extract_strided_slice %22 {offsets = [6, 1], sizes = [16, 16], strides = [1, 1]} : vector<22x22xf32> to vector<16x16xf32>
      %c92 = arith.constant 92 : index
      %463 = memref.load %arg3[%c92] : memref<99xf32, #tpu.memory_space<smem>>
      %464 = vector.broadcast %463 : f32 to vector<16x16xf32>
      %465 = arith.mulf %462, %464 : vector<16x16xf32>
      %466 = arith.addf %461, %465 : vector<16x16xf32>
      %467 = vector.extract_strided_slice %20 {offsets = [6, 2], sizes = [16, 16], strides = [1, 1]} : vector<22x22xf32> to vector<16x16xf32>
      %c44 = arith.constant 44 : index
      %468 = memref.load %arg3[%c44] : memref<99xf32, #tpu.memory_space<smem>>
      %469 = vector.broadcast %468 : f32 to vector<16x16xf32>
      %470 = arith.mulf %467, %469 : vector<16x16xf32>
      %471 = arith.addf %466, %470 : vector<16x16xf32>
      %472 = vector.extract_strided_slice %22 {offsets = [6, 2], sizes = [16, 16], strides = [1, 1]} : vector<22x22xf32> to vector<16x16xf32>
      %c93 = arith.constant 93 : index
      %473 = memref.load %arg3[%c93] : memref<99xf32, #tpu.memory_space<smem>>
      %474 = vector.broadcast %473 : f32 to vector<16x16xf32>
      %475 = arith.mulf %472, %474 : vector<16x16xf32>
      %476 = arith.addf %471, %475 : vector<16x16xf32>
      %477 = vector.extract_strided_slice %20 {offsets = [6, 3], sizes = [16, 16], strides = [1, 1]} : vector<22x22xf32> to vector<16x16xf32>
      %c45 = arith.constant 45 : index
      %478 = memref.load %arg3[%c45] : memref<99xf32, #tpu.memory_space<smem>>
      %479 = vector.broadcast %478 : f32 to vector<16x16xf32>
      %480 = arith.mulf %477, %479 : vector<16x16xf32>
      %481 = arith.addf %476, %480 : vector<16x16xf32>
      %482 = vector.extract_strided_slice %22 {offsets = [6, 3], sizes = [16, 16], strides = [1, 1]} : vector<22x22xf32> to vector<16x16xf32>
      %c94 = arith.constant 94 : index
      %483 = memref.load %arg3[%c94] : memref<99xf32, #tpu.memory_space<smem>>
      %484 = vector.broadcast %483 : f32 to vector<16x16xf32>
      %485 = arith.mulf %482, %484 : vector<16x16xf32>
      %486 = arith.addf %481, %485 : vector<16x16xf32>
      %487 = vector.extract_strided_slice %20 {offsets = [6, 4], sizes = [16, 16], strides = [1, 1]} : vector<22x22xf32> to vector<16x16xf32>
      %c46 = arith.constant 46 : index
      %488 = memref.load %arg3[%c46] : memref<99xf32, #tpu.memory_space<smem>>
      %489 = vector.broadcast %488 : f32 to vector<16x16xf32>
      %490 = arith.mulf %487, %489 : vector<16x16xf32>
      %491 = arith.addf %486, %490 : vector<16x16xf32>
      %492 = vector.extract_strided_slice %22 {offsets = [6, 4], sizes = [16, 16], strides = [1, 1]} : vector<22x22xf32> to vector<16x16xf32>
      %c95 = arith.constant 95 : index
      %493 = memref.load %arg3[%c95] : memref<99xf32, #tpu.memory_space<smem>>
      %494 = vector.broadcast %493 : f32 to vector<16x16xf32>
      %495 = arith.mulf %492, %494 : vector<16x16xf32>
      %496 = arith.addf %491, %495 : vector<16x16xf32>
      %497 = vector.extract_strided_slice %20 {offsets = [6, 5], sizes = [16, 16], strides = [1, 1]} : vector<22x22xf32> to vector<16x16xf32>
      %c47 = arith.constant 47 : index
      %498 = memref.load %arg3[%c47] : memref<99xf32, #tpu.memory_space<smem>>
      %499 = vector.broadcast %498 : f32 to vector<16x16xf32>
      %500 = arith.mulf %497, %499 : vector<16x16xf32>
      %501 = arith.addf %496, %500 : vector<16x16xf32>
      %502 = vector.extract_strided_slice %22 {offsets = [6, 5], sizes = [16, 16], strides = [1, 1]} : vector<22x22xf32> to vector<16x16xf32>
      %c96 = arith.constant 96 : index
      %503 = memref.load %arg3[%c96] : memref<99xf32, #tpu.memory_space<smem>>
      %504 = vector.broadcast %503 : f32 to vector<16x16xf32>
      %505 = arith.mulf %502, %504 : vector<16x16xf32>
      %506 = arith.addf %501, %505 : vector<16x16xf32>
      %507 = vector.extract_strided_slice %20 {offsets = [6, 6], sizes = [16, 16], strides = [1, 1]} : vector<22x22xf32> to vector<16x16xf32>
      %c48 = arith.constant 48 : index
      %508 = memref.load %arg3[%c48] : memref<99xf32, #tpu.memory_space<smem>>
      %509 = vector.broadcast %508 : f32 to vector<16x16xf32>
      %510 = arith.mulf %507, %509 : vector<16x16xf32>
      %511 = arith.addf %506, %510 : vector<16x16xf32>
      %512 = vector.extract_strided_slice %22 {offsets = [6, 6], sizes = [16, 16], strides = [1, 1]} : vector<22x22xf32> to vector<16x16xf32>
      %c97 = arith.constant 97 : index
      %513 = memref.load %arg3[%c97] : memref<99xf32, #tpu.memory_space<smem>>
      %514 = vector.broadcast %513 : f32 to vector<16x16xf32>
      %515 = arith.mulf %512, %514 : vector<16x16xf32>
      %516 = arith.addf %511, %515 : vector<16x16xf32>
      %517 = arith.negf %516 : vector<16x16xf32>
      %518 = math.exp %517 : vector<16x16xf32>
      %cst_18 = arith.constant 1.000000e+00 : f32
      %519 = vector.broadcast %cst_18 : f32 to vector<16x16xf32>
      %520 = arith.addf %519, %518 : vector<16x16xf32>
      %521 = arith.divf %519, %520 : vector<16x16xf32>
      %c0_19 = arith.constant 0 : index
      %c0_20 = arith.constant 0 : index
      %c0_21 = arith.constant 0 : index
      %522 = vector.load %arg4[%c0_19, %c0_20, %c0_21] : memref<1x16x16xf32, #tpu.memory_space<vmem>>, vector<1x16x16xf32>
      %523 = vector.shape_cast %522 : vector<1x16x16xf32> to vector<16x16xf32>
      %524 = vector.shape_cast %521 : vector<16x16xf32> to vector<1x16x16xf32>
      tpu.vector_store %arg4[%c0_19, %c0_20, %c0_21], %524 {strides = array<i32>} : memref<1x16x16xf32, #tpu.memory_space<vmem>>, vector<1x16x16xf32>,
    } else {
    }
    return
  }
  func.func @transform_0(%arg0: i32, %arg1: i32) -> (i32, i32, i32, i32) {
    %c0_i32 = arith.constant 0 : i32
    %c0_i32_0 = arith.constant 0 : i32
    %c0_i32_1 = arith.constant 0 : i32
    return %arg0, %arg1, %c0_i32, %c0_i32_0 : i32, i32, i32, i32
  }
  func.func @transform_1(%arg0: i32, %arg1: i32) -> i32 {
    %c0_i32 = arith.constant 0 : i32
    %c0_i32_0 = arith.constant 0 : i32
    return %c0_i32 : i32
  }
  func.func @transform_2(%arg0: i32, %arg1: i32) -> (i32, i32, i32) {
    %c0_i32 = arith.constant 0 : i32
    %c0_i32_0 = arith.constant 0 : i32
    %c0_i32_1 = arith.constant 0 : i32
    return %arg0, %c0_i32, %c0_i32_0 : i32, i32, i32
  }
}

</mosaic_0001>

<bundles_post_ra>
// kernel: tpu_custom_call.1
= control target key start
LH: loop header
LB: loop body
LE: loop exit
PB: predicated region body
PF: predicated region fallthrough
CT: control target
= control target key end

     0   :  { %7 = vsyncpa [#allocation5], 0  ;;  %s3952_s0 = inlined_call_operand.hbm [shape: f32[2,4,16,16], index: 0, kind: input, shape index: {}]   ;;  %s3953_s1 = inlined_call_operand.vmem [shape: f32[99], index: 1, kind: input, shape index: {}]   ;;  %s3954_s2 = inlined_call_operand.hbm [shape: f32[2,16,16], index: 2, kind: output, shape index: {}]  }
   0x1   :  { %9 = vsyncpa [#allocation5 + $0x1], 0 }
   0x2   :  { %10 = vsyncpa [#allocation7], 0 }
   0x3   :  { %11 = vsyncpa [#allocation6], 0 }
   0x4   :  { %13 = vsyncpa [#allocation6 + $0x1], 0  ;;  %s2712_s9 = smov 0   ;;  %s2714_s10 = smov 0  }
   0x5   :  { %s2716_s11 = smov 0   ;;  %s2718_s12 = smov 0  }
   0x6   :  { %s2720_s13 = smov 0   ;;  %s2722_s14 = smov 0  }
   0x7 LB: > { %s2339_s15 = sadd.s32 4294967295, %s2681_s14   ;;  %s2340_s16 = sadd.s32 4294967294, %s2681_s14   ;;  %s2681_s14 = sphi %s2722_s14, %s19_s14   ;;  %s2677_s13 = sphi %s2720_s13, %s3983_s13   ;;  %s2673_s12 = sphi %s2718_s12, %s3982_s12   ;;  %s2669_s11 = sphi %s2716_s11, %s3981_s11   ;;  %s2665_s10 = sphi %s2714_s10, %s3980_s10   ;;  %s2661_s9 = sphi %s2712_s9, %s3979_s9  }
   0x8   : > { %s40_s17 = sadd.s32 1, %s2669_s11  ;;  %p47_p0 = scmp.ne.s32.totalorder %s2669_s11, %s2665_s10 }
   0x9   : > { %p48_p1 = scmp.eq.s32.totalorder %s2681_s14, 0  ;;  %p53_p2 = scmp.ne.s32.totalorder %s2665_s10, %s2661_s9 }
   0xa   : > { %p2750_p3 = scmp.eq.s32.totalorder %s2339_s15, 0  ;;  %p98_p4 = scmp.eq.s32.totalorder %s2339_s15, 1 }
   0xb   : > { %p2754_p5 = por %p48_p1, %p47_p0  ;;  %p104_p6 = scmp.eq.s32.totalorder %s2340_s16, 1 }
   0xc   : > { %s3959_s18 = scalar_select %p2750_p3, 1, 0 }
   0xd   : > { %p2760_p7 = por %p2750_p3, %p53_p2  ;;  %p2764_p8 = por %p98_p4, %p47_p0 }
   0xe   : > { %p2768_p9 = por %p104_p6, %p53_p2  ;;  %p2341_p10 = scmp.ge.s32.totalorder %s2681_s14, 1 }
   0xf   : > { %s3961_s20 = scalar_select %p2760_p7, 1, 0 }
  0x10   : > { %s3962_s21 = scalar_select %p2764_p8, 1, 0 }
  0x11   : > { %s3963_s22 = scalar_select %p2768_p9, 1, 0 }
  0x12   : > { %p111_p11 = scmp.lt.s32.totalorder %s2681_s14, 3  ;;  %s124_s25 = sshll.u32 %s3953_s1, 4  ;;  %s125_s25 = int_to_ptr.vmem [resolvable:$true] %s124_s25 }
  0x13   : > { %p2479_p0 = scmp.lt.s32.totalorder %s2681_s14, 2  ;;  %s31_s29 = sadd.s32 1, %s2677_s13 }
  0x14   : > { %p2777_p12 = pnand %p2341_p10, %p111_p11  ;;  %p2798_p6 = scmp.ge.s32.totalorder %s31_s29, 2 }
  0x15   : > { %p2787_p2 = pnand %p2479_p0, %p2754_p5  ;;  %s135_s3 = sand.u32 1, %s2669_s11  }
  0x16   : > { %p2466_p1 = pneg %p2777_p12  ;;  %s2550_s4 = scalar_lea.vmem %s125_s25, 16 }
  0x17   : > { %p2551_p10 = scmp.ne.s32.totalorder %s125_s25, %s2550_s4  ;;  %p2558_p13 = scmp.lt.s32.totalorder %s125_s25, %s125_s25 }
  0x18   : > { %p2793_p4 = pnand %p2466_p1, %p2750_p3  ;;  %p2559_p9 = scmp.lt.s32.totalorder %s2550_s4, %s2550_s4 }
  0x1a   : > { %p2552_p11 = pneg %p2793_p4  ;;  %p2560_p8 = por %p2559_p9, %p2558_p13 }
  0x1c   : > { %p2553_p5 = pnand %p2552_p11, %p2551_p10 }
  0x1e   : > { %p2554_p0 = pneg %p2553_p5 }
  0x20   : > { %p2561_p1 = pnand %p2560_p8, %p2554_p0 }
  0x22   : > { %2564 = shalt.err (!%p2561_p1)
}
  0x23   : > { %s2683_s5 = smov [#allocation8]   ;;  %s3985_s29 = smov (%p2798_p6, %s31_s29), 0 }
  0x24   : > { %2469 = dma.vmem_to_smem (!%p2793_p4), %s125_s25, 16, %s2683_s5, [#allocation7]  }
  0x25   : > { %s2344_s6 = sshll.u32 %s135_s3, 6  ;;  %s35_s7 = ssub.s32 %s2677_s13, %s3985_s29 }
  0x26   : > { %p38_p9 = scmp.eq.s32.totalorder %s35_s7, 0  ;;  %s2456_s8 = sshll.u32 %s2677_s13, 10 }
  0x27   : > { %s2817_s19 = scalar_lea.hbm %s3952_s0, %s2456_s8  ;;  %s139_s23 = scalar_lea.vmem [#allocation4], %s2344_s6 }
  0x28   : > { %s149_s24 = sshll.u32 %s139_s23, 4  ;;  %s2826_s28 = scalar_lea.sflag [#allocation5], %s135_s3  ;;  %s2824_s24 = int_to_ptr.vmem [resolvable:$true] %s149_s24 }
  0x29   : > { %s2822_s25 = scalar_select %p38_p9, %s2669_s11, %s40_s17  }
  0x2a   : > { %s2565_s30 = scalar_lea.hbm %s2817_s19, 1024  ;;  %p2567_p13 = pneg %p2787_p2 }
  0x2b   : > { %p2566_p8 = scmp.ne.s32.totalorder %s2817_s19, %s2565_s30  ;;  %s2570_s6 = scalar_lea.hbm %s3952_s0, 2048 }
  0x2c   : > { %p2571_p10 = scmp.lt.u32.totalorder %s2817_s19, %s3952_s0  ;;  %p2572_p11 = scmp.lt.u32.totalorder %s2570_s6, %s2565_s30 }
  0x2d   : > { %p2568_p4 = pnand %p2567_p13, %p2566_p8  ;;  %p2574_p0 = scmp.lt.u32.totalorder %s2565_s30, %s2817_s19 }
  0x2e   : > { %p2573_p5 = por %p2572_p11, %p2571_p10 }
  0x2f   : > { %p2569_p6 = pneg %p2568_p4 }
  0x30   : > { %p2575_p1 = por %p2574_p0, %p2573_p5 }
  0x32   : > { %p2576_p9 = pnand %p2575_p1, %p2569_p6 }
  0x34   : > { %2579 = shalt.err (!%p2576_p9)
}
  0x35   : > { %s2580_s17 = scalar_lea.vmem %s2824_s24, 1024  ;;  %s2684_s3 = smov [#allocation4]  }
  0x36   : > { %p2581_p8 = scmp.ne.s32.totalorder %s2824_s24, %s2580_s17  ;;  %s2585_s15 = sshll.u32 %s2684_s3, 4  ;;  %s2586_s15 = int_to_ptr.vmem [resolvable:$false] %s2585_s15 }
  0x37   : > { %s2587_s16 = scalar_lea.vmem %s2586_s15, 2048  ;;  %p2588_p7 = scmp.lt.s32.totalorder %s2824_s24, %s2586_s15 }
  0x38   : > { %p2583_p4 = pnand %p2581_p8, %p2567_p13  ;;  %p2589_p10 = scmp.lt.s32.totalorder %s2587_s16, %s2580_s17 }
  0x3a   : > { %p2584_p3 = pneg %p2583_p4  ;;  %p2590_p11 = por %p2589_p10, %p2588_p7 }
  0x3c   : > { %p2591_p5 = pnand %p2590_p11, %p2584_p3 }
  0x3e   : > { %2594 = shalt.err (!%p2591_p5)
}
  0x3f   : > { %s2685_s23 = smov 128   ;;  %s2686_s30 = smov 8  }
  0x40   : > { %2473 = dma.hbm_to_vmem [thread:$0]  (!%p2787_p2), %s2817_s19, 1024, %s2824_s24, %s2826_s28, %s2685_s23, %s2685_s23, %s2686_s30  }
  0x41   : > { %161 = sbr.rel (%p2777_p12) target bundleno = 712 (0x2c8), region = 28 }
  0x48   : > { %s2857_s4 = sand.u32 1, %s2665_s10   ;;  %p3968_p3 = scmp.ne.s32.totalorder %s3961_s20, 0 }
  0x49   : > { %s2348_s5 = sshll.u32 %s2857_s4, 6  ;;  %s164_s6 = scalar_lea.sflag [#allocation5], %s2857_s4 }
  0x4a   : > { %s167_s7 = scalar_lea.vmem [#allocation4], %s2348_s5 }
  0x4b   : > { %2648 = dma.done.wait (%p3968_p3), %s164_s6, 1024  }
  0x4c   : > { %2650 = vsyncadd (%p3968_p3), %s164_s6, 4294966272  ;;  %p3969_p7 = scmp.ne.s32.totalorder %s3959_s18, 0 }
  0x4e   : > { %2652 = dma.done.wait (%p3969_p7), [#allocation7], 16  }
  0x4f   : > { %2654 = vsyncadd (%p3969_p7), [#allocation7], 4294967280 }
  0x50   : > { %176 = sfence }
  0x51   : > { %v194_v0 = vld [vmem:[%s167_s7] sm:$0xff]  ;;  %v196_v1 = vld [vmem:[%s167_s7 + $0x10] sm:$0xff]  ;;  %vm202_vm0 = vcmask 130048   ;;  %v195_v8 = vld [vmem:[%s167_s7 + $0x8] sm:$0xff]  ;;  %s2687_s18 = smov 3   ;;  %s2354_s20 = sld [smem:[#allocation8 + $0x32]] }
  0x52   : > { %v198_v2 = vld [vmem:[%s167_s7 + $0x20] sm:$0xff]  ;;  %v200_v3 = vld [vmem:[%s167_s7 + $0x30] sm:$0xff]  ;;  %v204_v4 = vsel %vm202_vm0, %v196_v1, 0.0  ;;  %v217_v5 = vsel %vm202_vm0, %v194_v0, -inf  ;;  %v218_v6 = vsel %vm202_vm0, %v196_v1, -inf  ;;  %v203_v11 = vsel %vm202_vm0, %v194_v0, 0.0 }
  0x53   : > { %v219_v7 = vsel %vm202_vm0, %v198_v2, -inf  ;;  %v221_v10 = vsel %vm202_vm0, %v200_v3, -inf  ;;  %v197_v12 = vld [vmem:[%s167_s7 + $0x18] sm:$0xff]  ;;  %v199_v13 = vld [vmem:[%s167_s7 + $0x28] sm:$0xff]  ;;  %v210_v15 = vsel %vm202_vm0, %v195_v8, 0.0  ;;  %v224_v19 = vsel %vm202_vm0, %v195_v8, -inf }
  0x54   : > { %v220_v9 = vmax.f32 %v217_v5, %v219_v7  ;;  %v201_v14 = vld [vmem:[%s167_s7 + $0x38] sm:$0xff]  ;;  %v222_v16 = vmax.f32 %v218_v6, %v221_v10  ;;  %v211_v17 = vsel %vm202_vm0, %v197_v12, 0.0  ;;  %v213_v18 = vsel %vm202_vm0, %v199_v13, 0.0  ;;  %s2889_s26 = sld [smem:[#allocation8 + $0x33]]  ;;  %s2893_s27 = sld [smem:[#allocation8 + $0x34]] }
  0x55   : > { %v212_v20 = vadd.f32 %v211_v17, %v210_v15  ;;  %v225_v21 = vsel %vm202_vm0, %v197_v12, -inf  ;;  %v226_v22 = vsel %vm202_vm0, %v199_v13, -inf  ;;  %v228_v23 = vsel %vm202_vm0, %v201_v14, -inf  ;;  %s2903_s19 = sld [smem:[#allocation8 + $0x35]]  ;;  %s2688_s24 = smov 127  }
  0x56   : > { %v223_v24 = vmax.f32 %v220_v9, %v222_v16  ;;  %v227_v25 = vmax.f32 %v224_v19, %v226_v22  ;;  %v229_v26 = vmax.f32 %v225_v21, %v228_v23  ;;  %v205_v27 = vadd.f32 %v204_v4, %v203_v11  ;;  %s2916_s28 = sld [smem:[#allocation8 + $0x36]]  ;;  %s2689_s8 = smov 126  }
  0x57   : > { %v206_v28 = vsel %vm202_vm0, %v198_v2, 0.0  ;;  %v208_v29 = vsel %vm202_vm0, %v200_v3, 0.0  ;;  %v214_v30 = vadd.f32 %v213_v18, %v212_v20  ;;  %v215_v31 = vsel %vm202_vm0, %v201_v14, 0.0  ;;  %s2368_s17 = sld [smem:[#allocation8 + $0x39]]  ;;  %s2935_s3 = sld [smem:[#allocation8 + $0x37]] }
  0x58   : > { %237 = vst.msk [vmem:[#allocation3] sm:$0xff] %vm202_vm0, %v223_v24  ;;  %v230_v32 = vmax.f32 %v227_v25, %v229_v26  ;;  %v207_v33 = vadd.f32 %v206_v28, %v205_v27  ;;  %vm272_vm1 = vcmask 23552   ;;  %vm275_vm2 = vcmask 154624   ;;  %s2690_s15 = smov 125   ;;  %s2370_s16 = sld [smem:[#allocation8 + $0x3a]] }
  0x59   : > { %v216_v34 = vadd.f32 %v215_v31, %v214_v30  ;;  %vm280_vm3 = vcmask 1042432   ;;  %v341_v46 = vstv %s2354_s20  ;;  %s2691_s23 = smov 124   ;;  %s2372_s30 = sld [smem:[#allocation8 + $0x3b]]  ;;  %vm502_vm4 = vcmask 1046528  }
  0x5a   : > { %238 = vst.msk [vmem:[#allocation3 + $0x8] sm:$0xff] %vm202_vm0, %v230_v32  ;;  %v209_v35 = vadd.f32 %v208_v29, %v207_v33  ;;  %v369_v55 = vstv %s2889_s26  ;;  %v397_v62 = vstv %s2893_s27  ;;  %s2692_s5 = smov 123   ;;  %s2374_s6 = sld [smem:[#allocation8 + $0x3c]]  ;;  %vm789_vm5 = vcmask 1045504  }
  0x5b   : > { %236 = vst.msk [vmem:[#allocation2 + $0x8] sm:$0xff] %vm202_vm0, %v216_v34  ;;  %v425_v5 = vstv %s2903_s19  ;;  %s2693_s7 = smov 122   ;;  %s2378_s20 = sld [smem:[#allocation8 + $0x3e]]  ;;  %vm1076_vm6 = vcmask 1044480   ;;  %vm1363_vm7 = vcmask 1043456   ;;  %vm1936_vm8 = vcmask 1041408  }
  0x5c   : > { %235 = vst.msk [vmem:[#allocation2] sm:$0xff] %vm202_vm0, %v209_v35  ;;  %v453_v8 = vstv %s2916_s28  ;;  %s2382_s26 = sld [smem:[#allocation8 + $0x40]]  ;;  %s2384_s27 = sld [smem:[#allocation8 + $0x41]] }
  0x5d   : > { %v551_v11 = vstv %s2368_s17  ;;  %v481_v12 = vstv %s2935_s3  ;;  %s2386_s19 = sld [smem:[#allocation8 + $0x42]]  ;;  %s2388_s28 = sld [smem:[#allocation8 + $0x43]] }
  0x5e   : > { %v593_v18 = vstv %s2370_s16  ;;  %s2390_s17 = sld [smem:[#allocation8 + $0x44]]  ;;  %s3017_s3 = sld [smem:[#allocation8 + $0x1]] }
  0x5f   : > { %v262_v36 = vld [vmem:[#allocation3] sm:$0xff]  ;;  %v635_v26 = vstv %s2372_s30  ;;  %s2355_s16 = sld [smem:[#allocation8 + $0x2]]  ;;  %s2357_s30 = sld [smem:[#allocation8 + $0x3]] }
  0x60   : > { %291 = vrot.lane.b32.xlu1 %v262_v36, %s2687_s18  ;;  %v677_v35 = vstv %s2374_s6  ;;  %s2359_s6 = sld [smem:[#allocation8 + $0x4]]  ;;  %p3976_p2 = scmp.ne.s32.totalorder %s3962_s21, 0 }
  0x61   : > { %v263_v37 = vld [vmem:[#allocation3 + $0x8] sm:$0xff] }
  0x62   : > { %v259_v39 = vld [vmem:[#allocation2 + $0x8] sm:$0xff] }
  0x63   : > { %v258_v38 = vld [vmem:[#allocation2] sm:$0xff]  ;;  %v261_v41 = vmul.f32 0.25, %v259_v39 }
  0x64   : > { %293 = vrot.lane.b32.xlu1 %v263_v37, %s2687_s18  ;;  %v260_v40 = vmul.f32 0.25, %v258_v38 }
  0x66   : > { %266 = vrot.lane.b32.xlu0 %v260_v40, %s2687_s18 }
  0x6a   : > { %268 = vrot.lane.b32.xlu0 %v261_v41, %s2687_s18  ;;  %s2376_s18 = sld [smem:[#allocation8 + $0x3d]] }
  0xd2   : > { %v292_v42 = vpop.permute.xlu1 %291 }
  0xd3   : > { %v297_v43 = vsel %vm272_vm1, 0.0, %v292_v42 }
  0xd4   : > { %v299_v44 = vsel %vm275_vm2, %v297_v43, 0.0 }
  0xd5   : > { %v303_v45 = vrot.slane %v299_v44, 5  ;;  %v719_v44 = vstv %s2376_s18  ;;  %s2361_s18 = sld [smem:[#allocation8 + $0x5]] }
  0xd6   : > { %v294_v47 = vpop.permute.xlu1 %293 }
  0xd7   : > { %v2896_v48 = vsel %vm280_vm3, 0.0, %v303_v45  ;;  %v298_v49 = vsel %vm272_vm1, 0.0, %v294_v47 }
  0xd8   : > { %v300_v50 = vsel %vm275_vm2, %v298_v49, 0.0  ;;  %v267_v51 = vpop.permute.xlu0 %266  ;;  %v342_v52 = vmul.f32 %v341_v46, %v2896_v48  ;;  %v370_v60 = vmul.f32 %v369_v55, %v2896_v48  ;;  %v398_v3 = vmul.f32 %v397_v62, %v2896_v48 }
  0xd9   : > { %v304_v53 = vrot.slane %v300_v50, 5  ;;  %v273_v54 = vsel %vm272_vm1, 0.0, %v267_v51  ;;  %v426_v7 = vmul.f32 %v425_v5, %v2896_v48  ;;  %v454_v10 = vmul.f32 %v453_v8, %v2896_v48 }
  0xda   : > { %v2906_v56 = vsel %vm275_vm2, %v273_v54, 0.0  ;;  %346 = vrot.lane.b32.xlu0 %v342_v52, %s2688_s24  ;;  %v552_v15 = vmul.f32 %v551_v11, %v2896_v48  ;;  %v482_v17 = vmul.f32 %v481_v12, %v2896_v48  ;;  %v594_v23 = vmul.f32 %v593_v18, %v2896_v48 }
  0xdb   : > { %v2910_v57 = vsel %vm280_vm3, %v303_v45, %v304_v53  ;;  %v281_v0 = vrot.slane %v2906_v56, 5  ;;  %v2949_v14 = vsel %vm280_vm3, %v304_v53, 0.0  ;;  %v636_v32 = vmul.f32 %v635_v26, %v2896_v48 }
  0xdc   : > { %v269_v58 = vpop.permute.xlu0 %268  ;;  %v343_v59 = vmul.f32 %v341_v46, %v2910_v57  ;;  %v371_v2 = vmul.f32 %v369_v55, %v2910_v57  ;;  %v399_v6 = vmul.f32 %v397_v62, %v2910_v57  ;;  %v427_v9 = vmul.f32 %v425_v5, %v2910_v57 }
  0xdd   : > { %v274_v61 = vsel %vm272_vm1, 0.0, %v269_v58  ;;  %v553_v13 = vmul.f32 %v551_v11, %v2910_v57  ;;  %v455_v16 = vmul.f32 %v453_v8, %v2910_v57  ;;  %v554_v20 = vmul.f32 %v551_v11, %v2949_v14 }
  0xde   : > { %v2919_v63 = vsel %vm275_vm2, %v274_v61, 0.0  ;;  %348 = vrot.lane.b32.xlu1 %v343_v59, %s2688_s24  ;;  %374 = vrot.lane.b32.xlu0 %v370_v60, %s2689_s8  ;;  %v595_v21 = vmul.f32 %v593_v18, %v2910_v57  ;;  %v558_v22 = vrot.slane %v552_v15, 1  ;;  %v483_v24 = vmul.f32 %v481_v12, %v2910_v57 }
  0xdf   : > { %v282_v1 = vrot.slane %v2919_v63, 5  ;;  %v559_v19 = vrot.slane %v553_v13, 1  ;;  %v596_v25 = vmul.f32 %v593_v18, %v2949_v14  ;;  %v561_v28 = vrot.slane %v554_v20, 1 }
  0xe0   : > { %v601_v29 = vrot.slane %v595_v21, 1  ;;  %v637_v30 = vmul.f32 %v635_v26, %v2910_v57  ;;  %v600_v31 = vrot.slane %v594_v23, 1  ;;  %v638_v34 = vmul.f32 %v635_v26, %v2949_v14 }
  0xe1   : > { %v2932_v4 = vsel %vm280_vm3, %v281_v0, %v282_v1  ;;  %v560_v27 = vsel %vm502_vm4, %v558_v22, %v559_v19  ;;  %v603_v33 = vrot.slane %v596_v25, 1  ;;  %v562_v36 = vsel %vm502_vm4, %v559_v19, %v561_v28 }
  0xe2   : > { %376 = vrot.lane.b32.xlu1 %v371_v2, %s2689_s8  ;;  %402 = vrot.lane.b32.xlu0 %v398_v3, %s2690_s15  ;;  %v602_v37 = vsel %vm502_vm4, %v600_v31, %v601_v29  ;;  %v643_v38 = vrot.slane %v637_v30, 1  ;;  %v679_v39 = vmul.f32 %v677_v35, %v2910_v57  ;;  %v642_v40 = vrot.slane %v636_v32, 1 }
  0xe3   : > { %v678_v41 = vmul.f32 %v677_v35, %v2896_v48  ;;  %v604_v42 = vsel %vm502_vm4, %v601_v29, %v603_v33  ;;  %v645_v43 = vrot.slane %v638_v34, 1  ;;  %v680_v47 = vmul.f32 %v677_v35, %v2949_v14 }
  0xe4   : > { %v644_v45 = vsel %vm502_vm4, %v642_v40, %v643_v38  ;;  %v685_v46 = vrot.slane %v679_v39, 1  ;;  %v721_v49 = vmul.f32 %v719_v44, %v2910_v57  ;;  %v720_v51 = vmul.f32 %v719_v44, %v2896_v48 }
  0xe5   : > { %v684_v50 = vrot.slane %v678_v41, 1  ;;  %v646_v52 = vsel %vm502_vm4, %v643_v38, %v645_v43  ;;  %v722_v53 = vmul.f32 %v719_v44, %v2949_v14  ;;  %v761_v54 = vstv %s2378_s20  ;;  %s2367_s20 = sld [smem:[#allocation8 + $0x8]] }
  0xe6   : > { %404 = vrot.lane.b32.xlu1 %v399_v6, %s2690_s15  ;;  %430 = vrot.lane.b32.xlu0 %v426_v7, %s2691_s23  ;;  %v687_v58 = vrot.slane %v680_v47, 1  ;;  %v727_v59 = vrot.slane %v721_v49, 1  ;;  %v763_v60 = vmul.f32 %v761_v54, %v2910_v57  ;;  %v726_v61 = vrot.slane %v720_v51, 1 }
  0xe7   : > { %v686_v55 = vsel %vm502_vm4, %v684_v50, %v685_v46  ;;  %v762_v62 = vmul.f32 %v761_v54, %v2896_v48  ;;  %v729_v2 = vrot.slane %v722_v53, 1  ;;  %v764_v3 = vmul.f32 %v761_v54, %v2949_v14 }
  0xe8   : > { %v838_v5 = vstv %s2382_s26  ;;  %v688_v6 = vsel %vm502_vm4, %v685_v46, %v687_v58  ;;  %v728_v7 = vsel %vm502_vm4, %v726_v61, %v727_v59  ;;  %v769_v8 = vrot.slane %v763_v60, 1  ;;  %s3051_s26 = sld [smem:[#allocation8 + $0x6]] }
  0xe9   : > { %v839_v11 = vmul.f32 %v838_v5, %v2896_v48  ;;  %v730_v12 = vsel %vm502_vm4, %v727_v59, %v729_v2  ;;  %v771_v13 = vrot.slane %v764_v3, 1  ;;  %v880_v15 = vstv %s2384_s27  ;;  %s2369_s27 = sld [smem:[#allocation8 + $0x9]] }
  0xea   : > { %432 = vrot.lane.b32.xlu1 %v427_v9, %s2691_s23  ;;  %458 = vrot.lane.b32.xlu0 %v454_v10, %s2692_s5  ;;  %v840_v9 = vmul.f32 %v838_v5, %v2910_v57  ;;  %v768_v10 = vrot.slane %v762_v62, 1  ;;  %v841_v18 = vmul.f32 %v838_v5, %v2949_v14  ;;  %v882_v19 = vmul.f32 %v880_v15, %v2910_v57 }
  0xeb   : > { %v845_v20 = vrot.slane %v839_v11, 2  ;;  %v881_v21 = vmul.f32 %v880_v15, %v2896_v48  ;;  %v772_v22 = vsel %vm502_vm4, %v769_v8, %v771_v13  ;;  %v883_v23 = vmul.f32 %v880_v15, %v2949_v14 }
  0xec   : > { %v848_v26 = vrot.slane %v841_v18, 2  ;;  %v964_v33 = vstv %s2388_s28  ;;  %v327_v58 = vstv %s3017_s3  ;;  %v3035_v59 = vsel %vm280_vm3, 0.0, %v281_v0  ;;  %s2373_s28 = sld [smem:[#allocation8 + $0xb]]  ;;  %s2377_s3 = sld [smem:[#allocation8 + $0xd]] }
  0xed   : > { %v887_v29 = vrot.slane %v881_v21, 2  ;;  %v890_v31 = vrot.slane %v883_v23, 2  ;;  %v965_v39 = vmul.f32 %v964_v33, %v2896_v48  ;;  %v328_v2 = vmul.f32 %v327_v58, %v3035_v59 }
  0xee   : > { %460 = vrot.lane.b32.xlu1 %v455_v16, %s2692_s5  ;;  %486 = vrot.lane.b32.xlu0 %v482_v17, %s2693_s7  ;;  %v770_v16 = vsel %vm502_vm4, %v768_v10, %v769_v8  ;;  %v846_v17 = vrot.slane %v840_v9, 2  ;;  %v355_v5 = vstv %s2355_s16  ;;  %v329_v0 = vmul.f32 %v327_v58, %v2932_v4  ;;  %s2381_s16 = sld [smem:[#allocation8 + $0xf]] }
  0xef   : > { %v971_v47 = vrot.slane %v965_v39, 2  ;;  %v356_v56 = vmul.f32 %v355_v5, %v3035_v59  ;;  %v357_v8 = vmul.f32 %v355_v5, %v2932_v4  ;;  %v411_v9 = vstv %s2359_s6  ;;  %s2385_s6 = sld [smem:[#allocation8 + $0x11]] }
  0xf0   : > { %v847_v25 = vsel %vm789_vm5, %v845_v20, %v846_v17  ;;  %v849_v34 = vsel %vm789_vm5, %v846_v17, %v848_v26  ;;  %v412_v10 = vmul.f32 %v411_v9, %v3035_v59  ;;  %v530_v13 = vstv %s2367_s20  ;;  %s2389_s20 = sld [smem:[#allocation8 + $0x13]] }
  0xf1   : > { %v467_v17 = vstv %s3051_s26  ;;  %v531_v18 = vmul.f32 %v530_v13, %v3035_v59  ;;  %v572_v20 = vstv %s2369_s27  ;;  %v3067_v21 = vsel %vm280_vm3, %v282_v1, 0.0  ;;  %s2391_s26 = sld [smem:[#allocation8 + $0x14]]  ;;  %s2392_s27 = sld [smem:[#allocation8 + $0x45]] }
  0xf2   : > { %488 = vrot.lane.b32.xlu1 %v483_v24, %s2693_s7  ;;  %563 = vrot.lane.b32.xlu0 %v560_v27, %s2688_s24  ;;  %v922_v24 = vstv %s2386_s19  ;;  %v888_v27 = vrot.slane %v882_v19, 2  ;;  %s2371_s19 = sld [smem:[#allocation8 + $0xa]]  ;;  %v532_v19 = vmul.f32 %v530_v13, %v2932_v4  ;;  %v533_v63 = vmul.f32 %v530_v13, %v3067_v21 }
  0xf3   : > { %v924_v28 = vmul.f32 %v922_v24, %v2910_v57  ;;  %v923_v30 = vmul.f32 %v922_v24, %v2896_v48  ;;  %v925_v32 = vmul.f32 %v922_v24, %v2949_v14  ;;  %v573_v24 = vmul.f32 %v572_v20, %v3035_v59 }
  0xf4   : > { %v889_v35 = vsel %vm789_vm5, %v887_v29, %v888_v27  ;;  %v891_v40 = vsel %vm789_vm5, %v888_v27, %v890_v31  ;;  %v537_v26 = vrot.slane %v531_v18, 1  ;;  %v538_v27 = vrot.slane %v532_v19, 1 }
  0xf5   : > { %v929_v38 = vrot.slane %v923_v30, 2  ;;  %v932_v41 = vrot.slane %v925_v32, 2  ;;  %v656_v1 = vstv %s2373_s28  ;;  %v469_v29 = vmul.f32 %v467_v17, %v2932_v4  ;;  %s2396_s28 = sld [smem:[#allocation8 + $0x47]] }
  0xf6   : > { %565 = vrot.lane.b32.xlu1 %v562_v36, %s2688_s24  ;;  %605 = vrot.lane.b32.xlu0 %v602_v37, %s2689_s8  ;;  %v930_v36 = vrot.slane %v924_v28, 2  ;;  %v966_v37 = vmul.f32 %v964_v33, %v2910_v57  ;;  %v574_v28 = vmul.f32 %v572_v20, %v2932_v4  ;;  %v575_v32 = vmul.f32 %v572_v20, %v3067_v21 }
  0xf8   : > { %v931_v43 = vsel %vm789_vm5, %v929_v38, %v930_v36  ;;  %v972_v44 = vrot.slane %v966_v37, 2  ;;  %v933_v51 = vsel %vm789_vm5, %v930_v36, %v932_v41  ;;  %v540_v36 = vrot.slane %v533_v63, 1 }
  0xf9   : > { %v657_v41 = vmul.f32 %v656_v1, %v3035_v59 }
  0xfa   : > { %607 = vrot.lane.b32.xlu1 %v604_v42, %s2689_s8  ;;  %647 = vrot.lane.b32.xlu0 %v644_v45, %s2690_s15  ;;  %v1006_v42 = vstv %s2390_s17  ;;  %v967_v45 = vmul.f32 %v964_v33, %v2949_v14  ;;  %s2375_s17 = sld [smem:[#allocation8 + $0xc]]  ;;  %v539_v33 = vsel %vm502_vm4, %v537_v26, %v538_v27 }
  0xfb   : > { %v1008_v46 = vmul.f32 %v1006_v42, %v2910_v57  ;;  %v1007_v49 = vmul.f32 %v1006_v42, %v2896_v48  ;;  %v1009_v50 = vmul.f32 %v1006_v42, %v2949_v14 }
  0xfc   : > { %v974_v53 = vrot.slane %v967_v45, 2 }
  0xfd   : > { %v1014_v54 = vrot.slane %v1008_v46, 2  ;;  %v1016_v62 = vrot.slane %v1009_v50, 2  ;;  %v740_v46 = vstv %s2377_s3  ;;  %v663_v50 = vrot.slane %v657_v41, 1  ;;  %s2398_s3 = sld [smem:[#allocation8 + $0x48]] }
  0xfe   : > { %649 = vrot.lane.b32.xlu1 %v646_v52, %s2690_s15  ;;  %689 = vrot.lane.b32.xlu0 %v686_v55, %s2691_s23  ;;  %v973_v52 = vsel %vm789_vm5, %v971_v47, %v972_v44  ;;  %v1013_v55 = vrot.slane %v1007_v49, 2  ;;  %v975_v60 = vsel %vm789_vm5, %v972_v44, %v974_v53  ;;  %v658_v44 = vmul.f32 %v656_v1, %v2932_v4 }
  0xff   : > { %v1017_v3 = vsel %vm789_vm5, %v1014_v54, %v1016_v62  ;;  %v741_v58 = vmul.f32 %v740_v46, %v3035_v59  ;;  %v743_v13 = vmul.f32 %v740_v46, %v3067_v21 }
 0x100   : > { %v1015_v61 = vsel %vm789_vm5, %v1013_v55, %v1014_v54  ;;  %v698_v37 = vstv %s2375_s17  ;;  %v659_v55 = vmul.f32 %v656_v1, %v3067_v21  ;;  %s2397_s17 = sld [smem:[#allocation8 + $0x17]] }
 0x101   : > { %v700_v54 = vmul.f32 %v698_v37, %v2932_v4  ;;  %v701_v62 = vmul.f32 %v698_v37, %v3067_v21 }
 0x102   : > { %691 = vrot.lane.b32.xlu1 %v688_v6, %s2691_s23  ;;  %731 = vrot.lane.b32.xlu0 %v728_v7, %s2692_s5  ;;  %v383_v6 = vstv %s2357_s30  ;;  %s2383_s30 = sld [smem:[#allocation8 + $0x10]] }
 0x103   : > { %v384_v7 = vmul.f32 %v383_v6, %v3035_v59  ;;  %v385_v11 = vmul.f32 %v383_v6, %v2932_v4  ;;  %v747_v6 = vrot.slane %v741_v58, 1 }
 0x106   : > { %733 = vrot.lane.b32.xlu1 %v730_v12, %s2692_s5  ;;  %773 = vrot.lane.b32.xlu0 %v770_v16, %s2693_s7  ;;  %v439_v12 = vstv %s2361_s18  ;;  %v413_v16 = vmul.f32 %v411_v9, %v2932_v4  ;;  %s2387_s18 = sld [smem:[#allocation8 + $0x12]] }
 0x107   : > { %v440_v15 = vmul.f32 %v439_v12, %v3035_v59  ;;  %v441_v23 = vmul.f32 %v439_v12, %v2932_v4 }
 0x10a   : > { %775 = vrot.lane.b32.xlu1 %v772_v22, %s2693_s7  ;;  %850 = vrot.lane.b32.xlu0 %v847_v25, %s2688_s24  ;;  %v468_v22 = vmul.f32 %v467_v17, %v3035_v59  ;;  %v614_v25 = vstv %s2371_s19  ;;  %s2395_s19 = sld [smem:[#allocation8 + $0x16]] }
 0x10b   : > { %v615_v30 = vmul.f32 %v614_v25, %v3035_v59  ;;  %v616_v31 = vmul.f32 %v614_v25, %v2932_v4  ;;  %v617_v45 = vmul.f32 %v614_v25, %v3067_v21 }
 0x10c   : > { %v943_v26 = vstv %s2387_s18  ;;  %s2402_s18 = sld [smem:[#allocation8 + $0x4a]] }
 0x10d   : > { %v621_v38 = vrot.slane %v615_v30, 1  ;;  %v622_v39 = vrot.slane %v616_v31, 1  ;;  %v624_v53 = vrot.slane %v617_v45, 1  ;;  %v1027_v45 = vstv %s2391_s26  ;;  %s2404_s26 = sld [smem:[#allocation8 + $0x4b]] }
 0x10e   : > { %852 = vrot.lane.b32.xlu1 %v849_v34, %s2688_s24  ;;  %892 = vrot.lane.b32.xlu0 %v889_v35, %s2689_s8  ;;  %v579_v34 = vrot.slane %v573_v24, 1  ;;  %v580_v35 = vrot.slane %v574_v28, 1  ;;  %v946_v58 = vmul.f32 %v943_v26, %v3067_v21 }
 0x10f   : > { %v623_v47 = vsel %vm502_vm4, %v621_v38, %v622_v39  ;;  %v625_v5 = vsel %vm502_vm4, %v622_v39, %v624_v53  ;;  %v944_v39 = vmul.f32 %v943_v26, %v3035_v59 }
 0x110   : > { %v581_v42 = vsel %vm502_vm4, %v579_v34, %v580_v35  ;;  %v985_v34 = vstv %s2389_s20  ;;  %s2403_s20 = sld [smem:[#allocation8 + $0x1a]] }
 0x112   : > { %894 = vrot.lane.b32.xlu1 %v891_v40, %s2689_s8  ;;  %934 = vrot.lane.b32.xlu0 %v931_v43, %s2690_s15  ;;  %v582_v40 = vrot.slane %v575_v32, 1  ;;  %v541_v43 = vsel %vm502_vm4, %v538_v27, %v540_v36 }
 0x114   : > { %v583_v49 = vsel %vm502_vm4, %v580_v35, %v582_v40  ;;  %v945_v40 = vmul.f32 %v943_v26, %v2932_v4 }
 0x116   : > { %936 = vrot.lane.b32.xlu1 %v933_v51, %s2690_s15  ;;  %976 = vrot.lane.b32.xlu0 %v973_v52, %s2691_s23  ;;  %v699_v51 = vmul.f32 %v698_v37, %v3035_v59  ;;  %v664_v52 = vrot.slane %v658_v44, 1 }
 0x11a   : > { %978 = vrot.lane.b32.xlu1 %v975_v60, %s2691_s23  ;;  %1018 = vrot.lane.b32.xlu0 %v1015_v61, %s2692_s5  ;;  %v705_v60 = vrot.slane %v699_v51, 1  ;;  %v742_v61 = vmul.f32 %v740_v46, %v2932_v4  ;;  %v951_v51 = vrot.slane %v945_v40, 2 }
 0x11e   : > { %1020 = vrot.lane.b32.xlu1 %v1017_v3, %s2692_s5  ;;  %332 = vrot.lane.b32.xlu0 %v328_v2, %s2688_s24  ;;  %v817_v2 = vstv %s2381_s16  ;;  %v665_v3 = vsel %vm502_vm4, %v663_v50, %v664_v52  ;;  %v950_v50 = vrot.slane %v944_v39, 2  ;;  %v1146_v39 = vstv %s2397_s17  ;;  %s2399_s16 = sld [smem:[#allocation8 + $0x18]]  ;;  %s3273_s17 = sld [smem:[#allocation8 + $0x62]] }
 0x11f   : > { %v818_v9 = vmul.f32 %v817_v2, %v3035_v59  ;;  %v820_v25 = vmul.f32 %v817_v2, %v3067_v21 }
 0x121   : > { %v824_v19 = vrot.slane %v818_v9, 2 }
 0x122   : > { %360 = vrot.lane.b32.xlu0 %v356_v56, %s2689_s8  ;;  %334 = vrot.lane.b32.xlu1 %v329_v0, %s2688_s24  ;;  %v706_v56 = vrot.slane %v700_v54, 1  ;;  %v666_v0 = vrot.slane %v659_v55, 1  ;;  %v987_v55 = vmul.f32 %v985_v34, %v2932_v4 }
 0x124   : > { %v667_v12 = vsel %vm502_vm4, %v664_v52, %v666_v0  ;;  %v986_v52 = vmul.f32 %v985_v34, %v3035_v59  ;;  %v993_v0 = vrot.slane %v987_v55, 2 }
 0x126   : > { %388 = vrot.lane.b32.xlu0 %v384_v7, %s2690_s15  ;;  %362 = vrot.lane.b32.xlu1 %v357_v8, %s2689_s8  ;;  %v748_v7 = vrot.slane %v742_v61, 1  ;;  %v708_v8 = vrot.slane %v701_v62, 1  ;;  %v952_v62 = vsel %vm789_vm5, %v950_v50, %v951_v51 }
 0x128   : > { %v749_v17 = vsel %vm502_vm4, %v747_v6, %v748_v7  ;;  %v709_v18 = vsel %vm502_vm4, %v706_v56, %v708_v8  ;;  %v953_v6 = vrot.slane %v946_v58, 2  ;;  %v1048_v8 = vstv %s2392_s27  ;;  %s3250_s27 = sld [smem:[#allocation8]] }
 0x12a   : > { %416 = vrot.lane.b32.xlu0 %v412_v10, %s2691_s23  ;;  %390 = vrot.lane.b32.xlu1 %v385_v11, %s2690_s15  ;;  %v819_v10 = vmul.f32 %v817_v2, %v2932_v4  ;;  %v707_v11 = vsel %vm502_vm4, %v705_v60, %v706_v56  ;;  %v992_v2 = vrot.slane %v986_v52, 2  ;;  %v1148_v52 = vmul.f32 %v1146_v39, %v2932_v4 }
 0x12c   : > { %v825_v20 = vrot.slane %v819_v10, 2 }
 0x12e   : > { %444 = vrot.lane.b32.xlu0 %v440_v15, %s2692_s5  ;;  %418 = vrot.lane.b32.xlu1 %v413_v16, %s2691_s23  ;;  %v859_v15 = vstv %s2383_s30  ;;  %v901_v16 = vstv %s2385_s6  ;;  %v826_v28 = vsel %vm789_vm5, %v824_v19, %v825_v20  ;;  %v1030_v19 = vmul.f32 %v1027_v45, %v3067_v21  ;;  %s2400_s30 = sld [smem:[#allocation8 + $0x49]] }
 0x12f   : > { %v861_v24 = vmul.f32 %v859_v15, %v2932_v4  ;;  %v902_v63 = vmul.f32 %v901_v16, %v3035_v59  ;;  %v903_v1 = vmul.f32 %v901_v16, %v2932_v4  ;;  %v904_v44 = vmul.f32 %v901_v16, %v3067_v21  ;;  %s2401_s6 = sld [smem:[#allocation8 + $0x19]] }
 0x130   : > { %v994_v16 = vsel %vm789_vm5, %v992_v2, %v993_v0  ;;  %v1167_v2 = vstv %s2398_s3  ;;  %s3281_s3 = sld [smem:[#allocation8 + $0x4c]] }
 0x131   : > { %v867_v32 = vrot.slane %v861_v24, 2  ;;  %v908_v37 = vrot.slane %v902_v63, 2  ;;  %v909_v38 = vrot.slane %v903_v1, 2  ;;  %v911_v54 = vrot.slane %v904_v44, 2 }
 0x132   : > { %472 = vrot.lane.b32.xlu0 %v468_v22, %s2693_s7  ;;  %446 = vrot.lane.b32.xlu1 %v441_v23, %s2692_s5  ;;  %v750_v22 = vrot.slane %v743_v13, 1  ;;  %v860_v23 = vmul.f32 %v859_v15, %v3035_v59  ;;  %v1050_v13 = vmul.f32 %v1048_v8, %v2910_v57  ;;  %v1037_v63 = vrot.slane %v1030_v19, 2 }
 0x133   : > { %v912_v56 = vsel %vm789_vm5, %v909_v38, %v911_v54 }
 0x134   : > { %v751_v30 = vsel %vm502_vm4, %v748_v7, %v750_v22  ;;  %v866_v31 = vrot.slane %v860_v23, 2  ;;  %v988_v7 = vmul.f32 %v985_v34, %v3067_v21 }
 0x136   : > { %542 = vrot.lane.b32.xlu0 %v539_v33, %s2688_s24  ;;  %474 = vrot.lane.b32.xlu1 %v469_v29, %s2693_s7  ;;  %v862_v29 = vmul.f32 %v859_v15, %v3067_v21  ;;  %v827_v33 = vrot.slane %v820_v25, 2  ;;  %v868_v41 = vsel %vm789_vm5, %v866_v31, %v867_v32  ;;  %v1104_v15 = vstv %s2395_s19  ;;  %s3262_s19 = sld [smem:[#allocation8 + $0x1b]] }
 0x137   : > { %v1056_v25 = vrot.slane %v1050_v13, 2  ;;  %v1105_v26 = vmul.f32 %v1104_v15, %v3035_v59  ;;  %v1106_v1 = vmul.f32 %v1104_v15, %v2932_v4  ;;  %v1125_v31 = vstv %s2396_s28  ;;  %s3265_s28 = sld [smem:[#allocation8 + $0x31]] }
 0x138   : > { %v1126_v44 = vmul.f32 %v1125_v31, %v2896_v48  ;;  %v1128_v58 = vmul.f32 %v1125_v31, %v2949_v14  ;;  %v1149_v13 = vmul.f32 %v1146_v39, %v3067_v21 }
 0x13a   : > { %584 = vrot.lane.b32.xlu0 %v581_v42, %s2689_s8  ;;  %544 = vrot.lane.b32.xlu1 %v541_v43, %s2688_s24  ;;  %v828_v42 = vsel %vm789_vm5, %v825_v20, %v827_v33  ;;  %v869_v43 = vrot.slane %v862_v29, 2  ;;  %v1049_v20 = vmul.f32 %v1048_v8, %v2896_v48  ;;  %v1051_v29 = vmul.f32 %v1048_v8, %v2949_v14 }
 0x13c   : > { %v870_v53 = vsel %vm789_vm5, %v867_v32, %v869_v43  ;;  %v1107_v43 = vmul.f32 %v1104_v15, %v3067_v21  ;;  %v1168_v15 = vmul.f32 %v1167_v2, %v2896_v48 }
 0x13e   : > { %626 = vrot.lane.b32.xlu0 %v623_v47, %s2690_s15  ;;  %586 = vrot.lane.b32.xlu1 %v583_v49, %s2689_s8  ;;  %v910_v49 = vsel %vm789_vm5, %v908_v37, %v909_v38  ;;  %v1111_v37 = vrot.slane %v1105_v26, 3  ;;  %v1127_v38 = vmul.f32 %v1125_v31, %v2910_v57  ;;  %v1114_v55 = vrot.slane %v1107_v43, 3 }
 0x13f   : > { %v1156_v26 = vrot.slane %v1149_v13, 3 }
 0x140   : > { %v1133_v50 = vrot.slane %v1127_v38, 3  ;;  %v1230_v38 = vstv %s2401_s6  ;;  %s3325_s6 = sld [smem:[#allocation8 + $0x1e]] }
 0x142   : > { %668 = vrot.lane.b32.xlu0 %v665_v3, %s2691_s23  ;;  %628 = vrot.lane.b32.xlu1 %v625_v5, %s2690_s15  ;;  %v1028_v3 = vmul.f32 %v1027_v45, %v3035_v59  ;;  %v1029_v5 = vmul.f32 %v1027_v45, %v2932_v4 }
 0x146   : > { %710 = vrot.lane.b32.xlu0 %v707_v11, %s2692_s5  ;;  %670 = vrot.lane.b32.xlu1 %v667_v12, %s2691_s23  ;;  %v1034_v11 = vrot.slane %v1028_v3, 2  ;;  %v1035_v12 = vrot.slane %v1029_v5, 2 }
 0x148   : > { %v1036_v24 = vsel %vm789_vm5, %v1034_v11, %v1035_v12  ;;  %v1038_v40 = vsel %vm789_vm5, %v1035_v12, %v1037_v63  ;;  %v1135_v11 = vrot.slane %v1128_v58, 3  ;;  %v1169_v12 = vmul.f32 %v1167_v2, %v2910_v57 }
 0x149   : > { %v1174_v63 = vrot.slane %v1168_v15, 3 }
 0x14a   : > { %752 = vrot.lane.b32.xlu0 %v749_v17, %s2693_s7  ;;  %712 = vrot.lane.b32.xlu1 %v709_v18, %s2692_s5  ;;  %v954_v17 = vsel %vm789_vm5, %v951_v51, %v953_v6  ;;  %v995_v18 = vrot.slane %v988_v7, 2  ;;  %v1147_v51 = vmul.f32 %v1146_v39, %v3035_v59  ;;  %v1154_v6 = vrot.slane %v1148_v52, 3 }
 0x14b   : > { %v1188_v7 = vstv %s2399_s16  ;;  %v1231_v52 = vmul.f32 %v1230_v38, %v3035_v59  ;;  %s3283_s16 = sld [smem:[#allocation8 + $0x1d]] }
 0x14c   : > { %v3120_v27 = vpop.permute.xlu0 %346  ;;  %v1189_v19 = vmul.f32 %v1188_v7, %v3035_v59 }
 0x14e   : > { %829 = vrot.lane.b32.xlu0 %v826_v28, %s2688_s24  ;;  %754 = vrot.lane.b32.xlu1 %v751_v30, %s2693_s7  ;;  %v996_v28 = vsel %vm789_vm5, %v993_v0, %v995_v18  ;;  %v1055_v30 = vrot.slane %v1049_v20, 2  ;;  %v1153_v0 = vrot.slane %v1147_v51, 3  ;;  %v1190_v20 = vmul.f32 %v1188_v7, %v2932_v4 }
 0x14f   : > { %v1195_v31 = vrot.slane %v1189_v19, 3  ;;  %v1272_v19 = vstv %s2403_s20  ;;  %s3344_s20 = sld [smem:[#allocation8 + $0x38]] }
 0x150   : > { %v3129_v35 = vpop.permute.xlu1 %348  ;;  %v3131_v36 = vpop.permute.xlu0 %374  ;;  %v1057_v34 = vsel %vm789_vm5, %v1055_v30, %v1056_v25  ;;  %v1155_v18 = vsel %vm1076_vm6, %v1153_v0, %v1154_v6 }
 0x152   : > { %871 = vrot.lane.b32.xlu0 %v868_v41, %s2689_s8  ;;  %831 = vrot.lane.b32.xlu1 %v828_v42, %s2688_s24  ;;  %v1112_v41 = vrot.slane %v1106_v1, 3  ;;  %v1058_v42 = vrot.slane %v1051_v29, 2  ;;  %v1209_v1 = vstv %s2400_s30  ;;  %s3305_s30 = sld [smem:[#allocation8 + $0x4e]] }
 0x153   : > { %v1210_v43 = vmul.f32 %v1209_v1, %v2896_v48 }
 0x154   : > { %v3140_v46 = vpop.permute.xlu1 %376  ;;  %v3142_v47 = vpop.permute.xlu0 %402  ;;  %v1059_v54 = vsel %vm789_vm5, %v1056_v25, %v1058_v42  ;;  %v1115_v8 = vsel %vm1076_vm6, %v1112_v41, %v1114_v55  ;;  %v1175_v25 = vrot.slane %v1169_v12, 3  ;;  %v1191_v42 = vmul.f32 %v1188_v7, %v3067_v21 }
 0x156   : > { %913 = vrot.lane.b32.xlu0 %v910_v49, %s2690_s15  ;;  %873 = vrot.lane.b32.xlu1 %v870_v53, %s2689_s8  ;;  %v1113_v53 = vsel %vm1076_vm6, %v1111_v37, %v1112_v41  ;;  %v1211_v37 = vmul.f32 %v1209_v1, %v2910_v57  ;;  %v1176_v39 = vsel %vm1076_vm6, %v1174_v63, %v1175_v25  ;;  %v1198_v58 = vrot.slane %v1191_v42, 3 }
 0x157   : > { %v1274_v63 = vmul.f32 %v1272_v19, %v2932_v4 }
 0x158   : > { %v3151_v60 = vpop.permute.xlu1 %404  ;;  %v3153_v61 = vpop.permute.xlu0 %430  ;;  %v1217_v51 = vrot.slane %v1211_v37, 3 }
 0x15a   : > { %955 = vrot.lane.b32.xlu0 %v952_v62, %s2691_s23  ;;  %915 = vrot.lane.b32.xlu1 %v912_v56, %s2690_s15  ;;  %v1132_v62 = vrot.slane %v1126_v44, 3 }
 0x15c   : > { %v3162_v9 = vpop.permute.xlu1 %432  ;;  %v3164_v10 = vpop.permute.xlu0 %458  ;;  %v1134_v56 = vsel %vm1076_vm6, %v1132_v62, %v1133_v50  ;;  %v1212_v62 = vmul.f32 %v1209_v1, %v2949_v14 }
 0x15e   : > { %997 = vrot.lane.b32.xlu0 %v994_v16, %s2692_s5  ;;  %957 = vrot.lane.b32.xlu1 %v954_v17, %s2691_s23  ;;  %v1219_v15 = vrot.slane %v1212_v62, 3 }
 0x160   : > { %v3173_v22 = vpop.permute.xlu1 %460  ;;  %v3175_v23 = vpop.permute.xlu0 %486 }
 0x162   : > { %1039 = vrot.lane.b32.xlu0 %v1036_v24, %s2693_s7  ;;  %999 = vrot.lane.b32.xlu1 %v996_v28, %s2692_s5  ;;  %v1136_v24 = vsel %vm1076_vm6, %v1133_v50, %v1135_v11  ;;  %v1170_v28 = vmul.f32 %v1167_v2, %v2949_v14  ;;  %v1216_v2 = vrot.slane %v1210_v43, 3 }
 0x164   : > { %v3184_v32 = vpop.permute.xlu1 %488  ;;  %v3186_v33 = vpop.permute.xlu0 %563  ;;  %v1177_v41 = vrot.slane %v1170_v28, 3  ;;  %v1218_v7 = vsel %vm1076_vm6, %v1216_v2, %v1217_v51  ;;  %v1273_v28 = vmul.f32 %v1272_v19, %v3035_v59  ;;  %v1314_v2 = vstv %s3262_s19  ;;  %s3359_s19 = sld [smem:[#allocation8 + $0x50]] }
 0x166   : > { %1060 = vrot.lane.b32.xlu0 %v1057_v34, %s2693_s7  ;;  %1041 = vrot.lane.b32.xlu1 %v1038_v40, %s2693_s7  ;;  %v1196_v34 = vrot.slane %v1190_v20, 3  ;;  %v1157_v40 = vsel %vm1076_vm6, %v1154_v6, %v1156_v26  ;;  %v1178_v55 = vsel %vm1076_vm6, %v1175_v25, %v1177_v41  ;;  %v1279_v43 = vrot.slane %v1273_v28, 3 }
 0x167   : > { %v1316_v28 = vmul.f32 %v1314_v2, %v2932_v4 }
 0x168   : > { %v3195_v45 = vpop.permute.xlu1 %565  ;;  %v3197_v49 = vpop.permute.xlu0 %605  ;;  %v1199_v13 = vsel %vm1076_vm6, %v1196_v34, %v1198_v58 }
 0x16a   : > { %1116 = vrot.lane.b32.xlu0 %v1113_v53, %s2688_s24  ;;  %1062 = vrot.lane.b32.xlu1 %v1059_v54, %s2693_s7  ;;  %v1232_v53 = vmul.f32 %v1230_v38, %v2932_v4  ;;  %v1197_v54 = vsel %vm1076_vm6, %v1195_v31, %v1196_v34  ;;  %v1220_v31 = vsel %vm1076_vm6, %v1217_v51, %v1219_v15  ;;  %v1280_v51 = vrot.slane %v1274_v63, 3 }
 0x16c   : > { %v3206_v3 = vpop.permute.xlu1 %607  ;;  %v3208_v5 = vpop.permute.xlu0 %647  ;;  %v1238_v11 = vrot.slane %v1232_v53, 3  ;;  %v1275_v53 = vmul.f32 %v1272_v19, %v3067_v21 }
 0x16e   : > { %1137 = vrot.lane.b32.xlu0 %v1134_v56, %s2688_s24  ;;  %1118 = vrot.lane.b32.xlu1 %v1115_v8, %s2688_s24  ;;  %v1251_v56 = vstv %s2402_s18  ;;  %v1237_v8 = vrot.slane %v1231_v52, 3  ;;  %v1282_v15 = vrot.slane %v1275_v53, 3  ;;  %s3339_s18 = sld [smem:[#allocation8 + $0x7]] }
 0x16f   : > { %v1253_v12 = vmul.f32 %v1251_v56, %v2910_v57  ;;  %v1252_v20 = vmul.f32 %v1251_v56, %v2896_v48  ;;  %v1254_v37 = vmul.f32 %v1251_v56, %v2949_v14 }
 0x170   : > { %v3217_v16 = vpop.permute.xlu1 %649  ;;  %v3219_v17 = vpop.permute.xlu0 %689  ;;  %v1239_v1 = vsel %vm1076_vm6, %v1237_v8, %v1238_v11 }
 0x171   : > { %v1259_v26 = vrot.slane %v1253_v12, 3  ;;  %v1261_v58 = vrot.slane %v1254_v37, 3  ;;  %v1335_v37 = vstv %s3281_s3  ;;  %s3426_s3 = sld [smem:[#allocation8 + $0x21]] }
 0x172   : > { %1158 = vrot.lane.b32.xlu0 %v1155_v18, %s2689_s8  ;;  %1139 = vrot.lane.b32.xlu1 %v1136_v24, %s2688_s24  ;;  %v1233_v18 = vmul.f32 %v1230_v38, %v3067_v21  ;;  %v1258_v38 = vrot.slane %v1252_v20, 3  ;;  %v1315_v20 = vmul.f32 %v1314_v2, %v3035_v59 }
 0x173   : > { %v1262_v19 = vsel %vm1076_vm6, %v1259_v26, %v1261_v58 }
 0x174   : > { %v3228_v29 = vpop.permute.xlu1 %691  ;;  %v3230_v30 = vpop.permute.xlu0 %731  ;;  %v1240_v34 = vrot.slane %v1233_v18, 3  ;;  %v312_v18 = vstv %s3273_s17  ;;  %v1321_v58 = vrot.slane %v1315_v20, 3  ;;  %s3410_s17 = sld [smem:[#allocation8 + $0x51]] }
 0x176   : > { %1179 = vrot.lane.b32.xlu0 %v1176_v39, %s2689_s8  ;;  %1160 = vrot.lane.b32.xlu1 %v1157_v40, %s2689_s8  ;;  %v1293_v39 = vstv %s2404_s26  ;;  %v315_v40 = vstv %s3250_s27  ;;  %s3346_s26 = sld [smem:[#allocation8 + $0x4f]] }
 0x177   : > { %v1295_v52 = vmul.f32 %v1293_v39, %v2910_v57  ;;  %v1294_v62 = vmul.f32 %v1293_v39, %v2896_v48  ;;  %v316_v56 = vmul.f32 %v315_v40, %v3035_v59  ;;  %v1296_v63 = vmul.f32 %v1293_v39, %v2949_v14  ;;  %s3355_s27 = sld [smem:[#allocation8 + $0x1f]] }
 0x178   : > { %v3239_v44 = vpop.permute.xlu1 %733  ;;  %v3241_v50 = vpop.permute.xlu0 %773  ;;  %v1337_v39 = vmul.f32 %v1335_v37, %v2910_v57 }
 0x17a   : > { %1200 = vrot.lane.b32.xlu0 %v1197_v54, %s2690_s15  ;;  %1181 = vrot.lane.b32.xlu1 %v1178_v55, %s2689_s8  ;;  %v1260_v54 = vsel %vm1076_vm6, %v1258_v38, %v1259_v26  ;;  %v1241_v55 = vsel %vm1076_vm6, %v1238_v11, %v1240_v34  ;;  %v1301_v11 = vrot.slane %v1295_v52, 3  ;;  %v317_v34 = vmul.f32 %v315_v40, %v2932_v4 }
 0x17b   : > { %v1391_v38 = vstv %s3283_s16  ;;  %v1303_v40 = vrot.slane %v1296_v63, 3  ;;  %v1412_v63 = vstv %s3305_s30  ;;  %s3432_s16 = sld [smem:[#allocation8 + $0x3f]]  ;;  %s3443_s30 = sld [smem:[#allocation8 + $0xe]] }
 0x17c   : > { %v3252_v0 = vpop.permute.xlu1 %775  ;;  %v3254_v6 = vpop.permute.xlu0 %850 }
 0x17e   : > { %1221 = vrot.lane.b32.xlu0 %v1218_v7, %s2690_s15  ;;  %1202 = vrot.lane.b32.xlu1 %v1199_v13, %s2690_s15  ;;  %v321_v7 = vstv %s3265_s28  ;;  %v1281_v13 = vsel %vm1076_vm6, %v1279_v43, %v1280_v51  ;;  %s3383_s28 = sld [smem:[#allocation8 + $0x20]] }
 0x17f   : > { %v322_v53 = vmul.f32 %v321_v7, %v2896_v48 }
 0x180   : > { %v3267_v24 = vpop.permute.xlu1 %852  ;;  %v3269_v25 = vpop.permute.xlu0 %892 }
 0x182   : > { %1242 = vrot.lane.b32.xlu0 %v1239_v1, %s2691_s23  ;;  %1223 = vrot.lane.b32.xlu1 %v1220_v31, %s2690_s15  ;;  %v1300_v1 = vrot.slane %v1294_v62, 3  ;;  %v318_v31 = vadd.f32 %v316_v56, %v312_v18  ;;  %v1322_v62 = vrot.slane %v1316_v28, 3  ;;  %v1336_v56 = vmul.f32 %v1335_v37, %v2896_v48 }
 0x183   : > { %v1338_v28 = vmul.f32 %v1335_v37, %v2949_v14 }
 0x184   : > { %v3285_v41 = vpop.permute.xlu1 %894  ;;  %v3287_v42 = vpop.permute.xlu0 %934  ;;  %v1302_v26 = vsel %vm1076_vm6, %v1300_v1, %v1301_v11  ;;  %v319_v1 = vadd.f32 %v317_v34, %v312_v18  ;;  %v1342_v18 = vrot.slane %v1336_v56, 3  ;;  %v1394_v34 = vmul.f32 %v1391_v38, %v3067_v21 }
 0x185   : > { %v1345_v56 = vrot.slane %v1338_v28, 3 }
 0x186   : > { %1263 = vrot.lane.b32.xlu0 %v1260_v54, %s2691_s23  ;;  %1244 = vrot.lane.b32.xlu1 %v1241_v55, %s2691_s23  ;;  %v1317_v54 = vmul.f32 %v1314_v2, %v3067_v21  ;;  %v1283_v55 = vsel %vm1076_vm6, %v1280_v51, %v1282_v15  ;;  %v1393_v2 = vmul.f32 %v1391_v38, %v2932_v4  ;;  %v1343_v15 = vrot.slane %v1337_v39, 3 }
 0x188   : > { %v3299_v8 = vpop.permute.xlu1 %936  ;;  %v3301_v12 = vpop.permute.xlu0 %976  ;;  %v1324_v20 = vrot.slane %v1317_v54, 3  ;;  %v1346_v28 = vsel %vm1076_vm6, %v1343_v15, %v1345_v56 }
 0x189   : > { %3970 = vst [vmem:[#allocation13_spill] sm:$0xff] %v3301_v12  ;;  %v323_v12 = vmul.f32 %v321_v7, %v2910_v57  ;;  %v1414_v7 = vmul.f32 %v1412_v63, %v2910_v57 }
 0x18a   : > { %1284 = vrot.lane.b32.xlu0 %v1281_v13, %s2692_s5  ;;  %1265 = vrot.lane.b32.xlu1 %v1262_v19, %s2691_s23  ;;  %v1392_v13 = vmul.f32 %v1391_v38, %v3035_v59  ;;  %v324_v19 = vadd.f32 %v322_v53, %v318_v31  ;;  %v1399_v53 = vrot.slane %v1393_v2, 4  ;;  %v1413_v38 = vmul.f32 %v1412_v63, %v2896_v48 }
 0x18c   : > { %v3316_v43 = vpop.permute.xlu1 %978  ;;  %v3318_v52 = vpop.permute.xlu0 %1018  ;;  %v1398_v31 = vrot.slane %v1392_v13, 4 }
 0x18d   : > { %3971 = vst [vmem:[#allocation14_spill] sm:$0xff] %v3316_v43  ;;  %3972 = vst [vmem:[#allocation15_spill] sm:$0xff] %v3318_v52 }
 0x18e   : > { %1305 = vrot.lane.b32.xlu0 %v1302_v26, %s2692_s5  ;;  %1286 = vrot.lane.b32.xlu1 %v1283_v55, %s2692_s5  ;;  %v1323_v26 = vsel %vm1076_vm6, %v1321_v58, %v1322_v62  ;;  %v1304_v55 = vsel %vm1076_vm6, %v1301_v11, %v1303_v40  ;;  %v325_v11 = vadd.f32 %v323_v12, %v319_v1  ;;  %v1420_v1 = vrot.slane %v1414_v7, 4 }
 0x18f   : > { %v1344_v58 = vsel %vm1076_vm6, %v1342_v18, %v1343_v15  ;;  %v1325_v40 = vsel %vm1076_vm6, %v1322_v62, %v1324_v20  ;;  %v1400_v62 = vsel %vm1363_vm7, %v1398_v31, %v1399_v53  ;;  %v3372_v31 = vstv %s3344_s20  ;;  %s3459_s20 = sld [smem:[#allocation8 + $0x53]] }
 0x190   : > { %v3332_v52 = vpop.permute.xlu1 %1020  ;;  %v333_v51 = vpop.permute.xlu0 %332  ;;  %v1454_v7 = vstv %s3346_s26  ;;  %s3465_s26 = sld [smem:[#allocation8 + $0x55]] }
 0x191   : > { %v338_v43 = vadd.f32 %v333_v51, %v324_v19  ;;  %v1415_v51 = vmul.f32 %v1412_v63, %v2949_v14  ;;  %v1419_v63 = vrot.slane %v1413_v38, 4 }
 0x192   : > { %1326 = vrot.lane.b32.xlu0 %v1323_v26, %s2693_s7  ;;  %1307 = vrot.lane.b32.xlu1 %v1304_v55, %s2692_s5  ;;  %v1433_v26 = vstv %s3325_s6  ;;  %s3445_s6 = sld [smem:[#allocation8 + $0x52]] }
 0x193   : > { %v352_v37 = vadd.f32 %v3120_v27, %v338_v43  ;;  %v1401_v27 = vrot.slane %v1394_v34, 4  ;;  %v1434_v55 = vmul.f32 %v1433_v26, %v3035_v59  ;;  %v1435_v18 = vmul.f32 %v1433_v26, %v2932_v4 }
 0x194   : > { %v335_v39 = vpop.permute.xlu1 %334  ;;  %v361_v54 = vpop.permute.xlu0 %360 }
 0x195   : > { %v339_v13 = vadd.f32 %v335_v39, %v325_v11  ;;  %v366_v19 = vadd.f32 %v361_v54, %v352_v37  ;;  %v1422_v11 = vrot.slane %v1415_v51, 4  ;;  %v1421_v54 = vsel %vm1363_vm7, %v1419_v63, %v1420_v1 }
 0x196   : > { %1347 = vrot.lane.b32.xlu0 %v1344_v58, %s2693_s7  ;;  %1328 = vrot.lane.b32.xlu1 %v1325_v40, %s2693_s7  ;;  %v1436_v58 = vmul.f32 %v1433_v26, %v3067_v21  ;;  %v1440_v38 = vrot.slane %v1434_v55, 4  ;;  %v514_v26 = vmul.f32 %v3372_v31, %v2896_v48 }
 0x197   : > { %v353_v12 = vadd.f32 %v3129_v35, %v339_v13  ;;  %v380_v43 = vadd.f32 %v3131_v36, %v366_v19  ;;  %v495_v35 = vstv %s3339_s18  ;;  %v1402_v36 = vsel %vm1363_vm7, %v1399_v53, %v1401_v27  ;;  %s3450_s18 = sld [smem:[#allocation8 + $0x22]] }
 0x198   : > { %v363_v2 = vpop.permute.xlu1 %362  ;;  %v389_v20 = vpop.permute.xlu0 %388  ;;  %v1441_v13 = vrot.slane %v1435_v18, 4  ;;  %v496_v19 = vmul.f32 %v495_v35, %v3035_v59  ;;  %v1456_v53 = vmul.f32 %v1454_v7, %v2910_v57 }
 0x199   : > { %v367_v34 = vadd.f32 %v363_v2, %v353_v12  ;;  %v394_v37 = vadd.f32 %v389_v20, %v380_v43  ;;  %v1423_v12 = vsel %vm1363_vm7, %v1420_v1, %v1422_v11  ;;  %v1455_v43 = vmul.f32 %v1454_v7, %v2896_v48 }
 0x19a   : > { %1403 = vrot.lane.b32.xlu0 %v1400_v62, %s2688_s24  ;;  %1349 = vrot.lane.b32.xlu1 %v1346_v28, %s2693_s7  ;;  %v1496_v62 = vstv %s3359_s19  ;;  %v1443_v20 = vrot.slane %v1436_v58, 4  ;;  %v1457_v28 = vmul.f32 %v1454_v7, %v2949_v14  ;;  %v1442_v18 = vsel %vm1363_vm7, %v1440_v38, %v1441_v13  ;;  %s3517_s19 = sld [smem:[#allocation8 + $0x25]] }
 0x19b   : > { %v381_v15 = vadd.f32 %v3140_v46, %v367_v34  ;;  %v408_v39 = vadd.f32 %v3142_v47, %v394_v37  ;;  %v1475_v46 = vstv %s3355_s27  ;;  %v3388_v47 = vmul.f32 %v495_v35, %v2932_v4  ;;  %s3483_s27 = sld [smem:[#allocation8 + $0x24]] }
 0x19c   : > { %v391_v40 = vpop.permute.xlu1 %390  ;;  %v417_v56 = vpop.permute.xlu0 %416  ;;  %v1462_v34 = vrot.slane %v1456_v53, 4  ;;  %v1476_v37 = vmul.f32 %v1475_v46, %v3035_v59  ;;  %v3400_v11 = vmul.f32 %v1475_v46, %v2932_v4  ;;  %v520_v7 = vrot.slane %v514_v26, 1 }
 0x19d   : > { %v395_v51 = vadd.f32 %v391_v40, %v381_v15  ;;  %v422_v27 = vadd.f32 %v417_v56, %v408_v39  ;;  %v503_v39 = vrot.slane %v496_v19, 1  ;;  %v498_v58 = vmul.f32 %v495_v35, %v3067_v21 }
 0x19e   : > { %1405 = vrot.lane.b32.xlu1 %v1402_v36, %s2688_s24  ;;  %1424 = vrot.lane.b32.xlu0 %v1421_v54, %s2688_s24  ;;  %v1461_v54 = vrot.slane %v1455_v43, 4  ;;  %v1444_v38 = vsel %vm1363_vm7, %v1441_v13, %v1443_v20  ;;  %v1464_v19 = vrot.slane %v1457_v28, 4  ;;  %v1478_v26 = vmul.f32 %v1475_v46, %v3067_v21 }
 0x19f   : > { %v409_v2 = vadd.f32 %v3151_v60, %v395_v51  ;;  %v436_v1 = vadd.f32 %v3153_v61, %v422_v27  ;;  %v3404_v60 = vmul.f32 %v3372_v31, %v2910_v57  ;;  %v504_v61 = vrot.slane %v3388_v47, 1 }
 0x1a0   : > { %v419_v63 = vpop.permute.xlu1 %418  ;;  %v445_v55 = vpop.permute.xlu0 %444  ;;  %v1463_v27 = vsel %vm1363_vm7, %v1461_v54, %v1462_v34  ;;  %v1483_v47 = vrot.slane %v3400_v11, 4  ;;  %v506_v13 = vrot.slane %v498_v58, 1  ;;  %v516_v20 = vmul.f32 %v3372_v31, %v2949_v14 }
 0x1a1   : > { %v423_v36 = vadd.f32 %v419_v63, %v409_v2  ;;  %v450_v15 = vadd.f32 %v445_v55, %v436_v1  ;;  %v1498_v2 = vmul.f32 %v1496_v62, %v2910_v57  ;;  %v1517_v1 = vstv %s3383_s28  ;;  %s3543_s28 = sld [smem:[#allocation8 + $0x56]] }
 0x1a2   : > { %1426 = vrot.lane.b32.xlu1 %v1423_v12, %s2688_s24  ;;  %1445 = vrot.lane.b32.xlu0 %v1442_v18, %s2689_s8  ;;  %v1482_v12 = vrot.slane %v1476_v37, 4  ;;  %v1465_v63 = vsel %vm1363_vm7, %v1462_v34, %v1464_v19  ;;  %v1497_v55 = vmul.f32 %v1496_v62, %v2896_v48  ;;  %v1485_v11 = vrot.slane %v1478_v26, 4 }
 0x1a3   : > { %v437_v40 = vadd.f32 %v3162_v9, %v423_v36  ;;  %v464_v56 = vadd.f32 %v3164_v10, %v450_v15  ;;  %v505_v9 = vsel %vm502_vm4, %v503_v39, %v504_v61  ;;  %v521_v10 = vrot.slane %v3404_v60, 1 }
 0x1a4   : > { %v447_v53 = vpop.permute.xlu1 %446  ;;  %v473_v51 = vpop.permute.xlu0 %472  ;;  %v1499_v36 = vmul.f32 %v1496_v62, %v2949_v14  ;;  %v1518_v31 = vmul.f32 %v1517_v1, %v3035_v59  ;;  %v1519_v15 = vmul.f32 %v1517_v1, %v2932_v4  ;;  %v1504_v60 = vrot.slane %v1498_v2, 4 }
 0x1a5   : > { %v451_v43 = vadd.f32 %v447_v53, %v437_v40  ;;  %v478_v35 = vadd.f32 %v473_v51, %v464_v56  ;;  %v522_v34 = vsel %vm502_vm4, %v520_v7, %v521_v10  ;;  %v507_v54 = vsel %vm502_vm4, %v504_v61, %v506_v13 }
 0x1a6   : > { %1447 = vrot.lane.b32.xlu1 %v1444_v38, %s2689_s8  ;;  %1466 = vrot.lane.b32.xlu0 %v1463_v27, %s2689_s8  ;;  %v523_v58 = vrot.slane %v516_v20, 1  ;;  %v1538_v40 = vstv %s3410_s17  ;;  %v1503_v38 = vrot.slane %v1497_v55, 4  ;;  %v1520_v19 = vmul.f32 %v1517_v1, %v3067_v21  ;;  %s3553_s17 = sld [smem:[#allocation8 + $0x26]] }
 0x1a7   : > { %v465_v46 = vadd.f32 %v3173_v22, %v451_v43  ;;  %v492_v28 = vadd.f32 %v3175_v23, %v478_v35  ;;  %v1484_v23 = vsel %vm1363_vm7, %v1482_v12, %v1483_v47  ;;  %v1506_v61 = vrot.slane %v1499_v36, 4 }
 0x1a8   : > { %v475_v18 = vpop.permute.xlu1 %474  ;;  %v543_v37 = vpop.permute.xlu0 %542  ;;  %v1524_v51 = vrot.slane %v1518_v31, 4  ;;  %v1525_v27 = vrot.slane %v1519_v15, 4  ;;  %v1540_v12 = vmul.f32 %v1538_v40, %v2910_v57  ;;  %v1486_v35 = vsel %vm1363_vm7, %v1483_v47, %v1485_v11 }
 0x1a9   : > { %v510_v39 = vadd.f32 %v505_v9, %v492_v28  ;;  %v479_v22 = vadd.f32 %v475_v18, %v465_v46  ;;  %v524_v2 = vsel %vm502_vm4, %v521_v10, %v523_v58  ;;  %v1539_v1 = vmul.f32 %v1538_v40, %v2896_v48 }
 0x1aa   : > { %1468 = vrot.lane.b32.xlu1 %v1465_v63, %s2689_s8  ;;  %1487 = vrot.lane.b32.xlu0 %v1484_v23, %s2690_s15  ;;  %v1559_v9 = vstv %s3426_s3  ;;  %v1527_v46 = vrot.slane %v1520_v19, 4  ;;  %v3463_v28 = vstv %s3432_s16  ;;  %v1507_v63 = vsel %vm1363_vm7, %v1504_v60, %v1506_v61  ;;  %s3560_s3 = sld [smem:[#allocation8 + $0x46]]  ;;  %s3562_s16 = sld [smem:[#allocation8 + $0x57]] }
 0x1ab   : > { %v527_v62 = vadd.f32 %v522_v34, %v510_v39  ;;  %v493_v56 = vadd.f32 %v3184_v32, %v479_v22  ;;  %v1505_v32 = vsel %vm1363_vm7, %v1503_v38, %v1504_v60  ;;  %v1526_v55 = vsel %vm1363_vm7, %v1524_v51, %v1525_v27 }
 0x1ac   : > { %v545_v7 = vpop.permute.xlu1 %544  ;;  %v585_v53 = vpop.permute.xlu0 %584  ;;  %v1546_v18 = vrot.slane %v1540_v12, 4  ;;  %v1561_v31 = vmul.f32 %v1559_v9, %v2932_v4  ;;  %v1545_v15 = vrot.slane %v1539_v1, 4  ;;  %v782_v39 = vstv %s3443_s30  ;;  %s3568_s30 = sld [smem:[#allocation8 + $0x15]] }
 0x1ad   : > { %v511_v26 = vadd.f32 %v507_v54, %v493_v56  ;;  %v548_v43 = vadd.f32 %v543_v37, %v527_v62  ;;  %v1541_v37 = vmul.f32 %v1538_v40, %v2949_v14  ;;  %v1580_v22 = vstv %s3445_s6  ;;  %s3586_s6 = sld [smem:[#allocation8 + $0x27]] }
 0x1ae   : > { %1489 = vrot.lane.b32.xlu1 %v1486_v35, %s2690_s15  ;;  %1508 = vrot.lane.b32.xlu0 %v1505_v32, %s2690_s15  ;;  %v1528_v34 = vsel %vm1363_vm7, %v1525_v27, %v1527_v46  ;;  %v1562_v54 = vmul.f32 %v1559_v9, %v3067_v21  ;;  %v1547_v62 = vsel %vm1363_vm7, %v1545_v15, %v1546_v18  ;;  %v1601_v19 = vstv %s3450_s18  ;;  %s3619_s18 = sld [smem:[#allocation8 + $0x58]] }
 0x1af   : > { %v528_v13 = vadd.f32 %v524_v2, %v511_v26  ;;  %v569_v20 = vadd.f32 %v3186_v33, %v548_v43  ;;  %v1560_v33 = vmul.f32 %v1559_v9, %v3035_v59  ;;  %v1548_v56 = vrot.slane %v1541_v37, 4 }
 0x1b0   : > { %v587_v47 = vpop.permute.xlu1 %586  ;;  %v627_v10 = vpop.permute.xlu0 %626  ;;  %v1582_v38 = vmul.f32 %v1580_v22, %v2910_v57  ;;  %v3489_v51 = vmul.f32 %v782_v39, %v2932_v4  ;;  %v1581_v27 = vmul.f32 %v1580_v22, %v2896_v48  ;;  %v1622_v12 = vstv %s3459_s20  ;;  %s3626_s20 = sld [smem:[#allocation8 + $0x28]] }
 0x1b1   : > { %v549_v11 = vadd.f32 %v545_v7, %v528_v13  ;;  %v590_v36 = vadd.f32 %v585_v53, %v569_v20  ;;  %v1566_v61 = vrot.slane %v1560_v33, 4  ;;  %v1569_v35 = vrot.slane %v1562_v54, 4 }
 0x1b2   : > { %1510 = vrot.lane.b32.xlu1 %v1507_v63, %s2690_s15  ;;  %1529 = vrot.lane.b32.xlu0 %v1526_v55, %s2691_s23  ;;  %v3496_v32 = vstv %s3465_s26  ;;  %v1549_v9 = vsel %vm1363_vm7, %v1546_v18, %v1548_v56  ;;  %v1588_v13 = vrot.slane %v1582_v38, 4  ;;  %v1583_v20 = vmul.f32 %v1580_v22, %v2949_v14  ;;  %s3651_s26 = sld [smem:[#allocation8 + $0x59]] }
 0x1b3   : > { %v570_v23 = vadd.f32 %v3195_v45, %v549_v11  ;;  %v611_v60 = vadd.f32 %v3197_v49, %v590_v36  ;;  %v1567_v45 = vrot.slane %v1561_v31, 4  ;;  %v783_v49 = vmul.f32 %v782_v39, %v3035_v59 }
 0x1b4   : > { %v629_v58 = vpop.permute.xlu1 %628  ;;  %v669_v40 = vpop.permute.xlu0 %668  ;;  %v1602_v46 = vmul.f32 %v1601_v19, %v3035_v59  ;;  %v791_v55 = vrot.slane %v3489_v51, 2  ;;  %v801_v18 = vmul.f32 %v3463_v28, %v2896_v48  ;;  %v1587_v37 = vrot.slane %v1581_v27, 4 }
 0x1b5   : > { %v591_v7 = vadd.f32 %v587_v47, %v570_v23  ;;  %v632_v53 = vadd.f32 %v627_v10, %v611_v60  ;;  %v1568_v63 = vsel %vm1363_vm7, %v1566_v61, %v1567_v45  ;;  %v1570_v33 = vsel %vm1363_vm7, %v1567_v45, %v1569_v35 }
 0x1b6   : > { %1531 = vrot.lane.b32.xlu1 %v1528_v34, %s2691_s23  ;;  %1550 = vrot.lane.b32.xlu0 %v1547_v62, %s2691_s23  ;;  %v1604_v31 = vmul.f32 %v1601_v19, %v3067_v21  ;;  %v1589_v23 = vsel %vm1363_vm7, %v1587_v37, %v1588_v13  ;;  %v1590_v60 = vrot.slane %v1583_v20, 4  ;;  %v1608_v34 = vrot.slane %v1602_v46, 4 }
 0x1b7   : > { %v612_v26 = vadd.f32 %v3206_v3, %v591_v7  ;;  %v653_v43 = vadd.f32 %v3208_v5, %v632_v53  ;;  %v1603_v3 = vmul.f32 %v1601_v19, %v2932_v4  ;;  %v790_v5 = vrot.slane %v783_v49, 2 }
 0x1b8   : > { %v671_v2 = vpop.permute.xlu1 %670  ;;  %v711_v1 = vpop.permute.xlu0 %710  ;;  %v3514_v54 = vmul.f32 %v1622_v12, %v2910_v57  ;;  %v1677_v56 = vstv %s3483_s27  ;;  %v785_v38 = vmul.f32 %v782_v39, %v3067_v21  ;;  %v1623_v19 = vmul.f32 %v1622_v12, %v2896_v48  ;;  %s3660_s27 = sld [smem:[#allocation8 + $0x29]] }
 0x1b9   : > { %v633_v47 = vadd.f32 %v629_v58, %v612_v26  ;;  %v674_v10 = vadd.f32 %v669_v40, %v653_v43  ;;  %v1609_v62 = vrot.slane %v1603_v3, 4  ;;  %v792_v61 = vsel %vm789_vm5, %v790_v5, %v791_v55 }
 0x1ba   : > { %1552 = vrot.lane.b32.xlu1 %v1549_v9, %s2691_s23  ;;  %1571 = vrot.lane.b32.xlu0 %v1568_v63, %s2692_s5  ;;  %v1611_v45 = vrot.slane %v1604_v31, 4  ;;  %v1591_v26 = vsel %vm1363_vm7, %v1588_v13, %v1590_v60  ;;  %v1630_v43 = vrot.slane %v3514_v54, 4  ;;  %v1625_v35 = vmul.f32 %v1622_v12, %v2949_v14 }
 0x1bb   : > { %v654_v11 = vadd.f32 %v3217_v16, %v633_v47  ;;  %v695_v36 = vadd.f32 %v3219_v17, %v674_v10  ;;  %v3521_v16 = vmul.f32 %v3463_v28, %v2910_v57  ;;  %v807_v17 = vrot.slane %v801_v18, 2 }
 0x1bc   : > { %v713_v15 = vpop.permute.xlu1 %712  ;;  %v753_v22 = vpop.permute.xlu0 %752  ;;  %v1678_v39 = vmul.f32 %v1677_v56, %v3035_v59  ;;  %v793_v20 = vrot.slane %v785_v38, 2  ;;  %v803_v46 = vmul.f32 %v3463_v28, %v2949_v14  ;;  %v1629_v12 = vrot.slane %v1623_v19, 4 }
 0x1bd   : > { %v675_v58 = vadd.f32 %v671_v2, %v654_v11  ;;  %v716_v40 = vadd.f32 %v711_v1, %v695_v36  ;;  %v808_v9 = vrot.slane %v3521_v16, 2  ;;  %v1612_v10 = vsel %vm1363_vm7, %v1609_v62, %v1611_v45 }
 0x1be   : > { %1573 = vrot.lane.b32.xlu1 %v1570_v33, %s2692_s5  ;;  %1592 = vrot.lane.b32.xlu0 %v1589_v23, %s2692_s5  ;;  %v1680_v63 = vmul.f32 %v1677_v56, %v3067_v21  ;;  %v1631_v28 = vsel %vm1363_vm7, %v1629_v12, %v1630_v43  ;;  %v1632_v18 = vrot.slane %v1625_v35, 4  ;;  %v1684_v37 = vrot.slane %v1678_v39, 5 }
 0x1bf   : > { %v696_v7 = vadd.f32 %v3228_v29, %v675_v58  ;;  %v737_v53 = vadd.f32 %v3230_v30, %v716_v40  ;;  %v1610_v29 = vsel %vm1363_vm7, %v1608_v34, %v1609_v62  ;;  %v1679_v30 = vmul.f32 %v1677_v56, %v2932_v4 }
 0x1c0   : > { %v755_v49 = vpop.permute.xlu1 %754  ;;  %v830_v27 = vpop.permute.xlu0 %829  ;;  %v1700_v11 = vmul.f32 %v3496_v32, %v2910_v57  ;;  %v794_v60 = vsel %vm789_vm5, %v791_v55, %v793_v20  ;;  %v1687_v54 = vrot.slane %v1680_v63, 5  ;;  %v1633_v62 = vsel %vm1363_vm7, %v1630_v43, %v1632_v18 }
 0x1c1   : > { %v717_v2 = vadd.f32 %v713_v15, %v696_v7  ;;  %v758_v1 = vadd.f32 %v753_v22, %v737_v53  ;;  %v1685_v31 = vrot.slane %v1679_v30, 5  ;;  %v1719_v15 = vstv %s3517_s19  ;;  %s3682_s19 = sld [smem:[#allocation8 + $0x5a]] }
 0x1c2   : > { %1594 = vrot.lane.b32.xlu1 %v1591_v26, %s2692_s5  ;;  %1613 = vrot.lane.b32.xlu0 %v1610_v29, %s2693_s7  ;;  %v1699_v22 = vmul.f32 %v3496_v32, %v2896_v48  ;;  %v1706_v56 = vrot.slane %v1700_v11, 5  ;;  %v1701_v16 = vmul.f32 %v3496_v32, %v2949_v14  ;;  %v1740_v53 = vstv %s3543_s28  ;;  %s3694_s28 = sld [smem:[#allocation8 + $0x2b]] }
 0x1c3   : > { %v738_v13 = vadd.f32 %v3239_v44, %v717_v2  ;;  %v779_v47 = vadd.f32 %v3241_v50, %v758_v1  ;;  %v809_v44 = vsel %vm789_vm5, %v807_v17, %v808_v9  ;;  %v810_v50 = vrot.slane %v803_v46, 2 }
 0x1c4   : > { %v832_v3 = vpop.permute.xlu1 %831  ;;  %v872_v5 = vpop.permute.xlu0 %871  ;;  %v1720_v17 = vmul.f32 %v1719_v15, %v3035_v59  ;;  %v1686_v55 = vsel %vm280_vm3, %v1684_v37, %v1685_v31  ;;  %v1705_v7 = vrot.slane %v1699_v22, 5  ;;  %v1688_v45 = vsel %vm280_vm3, %v1685_v31, %v1687_v54 }
 0x1c5   : > { %v797_v36 = vadd.f32 %v792_v61, %v779_v47  ;;  %v759_v33 = vadd.f32 %v755_v49, %v738_v13  ;;  %v811_v19 = vsel %vm789_vm5, %v808_v9, %v810_v50  ;;  %v1722_v49 = vmul.f32 %v1719_v15, %v3067_v21 }
 0x1c6   : > { %1615 = vrot.lane.b32.xlu1 %v1612_v10, %s2693_s7  ;;  %1634 = vrot.lane.b32.xlu0 %v1631_v28, %s2693_s7  ;;  %v1707_v43 = vsel %vm280_vm3, %v1705_v7, %v1706_v56  ;;  %v1708_v35 = vrot.slane %v1701_v16, 5  ;;  %v1726_v39 = vrot.slane %v1720_v17, 5  ;;  %v1742_v2 = vmul.f32 %v1740_v53, %v2910_v57  ;;  %v3973_v7 = vld [vmem:[#allocation13_spill] sm:$0xff] }
 0x1c7   : > { %v814_v23 = vadd.f32 %v809_v44, %v797_v36  ;;  %v780_v34 = vadd.f32 %v3252_v0, %v759_v33  ;;  %v1721_v0 = vmul.f32 %v1719_v15, %v2932_v4  ;;  %v1761_v9 = vstv %s3553_s17  ;;  %s3705_s17 = sld [smem:[#allocation8 + $0x5c]] }
 0x1c8   : > { %v874_v58 = vpop.permute.xlu1 %873  ;;  %v914_v40 = vpop.permute.xlu0 %913  ;;  %v3592_v20 = vstv %s3560_s3  ;;  %v1782_v46 = vstv %s3562_s16  ;;  %v1729_v47 = vrot.slane %v1722_v49, 5  ;;  %v1069_v10 = vstv %s3568_s30  ;;  %s3708_s3 = sld [smem:[#allocation8 + $0x2c]]  ;;  %s3725_s16 = sld [smem:[#allocation8 + $0x5d]] }
 0x1c9   : > { %v798_v38 = vadd.f32 %v794_v60, %v780_v34  ;;  %v835_v51 = vadd.f32 %v830_v27, %v814_v23  ;;  %v1727_v30 = vrot.slane %v1721_v0, 5  ;;  %v1748_v28 = vrot.slane %v1742_v2, 5  ;;  %s3733_s30 = sld [smem:[#allocation8 + $0x2d]] }
 0x1ca   : > { %1636 = vrot.lane.b32.xlu1 %v1633_v62, %s2693_s7  ;;  %1689 = vrot.lane.b32.xlu0 %v1686_v55, %s2688_s24  ;;  %v1743_v18 = vmul.f32 %v1740_v53, %v2949_v14  ;;  %v1762_v37 = vmul.f32 %v1761_v9, %v3035_v59  ;;  %v1763_v31 = vmul.f32 %v1761_v9, %v2932_v4  ;;  %v1803_v17 = vstv %s3586_s6  ;;  %s2442_s6 = sld [smem:[#allocation8 + $0x5e]] }
 0x1cb   : > { %v815_v61 = vadd.f32 %v811_v19, %v798_v38  ;;  %v856_v32 = vadd.f32 %v3254_v6, %v835_v51  ;;  %v1741_v6 = vmul.f32 %v1740_v53, %v2896_v48  ;;  %v1728_v33 = vsel %vm280_vm3, %v1726_v39, %v1727_v30 }
 0x1cc   : > { %v916_v27 = vpop.permute.xlu1 %915  ;;  %v956_v26 = vpop.permute.xlu0 %955  ;;  %v3609_v15 = vmul.f32 %v1069_v10, %v2932_v4  ;;  %v1764_v44 = vmul.f32 %v1761_v9, %v3067_v21  ;;  %v1730_v23 = vsel %vm280_vm3, %v1727_v30, %v1729_v47  ;;  %v3617_v60 = vmul.f32 %v3592_v20, %v2896_v48 }
 0x1cd   : > { %v836_v1 = vadd.f32 %v832_v3, %v815_v61  ;;  %v877_v29 = vadd.f32 %v872_v5, %v856_v32  ;;  %v1709_v5 = vsel %vm280_vm3, %v1706_v56, %v1708_v35  ;;  %v1768_v62 = vrot.slane %v1762_v37, 5 }
 0x1ce   : > { %1691 = vrot.lane.b32.xlu1 %v1688_v45, %s2688_s24  ;;  %1710 = vrot.lane.b32.xlu0 %v1707_v43, %s2688_s24  ;;  %v3623_v56 = vmul.f32 %v1782_v46, %v2910_v57  ;;  %v3633_v51 = vmul.f32 %v3592_v20, %v2910_v57  ;;  %v1771_v55 = vrot.slane %v1764_v44, 5  ;;  %v1783_v0 = vmul.f32 %v1782_v46, %v2896_v48 }
 0x1cf   : > { %v857_v12 = vadd.f32 %v3267_v24, %v836_v1  ;;  %v898_v13 = vadd.f32 %v3269_v25, %v877_v29  ;;  %v1747_v24 = vrot.slane %v1741_v6, 5  ;;  %v3606_v25 = vmul.f32 %v1069_v10, %v3035_v59 }
 0x1d0   : > { %v958_v63 = vpop.permute.xlu1 %957  ;;  %v998_v3 = vpop.permute.xlu0 %997  ;;  %v1078_v61 = vrot.slane %v3609_v15, 3  ;;  %v1094_v32 = vrot.slane %v3617_v60, 3  ;;  %v1785_v43 = vmul.f32 %v1782_v46, %v2949_v14  ;;  %v1804_v35 = vmul.f32 %v1803_v17, %v3035_v59  ;;  %v3974_v46 = vld [vmem:[#allocation14_spill] sm:$0xff] }
 0x1d1   : > { %v878_v11 = vadd.f32 %v874_v58, %v857_v12  ;;  %v919_v36 = vadd.f32 %v914_v40, %v898_v13  ;;  %v1749_v58 = vsel %vm280_vm3, %v1747_v24, %v1748_v28  ;;  %v1750_v40 = vrot.slane %v1743_v18, 5  ;;  %v3975_v13 = vld [vmem:[#allocation15_spill] sm:$0xff] }
 0x1d2   : > { %1712 = vrot.lane.b32.xlu1 %v1709_v5, %s2688_s24  ;;  %1731 = vrot.lane.b32.xlu0 %v1728_v33, %s2689_s8  ;;  %v1077_v38 = vrot.slane %v3606_v25, 3  ;;  %v1805_v1 = vmul.f32 %v1803_v17, %v2932_v4  ;;  %v1095_v29 = vrot.slane %v3633_v51, 3  ;;  %v1072_v30 = vmul.f32 %v1069_v10, %v3067_v21 }
 0x1d3   : > { %v899_v50 = vadd.f32 %v3285_v41, %v878_v11  ;;  %v940_v22 = vadd.f32 %v3287_v42, %v919_v36  ;;  %v1769_v42 = vrot.slane %v1763_v31, 5  ;;  %v1789_v6 = vrot.slane %v1783_v0, 5 }
 0x1d4   : > { %v1000_v34 = vpop.permute.xlu1 %999  ;;  %v1040_v54 = vpop.permute.xlu0 %1039  ;;  %v1792_v37 = vrot.slane %v1785_v43, 5  ;;  %v1810_v11 = vrot.slane %v1804_v35, 5  ;;  %v1811_v31 = vrot.slane %v1805_v1, 5  ;;  %v1845_v24 = vstv %s3626_s20  ;;  %s2444_s20 = sld [smem:[#allocation8 + $0x5f]] }
 0x1d5   : > { %v920_v41 = vadd.f32 %v916_v27, %v899_v50  ;;  %v961_v16 = vadd.f32 %v956_v26, %v940_v22  ;;  %v1751_v27 = vsel %vm280_vm3, %v1748_v28, %v1750_v40  ;;  %v1790_v26 = vrot.slane %v3623_v56, 5 }
 0x1d6   : > { %1733 = vrot.lane.b32.xlu1 %v1730_v23, %s2689_s8  ;;  %1752 = vrot.lane.b32.xlu0 %v1749_v58, %s2689_s8  ;;  %v1772_v9 = vsel %vm280_vm3, %v1769_v42, %v1771_v55  ;;  %v1079_v25 = vsel %vm1076_vm6, %v1077_v38, %v1078_v61  ;;  %v1080_v15 = vrot.slane %v1072_v30, 3  ;;  %v1090_v44 = vmul.f32 %v3592_v20, %v2949_v14 }
 0x1d7   : > { %v941_v19 = vadd.f32 %v3299_v8, %v920_v41  ;;  %v982_v53 = vadd.f32 %v3973_v7, %v961_v16  ;;  %v1770_v8 = vsel %vm280_vm3, %v1768_v62, %v1769_v42  ;;  %v1791_v18 = vsel %vm280_vm3, %v1789_v6, %v1790_v26 }
 0x1d8   : > { %v1042_v45 = vpop.permute.xlu1 %1041  ;;  %v1061_v49 = vpop.permute.xlu0 %1060  ;;  %v1793_v20 = vsel %vm280_vm3, %v1790_v26, %v1792_v37  ;;  %v1846_v56 = vmul.f32 %v1845_v24, %v3035_v59  ;;  %v1847_v42 = vmul.f32 %v1845_v24, %v2932_v4  ;;  %v1097_v38 = vrot.slane %v1090_v44, 3 }
 0x1d9   : > { %v962_v39 = vadd.f32 %v958_v63, %v941_v19  ;;  %v1003_v2 = vadd.f32 %v998_v3, %v982_v53  ;;  %v1806_v63 = vmul.f32 %v1803_v17, %v3067_v21  ;;  %v1824_v3 = vstv %s3619_s18  ;;  %s2443_s18 = sld [smem:[#allocation8 + $0x2e]] }
 0x1da   : > { %1754 = vrot.lane.b32.xlu1 %v1751_v27, %s2689_s8  ;;  %1773 = vrot.lane.b32.xlu0 %v1770_v8, %s2690_s15  ;;  %v1826_v10 = vmul.f32 %v1824_v3, %v2910_v57  ;;  %v1825_v50 = vmul.f32 %v1824_v3, %v2896_v48  ;;  %v1081_v17 = vsel %vm1076_vm6, %v1078_v61, %v1080_v15  ;;  %v1866_v0 = vstv %s3651_s26  ;;  %s2446_s26 = sld [smem:[#allocation8 + $0x60]] }
 0x1db   : > { %v983_v12 = vadd.f32 %v3974_v46, %v962_v39  ;;  %v1024_v47 = vadd.f32 %v3975_v13, %v1003_v2  ;;  %v1813_v60 = vrot.slane %v1806_v63, 5  ;;  %v1852_v61 = vrot.slane %v1846_v56, 5 }
 0x1dc   : > { %v1063_v5 = vpop.permute.xlu1 %1062  ;;  %v1117_v28 = vpop.permute.xlu0 %1116  ;;  %v1832_v62 = vrot.slane %v1826_v10, 5  ;;  %v1831_v55 = vrot.slane %v1825_v50, 5  ;;  %v1848_v26 = vmul.f32 %v1845_v24, %v3067_v21  ;;  %v1868_v43 = vmul.f32 %v1866_v0, %v2910_v57 }
 0x1dd   : > { %v1004_v36 = vadd.f32 %v1000_v34, %v983_v12  ;;  %v1045_v33 = vadd.f32 %v1040_v54, %v1024_v47  ;;  %v1827_v34 = vmul.f32 %v1824_v3, %v2949_v14  ;;  %v1096_v54 = vsel %vm1076_vm6, %v1094_v32, %v1095_v29 }
 0x1de   : > { %1775 = vrot.lane.b32.xlu1 %v1772_v9, %s2690_s15  ;;  %1794 = vrot.lane.b32.xlu0 %v1791_v18, %s2690_s15  ;;  %v1814_v53 = vsel %vm280_vm3, %v1811_v31, %v1813_v60  ;;  %v1833_v27 = vsel %vm280_vm3, %v1831_v55, %v1832_v62  ;;  %v1853_v2 = vrot.slane %v1847_v42, 5  ;;  %v1887_v8 = vstv %s3660_s27  ;;  %s2407_s27 = sld [smem:[#allocation8 + $0x1c]] }
 0x1df   : > { %v1025_v22 = vadd.f32 %v3332_v52, %v1004_v36  ;;  %v1066_v23 = vadd.f32 %v1061_v49, %v1045_v33  ;;  %v1812_v52 = vsel %vm280_vm3, %v1810_v11, %v1811_v31  ;;  %v1834_v32 = vrot.slane %v1827_v34, 5 }
 0x1e0   : > { %v1119_v58 = vpop.permute.xlu1 %1118  ;;  %v1138_v40 = vpop.permute.xlu0 %1137  ;;  %v1098_v1 = vsel %vm1076_vm6, %v1095_v29, %v1097_v38  ;;  %v1867_v30 = vmul.f32 %v1866_v0, %v2896_v48  ;;  %v1855_v47 = vrot.slane %v1848_v26, 5  ;;  %v1869_v51 = vmul.f32 %v1866_v0, %v2949_v14 }
 0x1e1   : > { %v1046_v41 = vadd.f32 %v1042_v45, %v1025_v22  ;;  %v1084_v16 = vadd.f32 %v1079_v25, %v1066_v23  ;;  %v1835_v46 = vsel %vm280_vm3, %v1832_v62, %v1834_v32  ;;  %v1888_v29 = vmul.f32 %v1887_v8, %v3035_v59 }
 0x1e2   : > { %1796 = vrot.lane.b32.xlu1 %v1793_v20, %s2690_s15  ;;  %1815 = vrot.lane.b32.xlu0 %v1812_v52, %s2691_s23  ;;  %v1889_v63 = vmul.f32 %v1887_v8, %v2932_v4  ;;  %v1874_v18 = vrot.slane %v1868_v43, 5  ;;  %v1873_v37 = vrot.slane %v1867_v30, 5  ;;  %v1890_v36 = vmul.f32 %v1887_v8, %v3067_v21 }
 0x1e3   : > { %v1101_v19 = vadd.f32 %v1096_v54, %v1084_v16  ;;  %v1067_v7 = vadd.f32 %v1063_v5, %v1046_v41  ;;  %v1908_v33 = vstv %s3682_s19  ;;  %v1876_v25 = vrot.slane %v1869_v51, 5  ;;  %s2448_s19 = sld [smem:[#allocation8 + $0x61]] }
 0x1e4   : > { %v1140_v45 = vpop.permute.xlu1 %1139  ;;  %v1159_v49 = vpop.permute.xlu0 %1158  ;;  %v1894_v15 = vrot.slane %v1888_v29, 5  ;;  %v1895_v44 = vrot.slane %v1889_v63, 5  ;;  %v1910_v50 = vmul.f32 %v1908_v33, %v2910_v57  ;;  %v1856_v60 = vsel %vm280_vm3, %v1853_v2, %v1855_v47 }
 0x1e5   : > { %v1085_v35 = vadd.f32 %v1081_v17, %v1067_v7  ;;  %v1122_v39 = vadd.f32 %v1117_v28, %v1101_v19  ;;  %v1854_v28 = vsel %vm280_vm3, %v1852_v61, %v1853_v2  ;;  %v1875_v34 = vsel %vm280_vm3, %v1873_v37, %v1874_v18 }
 0x1e6   : > { %1817 = vrot.lane.b32.xlu1 %v1814_v53, %s2691_s23  ;;  %1836 = vrot.lane.b32.xlu0 %v1833_v27, %s2691_s23  ;;  %v1909_v54 = vmul.f32 %v1908_v33, %v2896_v48  ;;  %v1897_v20 = vrot.slane %v1890_v36, 5  ;;  %v1911_v62 = vmul.f32 %v1908_v33, %v2949_v14  ;;  %v1877_v16 = vsel %vm280_vm3, %v1874_v18, %v1876_v25 }
 0x1e7   : > { %v1102_v9 = vadd.f32 %v1098_v1, %v1085_v35  ;;  %v1143_v6 = vadd.f32 %v1138_v40, %v1122_v39  ;;  %v1896_v52 = vsel %vm280_vm3, %v1894_v15, %v1895_v44  ;;  %v1916_v42 = vrot.slane %v1910_v50, 5 }
 0x1e8   : > { %v1161_v12 = vpop.permute.xlu1 %1160  ;;  %v1180_v13 = vpop.permute.xlu0 %1179  ;;  %v1915_v19 = vrot.slane %v1909_v54, 5  ;;  %v1898_v7 = vsel %vm280_vm3, %v1895_v44, %v1897_v20  ;;  %v1918_v53 = vrot.slane %v1911_v62, 5  ;;  %v1985_v32 = vstv %s3705_s17  ;;  %s2350_s17 = sshll.u32 %s2857_s4, 4 }
 0x1e9   : > { %v1123_v3 = vadd.f32 %v1119_v58, %v1102_v9  ;;  %v1164_v5 = vadd.f32 %v1159_v49, %v1143_v6  ;;  %v1964_v58 = vstv %s3694_s28  ;;  %v1987_v26 = vmul.f32 %v1985_v32, %v2910_v57  ;;  %s2436_s28 = sld [smem:[#allocation8 + $0x5b]] }
 0x1ea   : > { %1838 = vrot.lane.b32.xlu1 %v1835_v46, %s2691_s23  ;;  %1857 = vrot.lane.b32.xlu0 %v1854_v28, %s2692_s5  ;;  %v1965_v55 = vmul.f32 %v1964_v58, %v3035_v59  ;;  %v1966_v0 = vmul.f32 %v1964_v58, %v2932_v4  ;;  %v1917_v27 = vsel %vm280_vm3, %v1915_v19, %v1916_v42  ;;  %v2006_v43 = vstv %s3708_s3  ;;  %s2457_s3 = sshll.u32 %s2673_s12, 8 }
 0x1eb   : > { %v1144_v11 = vadd.f32 %v1140_v45, %v1123_v3  ;;  %v1185_v10 = vadd.f32 %v1180_v13, %v1164_v5  ;;  %v1967_v61 = vmul.f32 %v1964_v58, %v3067_v21  ;;  %v1919_v1 = vsel %vm280_vm3, %v1916_v42, %v1918_v53 }
 0x1ec   : > { %v1182_v31 = vpop.permute.xlu1 %1181  ;;  %v1201_v24 = vpop.permute.xlu0 %1200  ;;  %v1971_v2 = vrot.slane %v1965_v55, 6  ;;  %v1972_v8 = vrot.slane %v1966_v0, 6  ;;  %v1986_v30 = vmul.f32 %v1985_v32, %v2896_v48  ;;  %v2007_v13 = vmul.f32 %v2006_v43, %v3035_v59 }
 0x1ed   : > { %v1165_v22 = vadd.f32 %v1161_v12, %v1144_v11  ;;  %v1206_v23 = vadd.f32 %v1201_v24, %v1185_v10  ;;  %v1974_v46 = vrot.slane %v1967_v61, 6  ;;  %v1988_v12 = vmul.f32 %v1985_v32, %v2949_v14 }
 0x1ee   : > { %1859 = vrot.lane.b32.xlu1 %v1856_v60, %s2692_s5  ;;  %1878 = vrot.lane.b32.xlu0 %v1875_v34, %s2692_s5  ;;  %v2008_v47 = vmul.f32 %v2006_v43, %v2932_v4  ;;  %v1973_v63 = vsel %vm1936_vm8, %v1971_v2, %v1972_v8  ;;  %v1993_v3 = vrot.slane %v1987_v26, 6  ;;  %v1992_v5 = vrot.slane %v1986_v30, 6 }
 0x1ef   : > { %v1186_v40 = vadd.f32 %v1182_v31, %v1165_v22  ;;  %v2009_v28 = vmul.f32 %v2006_v43, %v3067_v21  ;;  %v2027_v18 = vstv %s3725_s16  ;;  %v1995_v10 = vrot.slane %v1988_v12, 6  ;;  %s192_s16 = scalar_lea.vmem [#allocation9], %s2350_s17 }
 0x1f0   : > { %v1203_v56 = vpop.permute.xlu1 %1202  ;;  %v1222_v41 = vpop.permute.xlu0 %1221  ;;  %v2013_v36 = vrot.slane %v2007_v13, 6  ;;  %v2014_v33 = vrot.slane %v2008_v47, 6  ;;  %v2029_v31 = vmul.f32 %v2027_v18, %v2910_v57  ;;  %v1975_v15 = vsel %vm1936_vm8, %v1972_v8, %v1974_v46 }
 0x1f1   : > { %v1207_v17 = vadd.f32 %v1203_v56, %v1186_v40  ;;  %v1227_v38 = vadd.f32 %v1222_v41, %v1206_v23  ;;  %v1994_v44 = vsel %vm1936_vm8, %v1992_v5, %v1993_v3  ;;  %v2028_v50 = vmul.f32 %v2027_v18, %v2896_v48 }
 0x1f2   : > { %1880 = vrot.lane.b32.xlu1 %v1877_v16, %s2692_s5  ;;  %1899 = vrot.lane.b32.xlu0 %v1896_v52, %s2693_s7  ;;  %v2048_v22 = vstv %s3733_s30  ;;  %v2016_v23 = vrot.slane %v2009_v28, 6  ;;  %v1996_v54 = vsel %vm1936_vm8, %v1993_v3, %v1995_v10  ;;  %v2015_v58 = vsel %vm1936_vm8, %v2013_v36, %v2014_v33  ;;  %s2243_s30 = sshll.u32 %s192_s16, 4  ;;  %s3902_s30 = int_to_ptr.vmem [resolvable:$true] %s2243_s30 }
 0x1f3   : > { %v2035_v40 = vrot.slane %v2029_v31, 6  ;;  %v2030_v20 = vmul.f32 %v2027_v18, %v2949_v14  ;;  %v2049_v41 = vmul.f32 %v2048_v22, %v3035_v59  ;;  %v2050_v16 = vmul.f32 %v2048_v22, %v2932_v4  ;;  %s2595_s12 = scalar_lea.vmem %s3902_s30, 256 }
 0x1f4   : > { %v1224_v45 = vpop.permute.xlu1 %1223  ;;  %v1243_v49 = vpop.permute.xlu0 %1242  ;;  %v2034_v52 = vrot.slane %v2028_v50, 6  ;;  %v2017_v42 = vsel %vm1936_vm8, %v2014_v33, %v2016_v23  ;;  %v2051_v19 = vmul.f32 %v2048_v22, %v3067_v21  ;;  %p2596_p12 = scmp.ne.s32.totalorder %s3902_s30, %s2595_s12 }
 0x1f5   : > { %v1228_v35 = vadd.f32 %v1224_v45, %v1207_v17  ;;  %v1248_v39 = vadd.f32 %v1243_v49, %v1227_v38  ;;  %v2037_v0 = vrot.slane %v2030_v20, 6  ;;  %v2055_v32 = vrot.slane %v2049_v41, 6 }
 0x1f6   : > { %1901 = vrot.lane.b32.xlu1 %v1898_v7, %s2693_s7  ;;  %1920 = vrot.lane.b32.xlu0 %v1917_v27, %s2693_s7  ;;  %v2036_v55 = vsel %vm1936_vm8, %v2034_v52, %v2035_v40  ;;  %v2069_v7 = vstv %s2442_s6  ;;  %v2056_v45 = vrot.slane %v2050_v16, 6  ;;  %v2090_v27 = vstv %s2443_s18  ;;  %p2597_p13 = pnand %p2596_p12, %p3976_p2 }
 0x1f7   : > { %v2071_v49 = vmul.f32 %v2069_v7, %v2910_v57  ;;  %v2070_v61 = vmul.f32 %v2069_v7, %v2896_v48  ;;  %v2072_v2 = vmul.f32 %v2069_v7, %v2949_v14  ;;  %v2091_v30 = vmul.f32 %v2090_v27, %v3035_v59 }
 0x1f8   : > { %v1245_v9 = vpop.permute.xlu1 %1244  ;;  %v1264_v6 = vpop.permute.xlu0 %1263  ;;  %v2057_v8 = vsel %vm1936_vm8, %v2055_v32, %v2056_v45  ;;  %p2598_p6 = pneg %p2597_p13 }
 0x1f9   : > { %v1249_v51 = vadd.f32 %v1245_v9, %v1228_v35  ;;  %v1269_v29 = vadd.f32 %v1264_v6, %v1248_v39  ;;  %v2038_v35 = vsel %vm1936_vm8, %v2035_v40, %v2037_v0  ;;  %v2058_v39 = vrot.slane %v2051_v19, 6 }
 0x1fa   : > { %1922 = vrot.lane.b32.xlu1 %v1919_v1, %s2693_s7  ;;  %1976 = vrot.lane.b32.xlu0 %v1973_v63, %s2688_s24  ;;  %v2077_v1 = vrot.slane %v2071_v49, 6  ;;  %v2092_v9 = vmul.f32 %v2090_v27, %v2932_v4  ;;  %v2076_v6 = vrot.slane %v2070_v61, 6  ;;  %v2079_v47 = vrot.slane %v2072_v2, 6 }
 0x1fb   : > { %v2059_v13 = vsel %vm1936_vm8, %v2056_v45, %v2058_v39  ;;  %v2097_v3 = vrot.slane %v2091_v30, 6 }
 0x1fc   : > { %v1266_v37 = vpop.permute.xlu1 %1265  ;;  %v1285_v11 = vpop.permute.xlu0 %1284  ;;  %v2078_v63 = vsel %vm1936_vm8, %v2076_v6, %v2077_v1  ;;  %v2098_v5 = vrot.slane %v2092_v9, 6  ;;  %v2080_v36 = vsel %vm1936_vm8, %v2077_v1, %v2079_v47  ;;  %v2195_v6 = vstv %s2448_s19 }
 0x1fd   : > { %v1270_v24 = vadd.f32 %v1266_v37, %v1249_v51  ;;  %v1290_v25 = vadd.f32 %v1285_v11, %v1269_v29  ;;  %v2093_v51 = vmul.f32 %v2090_v27, %v3067_v21  ;;  %v2111_v29 = vstv %s2444_s20  ;;  %s3900_s20 = scalar_lea.hbm %s3954_s2, %s2457_s3 }
 0x1fe   : > { %1978 = vrot.lane.b32.xlu1 %v1975_v15, %s2688_s24  ;;  %1997 = vrot.lane.b32.xlu0 %v1994_v44, %s2688_s24  ;;  %v2113_v28 = vmul.f32 %v2111_v29, %v2910_v57  ;;  %v2112_v37 = vmul.f32 %v2111_v29, %v2896_v48  ;;  %v2114_v31 = vmul.f32 %v2111_v29, %v2949_v14 }
 0x1ff   : > { %v2100_v33 = vrot.slane %v2093_v51, 6  ;;  %v2197_v29 = vmul.f32 %v2195_v6, %v2910_v57 }
 0x200   : > { %v1287_v60 = vpop.permute.xlu1 %1286  ;;  %v1306_v34 = vpop.permute.xlu0 %1305  ;;  %v2118_v50 = vrot.slane %v2112_v37, 6 }
 0x201   : > { %v1291_v62 = vadd.f32 %v1287_v60, %v1270_v24  ;;  %v3755_v56 = vadd.f32 %v1306_v34, %v1290_v25  ;;  %v2099_v24 = vsel %vm1936_vm8, %v2097_v3, %v2098_v5  ;;  %v2119_v25 = vrot.slane %v2113_v28, 6 }
 0x202   : > { %1999 = vrot.lane.b32.xlu1 %v1996_v54, %s2688_s24  ;;  %2018 = vrot.lane.b32.xlu0 %v2015_v58, %s2689_s8  ;;  %s2445_s24 = sld [smem:[#allocation8 + $0x2f]]  ;;  %v2101_v60 = vsel %vm1936_vm8, %v2098_v5, %v2100_v33  ;;  %v2121_v34 = vrot.slane %v2114_v31, 6  ;;  %v2153_v58 = vstv %s2446_s26  ;;  %s2694_s26 = smov [#allocation9]  }
 0x203   : > { %v2120_v40 = vsel %vm1936_vm8, %v2118_v50, %v2119_v25  ;;  %v2155_v41 = vmul.f32 %v2153_v58, %v2910_v57  ;;  %v2154_v52 = vmul.f32 %v2153_v58, %v2896_v48  ;;  %v2156_v7 = vmul.f32 %v2153_v58, %v2949_v14 }
 0x204   : > { %v1308_v17 = vpop.permute.xlu1 %1307  ;;  %v3762_v38 = vpop.permute.xlu0 %1326  ;;  %v2122_v0 = vsel %vm1936_vm8, %v2119_v25, %v2121_v34  ;;  %v2203_v50 = vrot.slane %v2197_v29, 6 }
 0x205   : > { %v3766_v53 = vadd.f32 %v1308_v17, %v1291_v62  ;;  %v2161_v45 = vrot.slane %v2155_v41, 6  ;;  %v2160_v39 = vrot.slane %v2154_v52, 6  ;;  %v2163_v30 = vrot.slane %v2156_v7, 6 }
 0x206   : > { %2020 = vrot.lane.b32.xlu1 %v2017_v42, %s2689_s8  ;;  %2039 = vrot.lane.b32.xlu0 %v2036_v55, %s2689_s8  ;;  %v1356_v42 = vstv %s2407_s27  ;;  %v1332_v3 = vadd.f32 %v3762_v38, %v3755_v56  ;;  %v2198_v56 = vmul.f32 %v2195_v6, %v2949_v14 }
 0x207   : > { %v1357_v61 = vmul.f32 %v1356_v42, %v3035_v59 }
 0x208   : > { %v3772_v26 = vpop.permute.xlu1 %1328  ;;  %v3774_v43 = vpop.permute.xlu0 %1347  ;;  %v2132_v18 = vstv %s2445_s24  ;;  %s2230_s24 = scalar_lea.sflag [#allocation6], %s2857_s4 }
 0x209   : > { %v2133_v15 = vmul.f32 %v2132_v18, %v3035_v59  ;;  %v2134_v44 = vmul.f32 %v2132_v18, %v2932_v4  ;;  %v2135_v54 = vmul.f32 %v2132_v18, %v3067_v21  ;;  %v1364_v5 = vrot.slane %v1357_v61, 4 }
 0x20a   : > { %2041 = vrot.lane.b32.xlu1 %v2038_v35, %s2689_s8  ;;  %2060 = vrot.lane.b32.xlu0 %v2057_v8, %s2690_s15  ;;  %s2447_s8 = sld [smem:[#allocation8 + $0x30]]  ;;  %v1358_v35 = vmul.f32 %v1356_v42, %v2932_v4  ;;  %v2196_v18 = vmul.f32 %v2195_v6, %v2896_v48 }
 0x20b   : > { %v2139_v20 = vrot.slane %v2133_v15, 6  ;;  %v2140_v62 = vrot.slane %v2134_v44, 6  ;;  %v2142_v19 = vrot.slane %v2135_v54, 6  ;;  %v1353_v15 = vadd.f32 %v3774_v43, %v1332_v3 }
 0x20c   : > { %v3783_v46 = vpop.permute.xlu1 %1349  ;;  %v3785_v12 = vpop.permute.xlu0 %1403  ;;  %v1365_v28 = vrot.slane %v1358_v35, 4  ;;  %v2202_v54 = vrot.slane %v2196_v18, 6 }
 0x20d   : > { %v2141_v32 = vsel %vm1936_vm8, %v2139_v20, %v2140_v62  ;;  %v2143_v1 = vsel %vm1936_vm8, %v2140_v62, %v2142_v19 }
 0x20e   : > { %2062 = vrot.lane.b32.xlu1 %v2059_v13, %s2690_s15  ;;  %2081 = vrot.lane.b32.xlu0 %v2078_v63, %s2690_s15  ;;  %v2162_v13 = vsel %vm1936_vm8, %v2160_v39, %v2161_v45  ;;  %v1366_v34 = vsel %vm1363_vm7, %v1364_v5, %v1365_v28 }
 0x210   : > { %v3794_v11 = vpop.permute.xlu1 %1405  ;;  %v3796_v10 = vpop.permute.xlu0 %1424  ;;  %v2174_v16 = vstv %s2447_s8  ;;  %s2599_s8 = sshll.u32 %s2694_s26, 4  ;;  %s2600_s8 = int_to_ptr.vmem [resolvable:$false] %s2599_s8 }
 0x211   : > { %v2175_v49 = vmul.f32 %v2174_v16, %v3035_v59  ;;  %v2176_v27 = vmul.f32 %v2174_v16, %v2932_v4  ;;  %v2177_v9 = vmul.f32 %v2174_v16, %v3067_v21  ;;  %v1371_v16 = vadd.f32 %v1366_v34, %v1353_v15  ;;  %s2601_s27 = scalar_lea.vmem %s2600_s8, 512  ;;  %p2602_p0 = scmp.lt.s32.totalorder %s3902_s30, %s2600_s8 }
 0x212   : > { %2083 = vrot.lane.b32.xlu1 %v2080_v36, %s2690_s15  ;;  %2102 = vrot.lane.b32.xlu0 %v2099_v24, %s2691_s23  ;;  %s2408_s15 = sld [smem:[#allocation8 + $0x4d]]  ;;  %v1359_v36 = vmul.f32 %v1356_v42, %v3067_v21  ;;  %v2164_v24 = vsel %vm1936_vm8, %v2161_v45, %v2163_v30  ;;  %v2204_v42 = vsel %vm1936_vm8, %v2202_v54, %v2203_v50  ;;  %p2603_p1 = scmp.lt.s32.totalorder %s2601_s27, %s2595_s12 }
 0x213   : > { %v2181_v47 = vrot.slane %v2175_v49, 6  ;;  %v2182_v51 = vrot.slane %v2176_v27, 6  ;;  %v2184_v25 = vrot.slane %v2177_v9, 6 }
 0x214   : > { %v3805_v22 = vpop.permute.xlu1 %1426  ;;  %v3807_v23 = vpop.permute.xlu0 %1445  ;;  %p2604_p9 = por %p2603_p1, %p2602_p0 }
 0x215   : > { %v2183_v44 = vsel %vm1936_vm8, %v2181_v47, %v2182_v51  ;;  %v2185_v41 = vsel %vm1936_vm8, %v2182_v51, %v2184_v25 }
 0x216   : > { %2104 = vrot.lane.b32.xlu1 %v2101_v60, %s2691_s23  ;;  %2123 = vrot.lane.b32.xlu0 %v2120_v40, %s2691_s23  ;;  %v1333_v60 = vadd.f32 %v3772_v26, %v3766_v53  ;;  %v1367_v40 = vrot.slane %v1359_v36, 4  ;;  %p2605_p8 = pnand %p2604_p9, %p2598_p6 }
 0x218   : > { %v3816_v17 = vpop.permute.xlu1 %1447  ;;  %v3818_v55 = vpop.permute.xlu0 %1466  ;;  %v1374_v63 = vstv %s2408_s15  ;;  %v1354_v52 = vadd.f32 %v3783_v46, %v1333_v60  ;;  %v1368_v26 = vsel %vm1363_vm7, %v1365_v28, %v1367_v40 }
 0x219   : > { %v1376_v37 = vmul.f32 %v1374_v63, %v2910_v57  ;;  %v1375_v38 = vmul.f32 %v1374_v63, %v2896_v48  ;;  %v1377_v43 = vmul.f32 %v1374_v63, %v2949_v14 }
 0x21a   : > { %2125 = vrot.lane.b32.xlu1 %v2122_v0, %s2691_s23  ;;  %2144 = vrot.lane.b32.xlu0 %v2141_v32, %s2692_s5  ;;  %v2205_v0 = vrot.slane %v2198_v56, 6  ;;  %v1372_v27 = vadd.f32 %v1368_v26, %v1354_v52  ;;  %s2421_s23 = sld [smem:[#allocation8 + $0x23]] }
 0x21b   : > { %v1382_v58 = vrot.slane %v1376_v37, 4  ;;  %v1381_v19 = vrot.slane %v1375_v38, 4  ;;  %v1384_v7 = vrot.slane %v1377_v43, 4 }
 0x21c   : > { %v3829_v2 = vpop.permute.xlu1 %1468  ;;  %v3831_v8 = vpop.permute.xlu0 %1487  ;;  %v2206_v61 = vsel %vm1936_vm8, %v2203_v50, %v2205_v0 }
 0x21d   : > { %v1383_v53 = vsel %vm1363_vm7, %v1381_v19, %v1382_v58  ;;  %v1385_v46 = vsel %vm1363_vm7, %v1382_v58, %v1384_v7 }
 0x21e   : > { %2146 = vrot.lane.b32.xlu1 %v2143_v1, %s2692_s5  ;;  %2165 = vrot.lane.b32.xlu0 %v2162_v13, %s2692_s5  ;;  %v1388_v49 = vadd.f32 %v1383_v53, %v1371_v16  ;;  %v1389_v1 = vadd.f32 %v1385_v46, %v1372_v27 }
 0x220   : > { %v1490_v33 = vpop.permute.xlu1 %1489  ;;  %v1509_v31 = vpop.permute.xlu0 %1508  ;;  %v1409_v30 = vadd.f32 %v3785_v12, %v1388_v49  ;;  %v1410_v13 = vadd.f32 %v3794_v11, %v1389_v1 }
 0x222   : > { %2167 = vrot.lane.b32.xlu1 %v2164_v24, %s2692_s5  ;;  %2186 = vrot.lane.b32.xlu0 %v2183_v44, %s2693_s7  ;;  %v1430_v47 = vadd.f32 %v3796_v10, %v1409_v30  ;;  %v1431_v3 = vadd.f32 %v3805_v22, %v1410_v13  ;;  %s2422_s5 = sld [smem:[#allocation8 + $0x54]]  ;;  %v1643_v22 = vstv %s2421_s23 }
 0x223   : > { %v1644_v56 = vmul.f32 %v1643_v22, %v3035_v59  ;;  %v1646_v40 = vmul.f32 %v1643_v22, %v3067_v21 }
 0x224   : > { %v1511_v20 = vpop.permute.xlu1 %1510  ;;  %v1530_v62 = vpop.permute.xlu0 %1529  ;;  %v1451_v51 = vadd.f32 %v3807_v23, %v1430_v47  ;;  %v1452_v28 = vadd.f32 %v3816_v17, %v1431_v3  ;;  %v1645_v17 = vmul.f32 %v1643_v22, %v2932_v4 }
 0x225   : > { %v1650_v54 = vrot.slane %v1644_v56, 5  ;;  %v1653_v19 = vrot.slane %v1646_v40, 5 }
 0x226   : > { %2188 = vrot.lane.b32.xlu1 %v2185_v41, %s2693_s7  ;;  %2207 = vrot.lane.b32.xlu0 %v2204_v42, %s2693_s7  ;;  %v1472_v5 = vadd.f32 %v3818_v55, %v1451_v51  ;;  %v1473_v36 = vadd.f32 %v3829_v2, %v1452_v28  ;;  %v1651_v58 = vrot.slane %v1645_v17, 5 }
 0x228   : > { %v1532_v32 = vpop.permute.xlu1 %1531  ;;  %v1551_v45 = vpop.permute.xlu0 %1550  ;;  %v1493_v18 = vadd.f32 %v3831_v8, %v1472_v5  ;;  %v1494_v24 = vadd.f32 %v1490_v33, %v1473_v36  ;;  %v1660_v33 = vstv %s2422_s5  ;;  %v1652_v0 = vsel %vm280_vm3, %v1650_v54, %v1651_v58 }
 0x229   : > { %v1662_v43 = vmul.f32 %v1660_v33, %v2910_v57  ;;  %v1661_v52 = vmul.f32 %v1660_v33, %v2896_v48  ;;  %v1663_v26 = vmul.f32 %v1660_v33, %v2949_v14  ;;  %v1947_v33 = vstv %s2436_s28 }
 0x22a   : > { %2209 = vrot.lane.b32.xlu1 %v2206_v61, %s2693_s7  ;;  %v1514_v11 = vadd.f32 %v1509_v31, %v1493_v18  ;;  %v1515_v15 = vadd.f32 %v1511_v20, %v1494_v24  ;;  %v1654_v61 = vsel %vm280_vm3, %v1651_v58, %v1653_v19  ;;  %s2435_s7 = sld [smem:[#allocation8 + $0x2a]]  ;;  %v1949_v40 = vmul.f32 %v1947_v33, %v2910_v57 }
 0x22b   : > { %v1668_v53 = vrot.slane %v1662_v43, 5  ;;  %v1667_v27 = vrot.slane %v1661_v52, 5  ;;  %v1948_v52 = vmul.f32 %v1947_v33, %v2896_v48 }
 0x22c   : > { %v1553_v35 = vpop.permute.xlu1 %1552  ;;  %v1572_v39 = vpop.permute.xlu0 %1571  ;;  %v1535_v10 = vadd.f32 %v1530_v62, %v1514_v11  ;;  %v1536_v50 = vadd.f32 %v1532_v32, %v1515_v15 }
 0x22d   : > { %v1669_v46 = vsel %vm280_vm3, %v1667_v27, %v1668_v53 }
 0x22e   : > { %v1556_v44 = vadd.f32 %v1551_v45, %v1535_v10  ;;  %v1557_v60 = vadd.f32 %v1553_v35, %v1536_v50  ;;  %v1670_v35 = vrot.slane %v1663_v26, 5 }
 0x230   : > { %v1574_v9 = vpop.permute.xlu1 %1573  ;;  %v1593_v6 = vpop.permute.xlu0 %1592  ;;  %v1577_v55 = vadd.f32 %v1572_v39, %v1556_v44 }
 0x231   : > { %v1578_v2 = vadd.f32 %v1574_v9, %v1557_v60 }
 0x232   : > { %v1598_v34 = vadd.f32 %v1593_v6, %v1577_v55  ;;  %v1671_v6 = vsel %vm280_vm3, %v1668_v53, %v1670_v35  ;;  %v1929_v55 = vstv %s2435_s7  ;;  %v1950_v53 = vmul.f32 %v1947_v33, %v2949_v14 }
 0x233   : > { %v1930_v60 = vmul.f32 %v1929_v55, %v3035_v59 }
 0x234   : > { %v1595_v29 = vpop.permute.xlu1 %1594  ;;  %v1614_v63 = vpop.permute.xlu0 %1613  ;;  %v1957_v48 = vrot.slane %v1950_v53, 6 }
 0x235   : > { %v1619_v31 = vadd.f32 %v1614_v63, %v1598_v34  ;;  %v1599_v41 = vadd.f32 %v1595_v29, %v1578_v2  ;;  %v1931_v34 = vmul.f32 %v1929_v55, %v2932_v4  ;;  %v1955_v4 = vrot.slane %v1949_v40, 6 }
 0x237   : > { %v1958_v14 = vsel %vm1936_vm8, %v1955_v4, %v1957_v48 }
 0x238   : > { %v1616_v12 = vpop.permute.xlu1 %1615  ;;  %v1635_v37 = vpop.permute.xlu0 %1634 }
 0x239   : > { %v1640_v16 = vadd.f32 %v1635_v37, %v1619_v31  ;;  %v1620_v42 = vadd.f32 %v1616_v12, %v1599_v41  ;;  %v1938_v41 = vrot.slane %v1931_v34, 6 }
 0x23b   : > { %v1657_v45 = vadd.f32 %v1652_v0, %v1640_v16  ;;  %v1932_v16 = vmul.f32 %v1929_v55, %v3067_v21 }
 0x23c   : > { %v1637_v23 = vpop.permute.xlu1 %1636  ;;  %v1690_v25 = vpop.permute.xlu0 %1689 }
 0x23d   : > { %v1641_v49 = vadd.f32 %v1637_v23, %v1620_v42  ;;  %v1674_v9 = vadd.f32 %v1669_v46, %v1657_v45  ;;  %v1940_v57 = vrot.slane %v1932_v16, 6  ;;  %v1954_v45 = vrot.slane %v1948_v52, 6 }
 0x23f   : > { %v1658_v30 = vadd.f32 %v1654_v61, %v1641_v49  ;;  %v1695_v51 = vadd.f32 %v1690_v25, %v1674_v9  ;;  %v1956_v21 = vsel %vm1936_vm8, %v1954_v45, %v1955_v4 }
 0x240   : > { %v1692_v8 = vpop.permute.xlu1 %1691  ;;  %v1711_v38 = vpop.permute.xlu0 %1710 }
 0x241   : > { %v1675_v29 = vadd.f32 %v1671_v6, %v1658_v30  ;;  %v1716_v28 = vadd.f32 %v1711_v38, %v1695_v51 }
 0x243   : > { %v1696_v5 = vadd.f32 %v1692_v8, %v1675_v29 }
 0x244   : > { %v1713_v20 = vpop.permute.xlu1 %1712  ;;  %v1732_v62 = vpop.permute.xlu0 %1731 }
 0x245   : > { %v1737_v18 = vadd.f32 %v1732_v62, %v1716_v28  ;;  %v1717_v36 = vadd.f32 %v1713_v20, %v1696_v5  ;;  %v1937_v62 = vrot.slane %v1930_v60, 6 }
 0x248   : > { %v1734_v7 = vpop.permute.xlu1 %1733  ;;  %v1753_v32 = vpop.permute.xlu0 %1752 }
 0x249   : > { %v1758_v11 = vadd.f32 %v1753_v32, %v1737_v18  ;;  %v1738_v24 = vadd.f32 %v1734_v7, %v1717_v36  ;;  %v1939_v32 = vsel %vm1936_vm8, %v1937_v62, %v1938_v41 }
 0x24c   : > { %v1755_v39 = vpop.permute.xlu1 %1754  ;;  %v1774_v1 = vpop.permute.xlu0 %1773 }
 0x24d   : > { %v1779_v10 = vadd.f32 %v1774_v1, %v1758_v11  ;;  %v1759_v44 = vadd.f32 %v1755_v39, %v1738_v24  ;;  %v1941_v1 = vsel %vm1936_vm8, %v1938_v41, %v1940_v57 }
 0x250   : > { %v1776_v13 = vpop.permute.xlu1 %1775  ;;  %v1795_v47 = vpop.permute.xlu0 %1794 }
 0x251   : > { %v1800_v22 = vadd.f32 %v1795_v47, %v1779_v10  ;;  %v1780_v50 = vadd.f32 %v1776_v13, %v1759_v44 }
 0x254   : > { %v1797_v63 = vpop.permute.xlu1 %1796  ;;  %v1816_v3 = vpop.permute.xlu0 %1815 }
 0x255   : > { %v1821_v25 = vadd.f32 %v1816_v3, %v1800_v22  ;;  %v1801_v8 = vadd.f32 %v1797_v63, %v1780_v50 }
 0x258   : > { %v1818_v12 = vpop.permute.xlu1 %1817  ;;  %v1837_v37 = vpop.permute.xlu0 %1836 }
 0x259   : > { %v1842_v38 = vadd.f32 %v1837_v37, %v1821_v25  ;;  %v1822_v2 = vadd.f32 %v1818_v12, %v1801_v8 }
 0x25c   : > { %v1839_v23 = vpop.permute.xlu1 %1838  ;;  %v1858_v15 = vpop.permute.xlu0 %1857 }
 0x25d   : > { %v1863_v31 = vadd.f32 %v1858_v15, %v1842_v38  ;;  %v1843_v43 = vadd.f32 %v1839_v23, %v1822_v2 }
 0x260   : > { %v1860_v56 = vpop.permute.xlu1 %1859  ;;  %v1879_v17 = vpop.permute.xlu0 %1878 }
 0x261   : > { %v1884_v20 = vadd.f32 %v1879_v17, %v1863_v31  ;;  %v1864_v42 = vadd.f32 %v1860_v56, %v1843_v43 }
 0x264   : > { %v1881_v54 = vpop.permute.xlu1 %1880  ;;  %v1900_v58 = vpop.permute.xlu0 %1899 }
 0x265   : > { %v1905_v0 = vadd.f32 %v1900_v58, %v1884_v20  ;;  %v1885_v26 = vadd.f32 %v1881_v54, %v1864_v42 }
 0x268   : > { %v1902_v59 = vpop.permute.xlu1 %1901  ;;  %v1921_v19 = vpop.permute.xlu0 %1920 }
 0x269   : > { %v1926_v7 = vadd.f32 %v1921_v19, %v1905_v0  ;;  %v1906_v49 = vadd.f32 %v1902_v59, %v1885_v26 }
 0x26b   : > { %v1944_v27 = vadd.f32 %v1939_v32, %v1926_v7 }
 0x26c   : > { %v1923_v61 = vpop.permute.xlu1 %1922  ;;  %v1977_v46 = vpop.permute.xlu0 %1976 }
 0x26d   : > { %v1927_v35 = vadd.f32 %v1923_v61, %v1906_v49  ;;  %v1961_v39 = vadd.f32 %v1956_v21, %v1944_v27 }
 0x26f   : > { %v1945_v30 = vadd.f32 %v1941_v1, %v1927_v35  ;;  %v1982_v12 = vadd.f32 %v1977_v46, %v1961_v39 }
 0x270   : > { %v1979_v9 = vpop.permute.xlu1 %1978  ;;  %v1998_v6 = vpop.permute.xlu0 %1997 }
 0x271   : > { %v1962_v13 = vadd.f32 %v1958_v14, %v1945_v30  ;;  %v2003_v24 = vadd.f32 %v1998_v6, %v1982_v12 }
 0x273   : > { %v1983_v11 = vadd.f32 %v1979_v9, %v1962_v13 }
 0x274   : > { %v2000_v47 = vpop.permute.xlu1 %1999  ;;  %v2019_v51 = vpop.permute.xlu0 %2018 }
 0x275   : > { %v2024_v10 = vadd.f32 %v2019_v51, %v2003_v24  ;;  %v2004_v44 = vadd.f32 %v2000_v47, %v1983_v11 }
 0x278   : > { %v2021_v29 = vpop.permute.xlu1 %2020  ;;  %v2040_v63 = vpop.permute.xlu0 %2039 }
 0x279   : > { %v2045_v22 = vadd.f32 %v2040_v63, %v2024_v10  ;;  %v2025_v50 = vadd.f32 %v2021_v29, %v2004_v44 }
 0x27c   : > { %v2042_v3 = vpop.permute.xlu1 %2041  ;;  %v2061_v5 = vpop.permute.xlu0 %2060 }
 0x27d   : > { %v2066_v25 = vadd.f32 %v2061_v5, %v2045_v22  ;;  %v2046_v17 = vadd.f32 %v2042_v3, %v2025_v50 }
 0x280   : > { %v2063_v28 = vpop.permute.xlu1 %2062  ;;  %v2082_v18 = vpop.permute.xlu0 %2081 }
 0x281   : > { %v2087_v8 = vadd.f32 %v2082_v18, %v2066_v25  ;;  %v2067_v38 = vadd.f32 %v2063_v28, %v2046_v17 }
 0x284   : > { %v2084_v37 = vpop.permute.xlu1 %2083  ;;  %v2103_v36 = vpop.permute.xlu0 %2102 }
 0x285   : > { %v2108_v60 = vadd.f32 %v2103_v36, %v2087_v8  ;;  %v2088_v31 = vadd.f32 %v2084_v37, %v2067_v38 }
 0x288   : > { %v2105_v23 = vpop.permute.xlu1 %2104  ;;  %v2124_v15 = vpop.permute.xlu0 %2123 }
 0x289   : > { %v2129_v33 = vadd.f32 %v2124_v15, %v2108_v60  ;;  %v2109_v54 = vadd.f32 %v2105_v23, %v2088_v31 }
 0x28c   : > { %v2126_v55 = vpop.permute.xlu1 %2125  ;;  %v2145_v56 = vpop.permute.xlu0 %2144 }
 0x28d   : > { %v2150_v58 = vadd.f32 %v2145_v56, %v2129_v33  ;;  %v2130_v20 = vadd.f32 %v2126_v55, %v2109_v54 }
 0x290   : > { %v2147_v34 = vpop.permute.xlu1 %2146  ;;  %v2166_v2 = vpop.permute.xlu0 %2165 }
 0x291   : > { %v2171_v62 = vadd.f32 %v2166_v2, %v2150_v58  ;;  %v2151_v41 = vadd.f32 %v2147_v34, %v2130_v20 }
 0x294   : > { %v2168_v40 = vpop.permute.xlu1 %2167  ;;  %v2187_v43 = vpop.permute.xlu0 %2186 }
 0x295   : > { %v2192_v16 = vadd.f32 %v2187_v43, %v2171_v62  ;;  %v2172_v0 = vadd.f32 %v2168_v40, %v2151_v41 }
 0x298   : > { %v2189_v52 = vpop.permute.xlu1 %2188  ;;  %v2208_v42 = vpop.permute.xlu0 %2207 }
 0x299   : > { %v2213_v59 = vadd.f32 %v2208_v42, %v2192_v16  ;;  %v2193_v19 = vadd.f32 %v2189_v52, %v2172_v0 }
 0x29b   : > { %v2449_v4 = vmul.f32 -1.442695, %v2213_v59 }
 0x29c   : > { %v2210_v53 = vpop.permute.xlu1 %2209 }
 0x29d   : > { %2542 = vpow2.f32 %v2449_v4  ;;  %v2214_v26 = vadd.f32 %v2210_v53, %v2193_v19 }
 0x29f   : > { %v2450_v7 = vmul.f32 -1.442695, %v2214_v26 }
 0x2a1   : > { %2544 = vpow2.f32 %v2450_v7 }
 0x2a7   : > { %v2543_v32 = vpop.eup %2542 }
 0x2a8   : > { %v2221_v57 = vadd.f32 1.0, %v2543_v32 }
 0x2aa   : > { %2546 = vrcp.f32 %v2221_v57 }
 0x2ab   : > { %v2545_v45 = vpop.eup %2544 }
 0x2ac   : > { %v2222_v49 = vadd.f32 1.0, %v2545_v45 }
 0x2ae   : > { %2548 = vrcp.f32 %v2222_v49 }
 0x2b4   : > { %v2547_v27 = vpop.eup %2546 }
 0x2b5   : > { %2227 = vst.msk [vmem:[%s192_s16] sm:$0xff] %vm202_vm0, %v2547_v27 }
 0x2b8   : > { %v2549_v61 = vpop.eup %2548 }
 0x2b9   : > { %2228 = vst.msk [vmem:[%s192_s16 + $0x8] sm:$0xff] %vm202_vm0, %v2549_v61 }
 0x2ba   : > { %2608 = shalt.err (!%p2605_p8)
}
 0x2bb   : > { %s2609_s19 = scalar_lea.hbm %s3900_s20, 256  ;;  %s2613_s5 = scalar_lea.hbm %s3954_s2, 512 }
 0x2bc   : > { %p2610_p4 = scmp.ne.s32.totalorder %s3900_s20, %s2609_s19  ;;  %p2614_p5 = scmp.lt.u32.totalorder %s3900_s20, %s3954_s2 }
 0x2bd   : > { %p2615_p3 = scmp.lt.u32.totalorder %s2613_s5, %s2609_s19  ;;  %p2617_p12 = scmp.lt.u32.totalorder %s2609_s19, %s3900_s20 }
 0x2be   : > { %p2611_p10 = pnand %p2610_p4, %p3976_p2 }
 0x2bf   : > { %p2616_p7 = por %p2615_p3, %p2614_p5 }
 0x2c0   : > { %p2612_p11 = pneg %p2611_p10 }
 0x2c1   : > { %p2618_p13 = por %p2617_p12, %p2616_p7 }
 0x2c3   : > { %p2619_p6 = pnand %p2618_p13, %p2612_p11 }
 0x2c5   : > { %2622 = shalt.err (!%p2619_p6)
}
 0x2c6   : > { %s2695_s17 = smov 128   ;;  %s2696_s3 = smov 8  }
 0x2c7   : > { %2464 = dma.vmem_to_hbm [thread:$0]  (%p3976_p2), %s3902_s30, 256, %s3900_s20, %s2230_s24, %s2695_s17, %s2695_s17, %s2696_s3  }
 0x2c8 PF: > { %s2258_s16 = sand.u32 1, %s2661_s9   ;;  %p3977_p0 = scmp.ne.s32.totalorder %s3963_s22, 0 }
 0x2c9   : > { %p3978_p1 = scmp.ge.s32.totalorder %s2681_s14, 2  ;;  %s2259_s6 = scalar_lea.sflag [#allocation6], %s2258_s16 }
 0x2cb   : > { %p2475_p9 = pnand %p3978_p1, %p3977_p0 }
 0x2cd   : > { %2656 = dma.done.wait (!%p2475_p9), %s2259_s6, 256  }
 0x2ce   : > { %2658 = vsyncadd (!%p2475_p9), %s2259_s6, 4294967040  ;;  %s19_s14 = sadd.s32 1, %s2681_s14   ;;  %s3979_s9 = smov %s2665_s10 }
 0x2cf   : > { %p16_p8 = scmp.ge.s32.totalorder %s19_s14, 4   ;;  %s3980_s10 = smov %s2669_s11 }
 0x2d0   : > { %s3981_s11 = smov %s2822_s25  ;;  %s3982_s12 = smov %s2677_s13 }
 0x2d1   : > { %s3983_s13 = smov %s3985_s29  ;;  %18 = sbr.rel (!%p16_p8) target bundleno = 7 (0x7), region = 90 }
 0x2d8   :  { %2264 = vsyncpa [#allocation5], 1 }
 0x2d9   :  { %2266 = vsyncpa [#allocation5 + $0x1], 1 }
 0x2da   :  { %2267 = vsyncpa [#allocation6], 1 }
 0x2db   :  { %2269 = vsyncpa [#allocation6 + $0x1], 1 }
 0x2dc   :  { %2270 = vsyncpa [#allocation7], 1 }
 0x2dd   :  { %2272 = vsyncpa [#allocation7 + $0x1], 1 }

</bundles_post_ra>
